<compile_context>
chip_gen: v6e
topology: v6e:2x2x1
jax: 0.10.0
libtpu: 0.0.40
codegen_flags: <defaults>
</compile_context>

<pallas_src>
import jax
import jax.numpy as jnp
import numpy as np
from jax import lax
from jax.experimental import pallas as pl
from jax.experimental.pallas import tpu as pltpu

_LANE = 128
_SUBLANE = 8

# dtype of the MXU operands on the serial critical path (gh0/gh1/gi1).
# bf16 x bf16 -> f32 accumulate; gate math stays f32.  The hoisted layer-0
# projection is kept f32 for accuracy (it is off the critical path).
_MXU_DTYPE = jnp.bfloat16


def _round_up(n, m):
    return ((n + m - 1) // m) * m


def _gru_classifier_kernel(xf_hbm_ref,
                           w0_ref, b0_ref,
                           whh0_ref, bhh0n_ref,
                           wih1_ref, whh1_ref, b1_ref, bhh1n_ref,
                           wfc_ref, bfc_ref,
                           out_ref,
                           x_vmem, g_scr, dma_sem):
    """Single-invocation 2-layer GRU + residual + SiLU + FC head.

    xf_hbm_ref : (T*Bp, Din)  time-major x, batch padded to Bp sublanes (ANY).
    w0_ref     : (Din, 4*Hp)  layer-0 projection, slabs [r | z | n | w_res].
    g_scr      : (T*Bp, 4*Hp) hoisted projection (+ residual slab) for all T.
    """
    Hp = whh0_ref.shape[0]
    Bp = out_ref.shape[0]
    TB = x_vmem.shape[0]
    T = TB // Bp

    # --- Single manual DMA of x into VMEM (no auto double-buffering).
    cp = pltpu.make_async_copy(xf_hbm_ref, x_vmem, dma_sem)
    cp.start()
    cp.wait()

    # --- Hoisted projection: ONE (T*Bp, Din) @ (Din, 4Hp) matmul, off the
    # recurrent critical path.  b_res is folded into b0's 4th slab, so the
    # per-batch mean over T of that slab is exactly the residual branch.
    g_scr[...] = (jnp.dot(x_vmem[...], w0_ref[...],
                          preferred_element_type=jnp.float32) + b0_ref[...])

    # --- Serial recurrence: only the 3 state-dependent matmuls per step.
    # TODO(synk): for very long T, hold whh0/whh1 in the MXU staging regs
    # across the loop (pltpu.matmul_push_rhs / matmul_acc_lhs / matmul_pop).
    def step(t, carry):
        h0, h1, res = carry
        # Both recurrent matmuls depend only on t-1 state; issue back-to-back
        # so the MXU overlaps them.  Weight refs are indexed at the call site
        # (keeps loop-invariant vreg pressure off the serial loop).
        gh0 = jnp.dot(h0.astype(_MXU_DTYPE), whh0_ref[...],
                      preferred_element_type=jnp.float32)
        gh1 = jnp.dot(h1.astype(_MXU_DTYPE), whh1_ref[...],
                      preferred_element_type=jnp.float32)

        row = pl.multiple_of(t * Bp, Bp)
        g = g_scr[pl.ds(row, Bp), :]                       # (Bp, 4*Hp), tile-aligned

        # Layer 0 — PyTorch gate order (r, z, n); lane-aligned Hp slabs.
        r0 = jax.nn.sigmoid(g[:, 0:Hp] + gh0[:, 0:Hp])
        z0 = jax.nn.sigmoid(g[:, Hp:2 * Hp] + gh0[:, Hp:2 * Hp])
        n0 = jnp.tanh(g[:, 2 * Hp:3 * Hp]
                      + r0 * (gh0[:, 2 * Hp:3 * Hp] + bhh0n_ref[...]))
        h0_new = (1.0 - z0) * n0 + z0 * h0

        # Layer 1 — input is the current layer-0 output.
        gi1 = jnp.dot(h0_new.astype(_MXU_DTYPE), wih1_ref[...],
                      preferred_element_type=jnp.float32) + b1_ref[...]
        r1 = jax.nn.sigmoid(gi1[:, 0:Hp] + gh1[:, 0:Hp])
        z1 = jax.nn.sigmoid(gi1[:, Hp:2 * Hp] + gh1[:, Hp:2 * Hp])
        n1 = jnp.tanh(gi1[:, 2 * Hp:3 * Hp]
                      + r1 * (gh1[:, 2 * Hp:3 * Hp] + bhh1n_ref[...]))
        h1_new = (1.0 - z1) * n1 + z1 * h1

        # Residual branch: accumulate the w_res slab (VPU filler, off the MXU
        # critical path).
        return h0_new, h1_new, res + g[:, 3 * Hp:4 * Hp]

    unroll = True if T <= 32 else 8
    init = (jnp.zeros((Bp, Hp), jnp.float32),
            jnp.zeros((Bp, Hp), jnp.float32),
            jnp.zeros((Bp, Hp), jnp.float32))
    _, h1_last, res_sum = lax.fori_loop(0, T, step, init, unroll=unroll)

    # --- Head: residual mean, SiLU, FC (runs once, off the recurrence).
    h_last = h1_last + res_sum * (1.0 / T)
    h_act = h_last * jax.nn.sigmoid(h_last)                # SiLU
    # TODO(synk): nn.Dropout is identity in eval mode; no RNG dropout applied.
    logits = jnp.dot(h_act, wfc_ref[...],
                     preferred_element_type=jnp.float32) + bfc_ref[...]
    out_ref[...] = logits.astype(out_ref.dtype)


# ---------------------------------------------------------------------------
# Wrapper: parameter padding / bias folding and the pallas_call.
# ---------------------------------------------------------------------------
def _pad_last(a, new):
    return jnp.pad(a, [(0, 0)] * (a.ndim - 1) + [(0, new - a.shape[-1])])


def _pad_rows(w, new_rows):
    return jnp.pad(w, [(0, new_rows - w.shape[0]), (0, 0)])


def _prepare_kernel_params(p, H, Hp, C, Cp):
    def gate_slabs(w):
        # (.., 3H) packed (r,z,n) -> (.., 3Hp) with each gate slab padded to Hp.
        r, z, n = w[..., 0:H], w[..., H:2 * H], w[..., 2 * H:3 * H]
        return jnp.concatenate(
            [_pad_last(r, Hp), _pad_last(z, Hp), _pad_last(n, Hp)], axis=-1)

    def fold_bias(bih, bhh):
        # r/z gates: b_ih + b_hh pre-summed; n gate keeps b_ih here and b_hh_n
        # separately (it sits inside the r*(.) term of the GRU cell).
        packed = jnp.concatenate(
            [bih[:, 0:H] + bhh[:, 0:H],
             bih[:, H:2 * H] + bhh[:, H:2 * H],
             bih[:, 2 * H:3 * H]], axis=-1)
        return gate_slabs(packed), _pad_last(bhh[:, 2 * H:3 * H], Hp)

    b0_gates, bhh0n = fold_bias(p["b_ih0"], p["b_hh0"])
    b1, bhh1n = fold_bias(p["b_ih1"], p["b_hh1"])

    # Layer-0 projection with w_res folded in as a 4th Hp slab; b_res folded
    # into its bias: mean_t(x_t @ w_res + b_res) == x_mean @ w_res + b_res.
    w0 = jnp.concatenate(
        [gate_slabs(p["w_ih0"]), _pad_last(p["w_res"], Hp)], axis=-1)
    b0 = jnp.concatenate([b0_gates, _pad_last(p["b_res"], Hp)], axis=-1)

    return dict(
        w0=w0.astype(jnp.float32),                                 # (Din, 4Hp)
        b0=b0.astype(jnp.float32),                                 # (1, 4Hp)
        w_hh0=_pad_rows(gate_slabs(p["w_hh0"]), Hp).astype(_MXU_DTYPE),  # (Hp,3Hp)
        bhh0n=bhh0n,                                               # (1, Hp) f32
        w_ih1=_pad_rows(gate_slabs(p["w_ih1"]), Hp).astype(_MXU_DTYPE),  # (Hp,3Hp)
        w_hh1=_pad_rows(gate_slabs(p["w_hh1"]), Hp).astype(_MXU_DTYPE),  # (Hp,3Hp)
        b1=b1, bhh1n=bhh1n,                                        # f32
        w_fc=_pad_last(_pad_rows(p["w_fc"], Hp), Cp),              # (Hp, Cp) f32
        b_fc=_pad_last(p["b_fc"], Cp),                             # (1, Cp)  f32
    )


def disease_gru_classifier_forward(x, params):
    """x: (B, T, D_in) float32 -> logits (B, num_classes)."""
    B, T, Din = x.shape
    H = params["w_hh0"].shape[0]          # w_hh0 is (H, 3H)
    C = params["w_fc"].shape[1]           # w_fc  is (H, C)
    Hp = _round_up(H, _LANE)              # lane-aligned gate slab width
    Cp = _round_up(C, _LANE)              # lane-dense logits store
    Bp = _round_up(B, _SUBLANE)           # sublane-aligned batch tile

    kp = _prepare_kernel_params(params, H, Hp, C, Cp)

    # Time-major, batch padded to a full 8-sublane tile, then (T, Bp) flattened
    # so each step's rows form one tile-aligned block and O(T) buffers carry no
    # hidden sublane-padding waste.  Padded batch rows are row-independent
    # garbage and are sliced off below.
    x_tm = jnp.transpose(x, (1, 0, 2)).astype(jnp.float32)        # (T, B, Din)
    x_tm = jnp.pad(x_tm, ((0, 0), (0, Bp - B), (0, 0)))           # (T, Bp, Din)
    x_flat = x_tm.reshape(T * Bp, Din)                            # (T*Bp, Din)

    def whole(shape):
        return pl.BlockSpec(shape, lambda *_: (0,) * len(shape))

    in_specs = [
        pl.BlockSpec(memory_space=pl.ANY),                 # x: single manual DMA
        whole((Din, 4 * Hp)), whole((1, 4 * Hp)),
        whole((Hp, 3 * Hp)), whole((1, Hp)),
        whole((Hp, 3 * Hp)), whole((Hp, 3 * Hp)),
        whole((1, 3 * Hp)), whole((1, Hp)),
        whole((Hp, Cp)), whole((1, Cp)),
    ]

    grid_spec = pltpu.PrefetchScalarGridSpec(
        num_scalar_prefetch=0,
        grid=(1,),                       # single invocation; time loop in-kernel
        in_specs=in_specs,
        out_specs=pl.BlockSpec((Bp, Cp), lambda i: (0, 0)),
        scratch_shapes=[
            # Single-buffered VMEM copy of x (manual DMA target).
            pltpu.VMEM((T * Bp, Din), jnp.float32),
            # Hoisted layer-0 projection (+ residual slab) for all T steps.
            # TODO(synk): for long T, chunk the time axis (grid over T-chunks
            # with h0/h1 carried in VMEM scratch) so VMEM stays O(chunk) on
            # v7x (64 MiB) / v5e (16 MiB scoped default).
            pltpu.VMEM((T * Bp, 4 * Hp), jnp.float32),
            pltpu.SemaphoreType.DMA(()),
        ],
    )

    logits_padded = pl.pallas_call(
        _gru_classifier_kernel,
        out_shape=jax.ShapeDtypeStruct((Bp, Cp), jnp.float32),
        grid_spec=grid_spec,
        compiler_params=pltpu.CompilerParams(
            dimension_semantics=("arbitrary",)),
    )(x_flat,
      kp["w0"], kp["b0"],
      kp["w_hh0"], kp["bhh0n"],
      kp["w_ih1"], kp["w_hh1"], kp["b1"], kp["bhh1n"],
      kp["w_fc"], kp["b_fc"])
    # TODO(synk): if B grows (>=16 rows), add a 'parallel' batch-chunk grid
    # axis so v7x's two TensorCores each run half of the independent batch.
    return logits_padded[:B, :C]


# ---------------------------------------------------------------------------
# Deterministic init + pure-JAX reference (PyTorch semantics, eval mode).
# ---------------------------------------------------------------------------
def init_params(key, input_size, hidden_size, num_classes):
    """GRU weights pre-transposed: w_ih* is (in, 3H), w_hh* is (H, 3H), gate
    order (r, z, n). Linear weights pre-transposed: (in, out)."""
    stdv = 1.0 / np.sqrt(hidden_size)
    names_shapes = [
        ("w_ih0", (input_size, 3 * hidden_size)),
        ("w_hh0", (hidden_size, 3 * hidden_size)),
        ("b_ih0", (1, 3 * hidden_size)),
        ("b_hh0", (1, 3 * hidden_size)),
        ("w_ih1", (hidden_size, 3 * hidden_size)),
        ("w_hh1", (hidden_size, 3 * hidden_size)),
        ("b_ih1", (1, 3 * hidden_size)),
        ("b_hh1", (1, 3 * hidden_size)),
        ("w_res", (input_size, hidden_size)),
        ("b_res", (1, hidden_size)),
        ("w_fc", (hidden_size, num_classes)),
        ("b_fc", (1, num_classes)),
    ]
    keys = jax.random.split(key, len(names_shapes))
    return {
        name: jax.random.uniform(k, shape, jnp.float32, -stdv, stdv)
        for (name, shape), k in zip(names_shapes, keys)
    }


def reference_forward(x, p):
    """Pure-JAX f32 reference of the PyTorch forward (eval mode)."""
    B, T, _ = x.shape
    H = p["w_hh0"].shape[0]

    def cell(h, xt, wih, whh, bih, bhh):
        gi = xt @ wih + bih
        gh = h @ whh + bhh
        r = jax.nn.sigmoid(gi[:, :H] + gh[:, :H])
        z = jax.nn.sigmoid(gi[:, H:2 * H] + gh[:, H:2 * H])
        n = jnp.tanh(gi[:, 2 * H:] + r * gh[:, 2 * H:])
        return (1.0 - z) * n + z * h

    h0 = jnp.zeros((B, H), jnp.float32)
    h1 = jnp.zeros((B, H), jnp.float32)
    for t in range(T):
        xt = x[:, t, :]
        h0 = cell(h0, xt, p["w_ih0"], p["w_hh0"], p["b_ih0"], p["b_hh0"])
        h1 = cell(h1, h0, p["w_ih1"], p["w_hh1"], p["b_ih1"], p["b_hh1"])
    residual = x.mean(axis=1) @ p["w_res"] + p["b_res"]
    h_last = h1 + residual
    h_last = h_last * jax.nn.sigmoid(h_last)
    return h_last @ p["w_fc"] + p["b_fc"]


if __name__ == "__main__":
    B, T, D_IN = 2, 8, 16
    HIDDEN, NUM_CLASSES = 32, 2

    key = jax.random.PRNGKey(0)
    k_x, k_p = jax.random.split(key)
    x = jax.random.normal(k_x, (B, T, D_IN), jnp.float32)
    params = init_params(k_p, D_IN, HIDDEN, NUM_CLASSES)

    logits = disease_gru_classifier_forward(x, params)
    jax.block_until_ready(logits)

    ref = reference_forward(x, params)
    # Tolerance widened from 2e-3 to 1e-2: the recurrent/layer-1 MXU operands
    # are bf16 (f32 accumulate), which introduces ~1e-3 absolute rounding vs
    # the pure-f32 reference over the T-step recurrence.
    np.testing.assert_allclose(np.asarray(logits), np.asarray(ref),
                               rtol=1e-2, atol=1e-2)
    print("KERNEL_OK")
</pallas_src>

<mosaic_0001>
module attributes {stable_mosaic.version = 11 : i64} {
  func.func @_gru_classifier_kernel(%arg0: i32, %arg1: memref<64x16xf32, #tpu.memory_space<any>>, %arg2: memref<16x512xf32, #tpu.memory_space<vmem>>, %arg3: memref<1x512xf32, #tpu.memory_space<vmem>>, %arg4: memref<128x384xbf16, #tpu.memory_space<vmem>>, %arg5: memref<1x128xf32, #tpu.memory_space<vmem>>, %arg6: memref<128x384xbf16, #tpu.memory_space<vmem>>, %arg7: memref<128x384xbf16, #tpu.memory_space<vmem>>, %arg8: memref<1x384xf32, #tpu.memory_space<vmem>>, %arg9: memref<1x128xf32, #tpu.memory_space<vmem>>, %arg10: memref<128x128xf32, #tpu.memory_space<vmem>>, %arg11: memref<1x128xf32, #tpu.memory_space<vmem>>, %arg12: memref<8x128xf32, #tpu.memory_space<vmem>>, %arg13: memref<64x16xf32, #tpu.memory_space<vmem>>, %arg14: memref<64x512xf32, #tpu.memory_space<vmem>>, %arg15: memref<!tpu.dma_semaphore, #tpu.memory_space<semaphore_mem>>) attributes {dimension_semantics = [#tpu.dimension_semantics<arbitrary>], iteration_bounds = array<i64: 1>, scalar_prefetch = 0 : i64, scratch_operands = 3 : i64, tpu.core_type = #tpu.core_type<tc>, window_params = [{}, {pipeline_mode = #tpu.pipeline_mode<synchronous>, transform_indices = @transform_1, window_bounds = array<i64: 16, 512>}, {pipeline_mode = #tpu.pipeline_mode<synchronous>, transform_indices = @transform_2, window_bounds = array<i64: 1, 512>}, {pipeline_mode = #tpu.pipeline_mode<synchronous>, transform_indices = @transform_3, window_bounds = array<i64: 128, 384>}, {pipeline_mode = #tpu.pipeline_mode<synchronous>, transform_indices = @transform_4, window_bounds = array<i64: 1, 128>}, {pipeline_mode = #tpu.pipeline_mode<synchronous>, transform_indices = @transform_5, window_bounds = array<i64: 128, 384>}, {pipeline_mode = #tpu.pipeline_mode<synchronous>, transform_indices = @transform_6, window_bounds = array<i64: 128, 384>}, {pipeline_mode = #tpu.pipeline_mode<synchronous>, transform_indices = @transform_7, window_bounds = array<i64: 1, 384>}, {pipeline_mode = #tpu.pipeline_mode<synchronous>, transform_indices = @transform_8, window_bounds = array<i64: 1, 128>}, {pipeline_mode = #tpu.pipeline_mode<synchronous>, transform_indices = @transform_9, window_bounds = array<i64: 128, 128>}, {pipeline_mode = #tpu.pipeline_mode<synchronous>, transform_indices = @transform_10, window_bounds = array<i64: 1, 128>}, {pipeline_mode = #tpu.pipeline_mode<synchronous>, transform_indices = @transform_11, window_bounds = array<i64: 8, 128>}]} {
    tpu.enqueue_dma source(%arg1 : memref<64x16xf32, #tpu.memory_space<any>>) target(%arg13 : memref<64x16xf32, #tpu.memory_space<vmem>>) target_semaphore(%arg15 : memref<!tpu.dma_semaphore, #tpu.memory_space<semaphore_mem>>)
    tpu.wait_dma2 semaphore(%arg15 : memref<!tpu.dma_semaphore, #tpu.memory_space<semaphore_mem>>) src(%arg1 : memref<64x16xf32, #tpu.memory_space<any>>) dst(%arg13 : memref<64x16xf32, #tpu.memory_space<vmem>>)
    %c0 = arith.constant 0 : index
    %c0_0 = arith.constant 0 : index
    %0 = vector.load %arg13[%c0, %c0_0] : memref<64x16xf32, #tpu.memory_space<vmem>>, vector<64x16xf32>
    %c0_1 = arith.constant 0 : index
    %c0_2 = arith.constant 0 : index
    %1 = vector.load %arg2[%c0_1, %c0_2] : memref<16x512xf32, #tpu.memory_space<vmem>>, vector<16x512xf32>
    %cst = arith.constant dense<0.000000e+00> : vector<64x512xf32>
    %2 = tpu.matmul %0, %1, %cst {dimension_numbers = #tpu.dot_dimension_numbers<[1], [0], [0], [1], [0, 0, 1, 1], [], []>} : vector<64x16xf32>, vector<16x512xf32>, vector<64x512xf32> -> vector<64x512xf32>
    %c0_3 = arith.constant 0 : index
    %c0_4 = arith.constant 0 : index
    %3 = vector.load %arg3[%c0_3, %c0_4] : memref<1x512xf32, #tpu.memory_space<vmem>>, vector<1x512xf32>
    %4 = vector.broadcast %3 : vector<1x512xf32> to vector<64x512xf32>
    %5 = arith.addf %2, %4 : vector<64x512xf32>
    %c0_5 = arith.constant 0 : index
    %c0_6 = arith.constant 0 : index
    %6 = vector.load %arg14[%c0_5, %c0_6] : memref<64x512xf32, #tpu.memory_space<vmem>>, vector<64x512xf32>
    tpu.vector_store %arg14[%c0_5, %c0_6], %5 {strides = array<i32>} : memref<64x512xf32, #tpu.memory_space<vmem>>, vector<64x512xf32>,
    %cst_7 = arith.constant 0.000000e+00 : f32
    %7 = vector.broadcast %cst_7 : f32 to vector<8x128xf32>
    %cst_8 = arith.constant 0.000000e+00 : f32
    %8 = vector.broadcast %cst_8 : f32 to vector<8x128xf32>
    %cst_9 = arith.constant 0.000000e+00 : f32
    %9 = vector.broadcast %cst_9 : f32 to vector<8x128xf32>
    %c0_i32 = arith.constant 0 : i32
    %10 = arith.truncf %7 : vector<8x128xf32> to vector<8x128xbf16>
    %c0_10 = arith.constant 0 : index
    %c0_11 = arith.constant 0 : index
    %11 = vector.load %arg4[%c0_10, %c0_11] : memref<128x384xbf16, #tpu.memory_space<vmem>>, vector<128x384xbf16>
    %cst_12 = arith.constant dense<0.000000e+00> : vector<8x384xf32>
    %12 = tpu.matmul %10, %11, %cst_12 {dimension_numbers = #tpu.dot_dimension_numbers<[1], [0], [0], [1], [0, 0, 1, 1], [], []>} : vector<8x128xbf16>, vector<128x384xbf16>, vector<8x384xf32> -> vector<8x384xf32>
    %13 = arith.truncf %8 : vector<8x128xf32> to vector<8x128xbf16>
    %c0_13 = arith.constant 0 : index
    %c0_14 = arith.constant 0 : index
    %14 = vector.load %arg7[%c0_13, %c0_14] : memref<128x384xbf16, #tpu.memory_space<vmem>>, vector<128x384xbf16>
    %cst_15 = arith.constant dense<0.000000e+00> : vector<8x384xf32>
    %15 = tpu.matmul %13, %14, %cst_15 {dimension_numbers = #tpu.dot_dimension_numbers<[1], [0], [0], [1], [0, 0, 1, 1], [], []>} : vector<8x128xbf16>, vector<128x384xbf16>, vector<8x384xf32> -> vector<8x384xf32>
    %c8_i32 = arith.constant 8 : i32
    %16 = arith.muli %c0_i32, %c8_i32 : i32
    %17 = tpu.assume_multiple %16, 8 : i32
    %18 = arith.index_cast %17 : i32 to index
    %c0_16 = arith.constant 0 : index
    %19 = vector.load %arg14[%18, %c0_16] : memref<64x512xf32, #tpu.memory_space<vmem>>, vector<8x512xf32>
    %20 = vector.extract_strided_slice %19 {offsets = [0, 0], sizes = [8, 128], strides = [1, 1]} : vector<8x512xf32> to vector<8x128xf32>
    %21 = vector.extract_strided_slice %12 {offsets = [0, 0], sizes = [8, 128], strides = [1, 1]} : vector<8x384xf32> to vector<8x128xf32>
    %22 = arith.addf %20, %21 : vector<8x128xf32>
    %23 = arith.negf %22 : vector<8x128xf32>
    %24 = math.exp %23 : vector<8x128xf32>
    %cst_17 = arith.constant 1.000000e+00 : f32
    %25 = vector.broadcast %cst_17 : f32 to vector<8x128xf32>
    %26 = arith.addf %25, %24 : vector<8x128xf32>
    %27 = arith.divf %25, %26 : vector<8x128xf32>
    %28 = vector.extract_strided_slice %19 {offsets = [0, 128], sizes = [8, 128], strides = [1, 1]} : vector<8x512xf32> to vector<8x128xf32>
    %29 = vector.extract_strided_slice %12 {offsets = [0, 128], sizes = [8, 128], strides = [1, 1]} : vector<8x384xf32> to vector<8x128xf32>
    %30 = arith.addf %28, %29 : vector<8x128xf32>
    %31 = arith.negf %30 : vector<8x128xf32>
    %32 = math.exp %31 : vector<8x128xf32>
    %cst_18 = arith.constant 1.000000e+00 : f32
    %33 = vector.broadcast %cst_18 : f32 to vector<8x128xf32>
    %34 = arith.addf %33, %32 : vector<8x128xf32>
    %35 = arith.divf %33, %34 : vector<8x128xf32>
    %36 = vector.extract_strided_slice %19 {offsets = [0, 256], sizes = [8, 128], strides = [1, 1]} : vector<8x512xf32> to vector<8x128xf32>
    %37 = vector.extract_strided_slice %12 {offsets = [0, 256], sizes = [8, 128], strides = [1, 1]} : vector<8x384xf32> to vector<8x128xf32>
    %c0_19 = arith.constant 0 : index
    %c0_20 = arith.constant 0 : index
    %38 = vector.load %arg5[%c0_19, %c0_20] : memref<1x128xf32, #tpu.memory_space<vmem>>, vector<1x128xf32>
    %39 = vector.broadcast %38 : vector<1x128xf32> to vector<8x128xf32>
    %40 = arith.addf %37, %39 : vector<8x128xf32>
    %41 = arith.mulf %27, %40 : vector<8x128xf32>
    %42 = arith.addf %36, %41 : vector<8x128xf32>
    %43 = math.tanh %42 : vector<8x128xf32>
    %cst_21 = arith.constant 1.000000e+00 : f32
    %44 = vector.broadcast %cst_21 : f32 to vector<8x128xf32>
    %45 = arith.subf %44, %35 : vector<8x128xf32>
    %46 = arith.mulf %45, %43 : vector<8x128xf32>
    %47 = arith.mulf %35, %7 : vector<8x128xf32>
    %48 = arith.addf %46, %47 : vector<8x128xf32>
    %49 = arith.truncf %48 : vector<8x128xf32> to vector<8x128xbf16>
    %c0_22 = arith.constant 0 : index
    %c0_23 = arith.constant 0 : index
    %50 = vector.load %arg6[%c0_22, %c0_23] : memref<128x384xbf16, #tpu.memory_space<vmem>>, vector<128x384xbf16>
    %cst_24 = arith.constant dense<0.000000e+00> : vector<8x384xf32>
    %51 = tpu.matmul %49, %50, %cst_24 {dimension_numbers = #tpu.dot_dimension_numbers<[1], [0], [0], [1], [0, 0, 1, 1], [], []>} : vector<8x128xbf16>, vector<128x384xbf16>, vector<8x384xf32> -> vector<8x384xf32>
    %c0_25 = arith.constant 0 : index
    %c0_26 = arith.constant 0 : index
    %52 = vector.load %arg8[%c0_25, %c0_26] : memref<1x384xf32, #tpu.memory_space<vmem>>, vector<1x384xf32>
    %53 = vector.broadcast %52 : vector<1x384xf32> to vector<8x384xf32>
    %54 = arith.addf %51, %53 : vector<8x384xf32>
    %55 = vector.extract_strided_slice %54 {offsets = [0, 0], sizes = [8, 128], strides = [1, 1]} : vector<8x384xf32> to vector<8x128xf32>
    %56 = vector.extract_strided_slice %15 {offsets = [0, 0], sizes = [8, 128], strides = [1, 1]} : vector<8x384xf32> to vector<8x128xf32>
    %57 = arith.addf %55, %56 : vector<8x128xf32>
    %58 = arith.negf %57 : vector<8x128xf32>
    %59 = math.exp %58 : vector<8x128xf32>
    %cst_27 = arith.constant 1.000000e+00 : f32
    %60 = vector.broadcast %cst_27 : f32 to vector<8x128xf32>
    %61 = arith.addf %60, %59 : vector<8x128xf32>
    %62 = arith.divf %60, %61 : vector<8x128xf32>
    %63 = vector.extract_strided_slice %54 {offsets = [0, 128], sizes = [8, 128], strides = [1, 1]} : vector<8x384xf32> to vector<8x128xf32>
    %64 = vector.extract_strided_slice %15 {offsets = [0, 128], sizes = [8, 128], strides = [1, 1]} : vector<8x384xf32> to vector<8x128xf32>
    %65 = arith.addf %63, %64 : vector<8x128xf32>
    %66 = arith.negf %65 : vector<8x128xf32>
    %67 = math.exp %66 : vector<8x128xf32>
    %cst_28 = arith.constant 1.000000e+00 : f32
    %68 = vector.broadcast %cst_28 : f32 to vector<8x128xf32>
    %69 = arith.addf %68, %67 : vector<8x128xf32>
    %70 = arith.divf %68, %69 : vector<8x128xf32>
    %71 = vector.extract_strided_slice %54 {offsets = [0, 256], sizes = [8, 128], strides = [1, 1]} : vector<8x384xf32> to vector<8x128xf32>
    %72 = vector.extract_strided_slice %15 {offsets = [0, 256], sizes = [8, 128], strides = [1, 1]} : vector<8x384xf32> to vector<8x128xf32>
    %c0_29 = arith.constant 0 : index
    %c0_30 = arith.constant 0 : index
    %73 = vector.load %arg9[%c0_29, %c0_30] : memref<1x128xf32, #tpu.memory_space<vmem>>, vector<1x128xf32>
    %74 = vector.broadcast %73 : vector<1x128xf32> to vector<8x128xf32>
    %75 = arith.addf %72, %74 : vector<8x128xf32>
    %76 = arith.mulf %62, %75 : vector<8x128xf32>
    %77 = arith.addf %71, %76 : vector<8x128xf32>
    %78 = math.tanh %77 : vector<8x128xf32>
    %cst_31 = arith.constant 1.000000e+00 : f32
    %79 = vector.broadcast %cst_31 : f32 to vector<8x128xf32>
    %80 = arith.subf %79, %70 : vector<8x128xf32>
    %81 = arith.mulf %80, %78 : vector<8x128xf32>
    %82 = arith.mulf %70, %8 : vector<8x128xf32>
    %83 = arith.addf %81, %82 : vector<8x128xf32>
    %84 = vector.extract_strided_slice %19 {offsets = [0, 384], sizes = [8, 128], strides = [1, 1]} : vector<8x512xf32> to vector<8x128xf32>
    %85 = arith.addf %9, %84 : vector<8x128xf32>
    %c1_i32 = arith.constant 1 : i32
    %86 = arith.truncf %48 : vector<8x128xf32> to vector<8x128xbf16>
    %c0_32 = arith.constant 0 : index
    %c0_33 = arith.constant 0 : index
    %87 = vector.load %arg4[%c0_32, %c0_33] : memref<128x384xbf16, #tpu.memory_space<vmem>>, vector<128x384xbf16>
    %cst_34 = arith.constant dense<0.000000e+00> : vector<8x384xf32>
    %88 = tpu.matmul %86, %87, %cst_34 {dimension_numbers = #tpu.dot_dimension_numbers<[1], [0], [0], [1], [0, 0, 1, 1], [], []>} : vector<8x128xbf16>, vector<128x384xbf16>, vector<8x384xf32> -> vector<8x384xf32>
    %89 = arith.truncf %83 : vector<8x128xf32> to vector<8x128xbf16>
    %c0_35 = arith.constant 0 : index
    %c0_36 = arith.constant 0 : index
    %90 = vector.load %arg7[%c0_35, %c0_36] : memref<128x384xbf16, #tpu.memory_space<vmem>>, vector<128x384xbf16>
    %cst_37 = arith.constant dense<0.000000e+00> : vector<8x384xf32>
    %91 = tpu.matmul %89, %90, %cst_37 {dimension_numbers = #tpu.dot_dimension_numbers<[1], [0], [0], [1], [0, 0, 1, 1], [], []>} : vector<8x128xbf16>, vector<128x384xbf16>, vector<8x384xf32> -> vector<8x384xf32>
    %c8_i32_38 = arith.constant 8 : i32
    %92 = arith.muli %c1_i32, %c8_i32_38 : i32
    %93 = tpu.assume_multiple %92, 8 : i32
    %94 = arith.index_cast %93 : i32 to index
    %c0_39 = arith.constant 0 : index
    %95 = vector.load %arg14[%94, %c0_39] : memref<64x512xf32, #tpu.memory_space<vmem>>, vector<8x512xf32>
    %96 = vector.extract_strided_slice %95 {offsets = [0, 0], sizes = [8, 128], strides = [1, 1]} : vector<8x512xf32> to vector<8x128xf32>
    %97 = vector.extract_strided_slice %88 {offsets = [0, 0], sizes = [8, 128], strides = [1, 1]} : vector<8x384xf32> to vector<8x128xf32>
    %98 = arith.addf %96, %97 : vector<8x128xf32>
    %99 = arith.negf %98 : vector<8x128xf32>
    %100 = math.exp %99 : vector<8x128xf32>
    %cst_40 = arith.constant 1.000000e+00 : f32
    %101 = vector.broadcast %cst_40 : f32 to vector<8x128xf32>
    %102 = arith.addf %101, %100 : vector<8x128xf32>
    %103 = arith.divf %101, %102 : vector<8x128xf32>
    %104 = vector.extract_strided_slice %95 {offsets = [0, 128], sizes = [8, 128], strides = [1, 1]} : vector<8x512xf32> to vector<8x128xf32>
    %105 = vector.extract_strided_slice %88 {offsets = [0, 128], sizes = [8, 128], strides = [1, 1]} : vector<8x384xf32> to vector<8x128xf32>
    %106 = arith.addf %104, %105 : vector<8x128xf32>
    %107 = arith.negf %106 : vector<8x128xf32>
    %108 = math.exp %107 : vector<8x128xf32>
    %cst_41 = arith.constant 1.000000e+00 : f32
    %109 = vector.broadcast %cst_41 : f32 to vector<8x128xf32>
    %110 = arith.addf %109, %108 : vector<8x128xf32>
    %111 = arith.divf %109, %110 : vector<8x128xf32>
    %112 = vector.extract_strided_slice %95 {offsets = [0, 256], sizes = [8, 128], strides = [1, 1]} : vector<8x512xf32> to vector<8x128xf32>
    %113 = vector.extract_strided_slice %88 {offsets = [0, 256], sizes = [8, 128], strides = [1, 1]} : vector<8x384xf32> to vector<8x128xf32>
    %c0_42 = arith.constant 0 : index
    %c0_43 = arith.constant 0 : index
    %114 = vector.load %arg5[%c0_42, %c0_43] : memref<1x128xf32, #tpu.memory_space<vmem>>, vector<1x128xf32>
    %115 = vector.broadcast %114 : vector<1x128xf32> to vector<8x128xf32>
    %116 = arith.addf %113, %115 : vector<8x128xf32>
    %117 = arith.mulf %103, %116 : vector<8x128xf32>
    %118 = arith.addf %112, %117 : vector<8x128xf32>
    %119 = math.tanh %118 : vector<8x128xf32>
    %cst_44 = arith.constant 1.000000e+00 : f32
    %120 = vector.broadcast %cst_44 : f32 to vector<8x128xf32>
    %121 = arith.subf %120, %111 : vector<8x128xf32>
    %122 = arith.mulf %121, %119 : vector<8x128xf32>
    %123 = arith.mulf %111, %48 : vector<8x128xf32>
    %124 = arith.addf %122, %123 : vector<8x128xf32>
    %125 = arith.truncf %124 : vector<8x128xf32> to vector<8x128xbf16>
    %c0_45 = arith.constant 0 : index
    %c0_46 = arith.constant 0 : index
    %126 = vector.load %arg6[%c0_45, %c0_46] : memref<128x384xbf16, #tpu.memory_space<vmem>>, vector<128x384xbf16>
    %cst_47 = arith.constant dense<0.000000e+00> : vector<8x384xf32>
    %127 = tpu.matmul %125, %126, %cst_47 {dimension_numbers = #tpu.dot_dimension_numbers<[1], [0], [0], [1], [0, 0, 1, 1], [], []>} : vector<8x128xbf16>, vector<128x384xbf16>, vector<8x384xf32> -> vector<8x384xf32>
    %c0_48 = arith.constant 0 : index
    %c0_49 = arith.constant 0 : index
    %128 = vector.load %arg8[%c0_48, %c0_49] : memref<1x384xf32, #tpu.memory_space<vmem>>, vector<1x384xf32>
    %129 = vector.broadcast %128 : vector<1x384xf32> to vector<8x384xf32>
    %130 = arith.addf %127, %129 : vector<8x384xf32>
    %131 = vector.extract_strided_slice %130 {offsets = [0, 0], sizes = [8, 128], strides = [1, 1]} : vector<8x384xf32> to vector<8x128xf32>
    %132 = vector.extract_strided_slice %91 {offsets = [0, 0], sizes = [8, 128], strides = [1, 1]} : vector<8x384xf32> to vector<8x128xf32>
    %133 = arith.addf %131, %132 : vector<8x128xf32>
    %134 = arith.negf %133 : vector<8x128xf32>
    %135 = math.exp %134 : vector<8x128xf32>
    %cst_50 = arith.constant 1.000000e+00 : f32
    %136 = vector.broadcast %cst_50 : f32 to vector<8x128xf32>
    %137 = arith.addf %136, %135 : vector<8x128xf32>
    %138 = arith.divf %136, %137 : vector<8x128xf32>
    %139 = vector.extract_strided_slice %130 {offsets = [0, 128], sizes = [8, 128], strides = [1, 1]} : vector<8x384xf32> to vector<8x128xf32>
    %140 = vector.extract_strided_slice %91 {offsets = [0, 128], sizes = [8, 128], strides = [1, 1]} : vector<8x384xf32> to vector<8x128xf32>
    %141 = arith.addf %139, %140 : vector<8x128xf32>
    %142 = arith.negf %141 : vector<8x128xf32>
    %143 = math.exp %142 : vector<8x128xf32>
    %cst_51 = arith.constant 1.000000e+00 : f32
    %144 = vector.broadcast %cst_51 : f32 to vector<8x128xf32>
    %145 = arith.addf %144, %143 : vector<8x128xf32>
    %146 = arith.divf %144, %145 : vector<8x128xf32>
    %147 = vector.extract_strided_slice %130 {offsets = [0, 256], sizes = [8, 128], strides = [1, 1]} : vector<8x384xf32> to vector<8x128xf32>
    %148 = vector.extract_strided_slice %91 {offsets = [0, 256], sizes = [8, 128], strides = [1, 1]} : vector<8x384xf32> to vector<8x128xf32>
    %c0_52 = arith.constant 0 : index
    %c0_53 = arith.constant 0 : index
    %149 = vector.load %arg9[%c0_52, %c0_53] : memref<1x128xf32, #tpu.memory_space<vmem>>, vector<1x128xf32>
    %150 = vector.broadcast %149 : vector<1x128xf32> to vector<8x128xf32>
    %151 = arith.addf %148, %150 : vector<8x128xf32>
    %152 = arith.mulf %138, %151 : vector<8x128xf32>
    %153 = arith.addf %147, %152 : vector<8x128xf32>
    %154 = math.tanh %153 : vector<8x128xf32>
    %cst_54 = arith.constant 1.000000e+00 : f32
    %155 = vector.broadcast %cst_54 : f32 to vector<8x128xf32>
    %156 = arith.subf %155, %146 : vector<8x128xf32>
    %157 = arith.mulf %156, %154 : vector<8x128xf32>
    %158 = arith.mulf %146, %83 : vector<8x128xf32>
    %159 = arith.addf %157, %158 : vector<8x128xf32>
    %160 = vector.extract_strided_slice %95 {offsets = [0, 384], sizes = [8, 128], strides = [1, 1]} : vector<8x512xf32> to vector<8x128xf32>
    %161 = arith.addf %85, %160 : vector<8x128xf32>
    %c2_i32 = arith.constant 2 : i32
    %162 = arith.truncf %124 : vector<8x128xf32> to vector<8x128xbf16>
    %c0_55 = arith.constant 0 : index
    %c0_56 = arith.constant 0 : index
    %163 = vector.load %arg4[%c0_55, %c0_56] : memref<128x384xbf16, #tpu.memory_space<vmem>>, vector<128x384xbf16>
    %cst_57 = arith.constant dense<0.000000e+00> : vector<8x384xf32>
    %164 = tpu.matmul %162, %163, %cst_57 {dimension_numbers = #tpu.dot_dimension_numbers<[1], [0], [0], [1], [0, 0, 1, 1], [], []>} : vector<8x128xbf16>, vector<128x384xbf16>, vector<8x384xf32> -> vector<8x384xf32>
    %165 = arith.truncf %159 : vector<8x128xf32> to vector<8x128xbf16>
    %c0_58 = arith.constant 0 : index
    %c0_59 = arith.constant 0 : index
    %166 = vector.load %arg7[%c0_58, %c0_59] : memref<128x384xbf16, #tpu.memory_space<vmem>>, vector<128x384xbf16>
    %cst_60 = arith.constant dense<0.000000e+00> : vector<8x384xf32>
    %167 = tpu.matmul %165, %166, %cst_60 {dimension_numbers = #tpu.dot_dimension_numbers<[1], [0], [0], [1], [0, 0, 1, 1], [], []>} : vector<8x128xbf16>, vector<128x384xbf16>, vector<8x384xf32> -> vector<8x384xf32>
    %c8_i32_61 = arith.constant 8 : i32
    %168 = arith.muli %c2_i32, %c8_i32_61 : i32
    %169 = tpu.assume_multiple %168, 8 : i32
    %170 = arith.index_cast %169 : i32 to index
    %c0_62 = arith.constant 0 : index
    %171 = vector.load %arg14[%170, %c0_62] : memref<64x512xf32, #tpu.memory_space<vmem>>, vector<8x512xf32>
    %172 = vector.extract_strided_slice %171 {offsets = [0, 0], sizes = [8, 128], strides = [1, 1]} : vector<8x512xf32> to vector<8x128xf32>
    %173 = vector.extract_strided_slice %164 {offsets = [0, 0], sizes = [8, 128], strides = [1, 1]} : vector<8x384xf32> to vector<8x128xf32>
    %174 = arith.addf %172, %173 : vector<8x128xf32>
    %175 = arith.negf %174 : vector<8x128xf32>
    %176 = math.exp %175 : vector<8x128xf32>
    %cst_63 = arith.constant 1.000000e+00 : f32
    %177 = vector.broadcast %cst_63 : f32 to vector<8x128xf32>
    %178 = arith.addf %177, %176 : vector<8x128xf32>
    %179 = arith.divf %177, %178 : vector<8x128xf32>
    %180 = vector.extract_strided_slice %171 {offsets = [0, 128], sizes = [8, 128], strides = [1, 1]} : vector<8x512xf32> to vector<8x128xf32>
    %181 = vector.extract_strided_slice %164 {offsets = [0, 128], sizes = [8, 128], strides = [1, 1]} : vector<8x384xf32> to vector<8x128xf32>
    %182 = arith.addf %180, %181 : vector<8x128xf32>
    %183 = arith.negf %182 : vector<8x128xf32>
    %184 = math.exp %183 : vector<8x128xf32>
    %cst_64 = arith.constant 1.000000e+00 : f32
    %185 = vector.broadcast %cst_64 : f32 to vector<8x128xf32>
    %186 = arith.addf %185, %184 : vector<8x128xf32>
    %187 = arith.divf %185, %186 : vector<8x128xf32>
    %188 = vector.extract_strided_slice %171 {offsets = [0, 256], sizes = [8, 128], strides = [1, 1]} : vector<8x512xf32> to vector<8x128xf32>
    %189 = vector.extract_strided_slice %164 {offsets = [0, 256], sizes = [8, 128], strides = [1, 1]} : vector<8x384xf32> to vector<8x128xf32>
    %c0_65 = arith.constant 0 : index
    %c0_66 = arith.constant 0 : index
    %190 = vector.load %arg5[%c0_65, %c0_66] : memref<1x128xf32, #tpu.memory_space<vmem>>, vector<1x128xf32>
    %191 = vector.broadcast %190 : vector<1x128xf32> to vector<8x128xf32>
    %192 = arith.addf %189, %191 : vector<8x128xf32>
    %193 = arith.mulf %179, %192 : vector<8x128xf32>
    %194 = arith.addf %188, %193 : vector<8x128xf32>
    %195 = math.tanh %194 : vector<8x128xf32>
    %cst_67 = arith.constant 1.000000e+00 : f32
    %196 = vector.broadcast %cst_67 : f32 to vector<8x128xf32>
    %197 = arith.subf %196, %187 : vector<8x128xf32>
    %198 = arith.mulf %197, %195 : vector<8x128xf32>
    %199 = arith.mulf %187, %124 : vector<8x128xf32>
    %200 = arith.addf %198, %199 : vector<8x128xf32>
    %201 = arith.truncf %200 : vector<8x128xf32> to vector<8x128xbf16>
    %c0_68 = arith.constant 0 : index
    %c0_69 = arith.constant 0 : index
    %202 = vector.load %arg6[%c0_68, %c0_69] : memref<128x384xbf16, #tpu.memory_space<vmem>>, vector<128x384xbf16>
    %cst_70 = arith.constant dense<0.000000e+00> : vector<8x384xf32>
    %203 = tpu.matmul %201, %202, %cst_70 {dimension_numbers = #tpu.dot_dimension_numbers<[1], [0], [0], [1], [0, 0, 1, 1], [], []>} : vector<8x128xbf16>, vector<128x384xbf16>, vector<8x384xf32> -> vector<8x384xf32>
    %c0_71 = arith.constant 0 : index
    %c0_72 = arith.constant 0 : index
    %204 = vector.load %arg8[%c0_71, %c0_72] : memref<1x384xf32, #tpu.memory_space<vmem>>, vector<1x384xf32>
    %205 = vector.broadcast %204 : vector<1x384xf32> to vector<8x384xf32>
    %206 = arith.addf %203, %205 : vector<8x384xf32>
    %207 = vector.extract_strided_slice %206 {offsets = [0, 0], sizes = [8, 128], strides = [1, 1]} : vector<8x384xf32> to vector<8x128xf32>
    %208 = vector.extract_strided_slice %167 {offsets = [0, 0], sizes = [8, 128], strides = [1, 1]} : vector<8x384xf32> to vector<8x128xf32>
    %209 = arith.addf %207, %208 : vector<8x128xf32>
    %210 = arith.negf %209 : vector<8x128xf32>
    %211 = math.exp %210 : vector<8x128xf32>
    %cst_73 = arith.constant 1.000000e+00 : f32
    %212 = vector.broadcast %cst_73 : f32 to vector<8x128xf32>
    %213 = arith.addf %212, %211 : vector<8x128xf32>
    %214 = arith.divf %212, %213 : vector<8x128xf32>
    %215 = vector.extract_strided_slice %206 {offsets = [0, 128], sizes = [8, 128], strides = [1, 1]} : vector<8x384xf32> to vector<8x128xf32>
    %216 = vector.extract_strided_slice %167 {offsets = [0, 128], sizes = [8, 128], strides = [1, 1]} : vector<8x384xf32> to vector<8x128xf32>
    %217 = arith.addf %215, %216 : vector<8x128xf32>
    %218 = arith.negf %217 : vector<8x128xf32>
    %219 = math.exp %218 : vector<8x128xf32>
    %cst_74 = arith.constant 1.000000e+00 : f32
    %220 = vector.broadcast %cst_74 : f32 to vector<8x128xf32>
    %221 = arith.addf %220, %219 : vector<8x128xf32>
    %222 = arith.divf %220, %221 : vector<8x128xf32>
    %223 = vector.extract_strided_slice %206 {offsets = [0, 256], sizes = [8, 128], strides = [1, 1]} : vector<8x384xf32> to vector<8x128xf32>
    %224 = vector.extract_strided_slice %167 {offsets = [0, 256], sizes = [8, 128], strides = [1, 1]} : vector<8x384xf32> to vector<8x128xf32>
    %c0_75 = arith.constant 0 : index
    %c0_76 = arith.constant 0 : index
    %225 = vector.load %arg9[%c0_75, %c0_76] : memref<1x128xf32, #tpu.memory_space<vmem>>, vector<1x128xf32>
    %226 = vector.broadcast %225 : vector<1x128xf32> to vector<8x128xf32>
    %227 = arith.addf %224, %226 : vector<8x128xf32>
    %228 = arith.mulf %214, %227 : vector<8x128xf32>
    %229 = arith.addf %223, %228 : vector<8x128xf32>
    %230 = math.tanh %229 : vector<8x128xf32>
    %cst_77 = arith.constant 1.000000e+00 : f32
    %231 = vector.broadcast %cst_77 : f32 to vector<8x128xf32>
    %232 = arith.subf %231, %222 : vector<8x128xf32>
    %233 = arith.mulf %232, %230 : vector<8x128xf32>
    %234 = arith.mulf %222, %159 : vector<8x128xf32>
    %235 = arith.addf %233, %234 : vector<8x128xf32>
    %236 = vector.extract_strided_slice %171 {offsets = [0, 384], sizes = [8, 128], strides = [1, 1]} : vector<8x512xf32> to vector<8x128xf32>
    %237 = arith.addf %161, %236 : vector<8x128xf32>
    %c3_i32 = arith.constant 3 : i32
    %238 = arith.truncf %200 : vector<8x128xf32> to vector<8x128xbf16>
    %c0_78 = arith.constant 0 : index
    %c0_79 = arith.constant 0 : index
    %239 = vector.load %arg4[%c0_78, %c0_79] : memref<128x384xbf16, #tpu.memory_space<vmem>>, vector<128x384xbf16>
    %cst_80 = arith.constant dense<0.000000e+00> : vector<8x384xf32>
    %240 = tpu.matmul %238, %239, %cst_80 {dimension_numbers = #tpu.dot_dimension_numbers<[1], [0], [0], [1], [0, 0, 1, 1], [], []>} : vector<8x128xbf16>, vector<128x384xbf16>, vector<8x384xf32> -> vector<8x384xf32>
    %241 = arith.truncf %235 : vector<8x128xf32> to vector<8x128xbf16>
    %c0_81 = arith.constant 0 : index
    %c0_82 = arith.constant 0 : index
    %242 = vector.load %arg7[%c0_81, %c0_82] : memref<128x384xbf16, #tpu.memory_space<vmem>>, vector<128x384xbf16>
    %cst_83 = arith.constant dense<0.000000e+00> : vector<8x384xf32>
    %243 = tpu.matmul %241, %242, %cst_83 {dimension_numbers = #tpu.dot_dimension_numbers<[1], [0], [0], [1], [0, 0, 1, 1], [], []>} : vector<8x128xbf16>, vector<128x384xbf16>, vector<8x384xf32> -> vector<8x384xf32>
    %c8_i32_84 = arith.constant 8 : i32
    %244 = arith.muli %c3_i32, %c8_i32_84 : i32
    %245 = tpu.assume_multiple %244, 8 : i32
    %246 = arith.index_cast %245 : i32 to index
    %c0_85 = arith.constant 0 : index
    %247 = vector.load %arg14[%246, %c0_85] : memref<64x512xf32, #tpu.memory_space<vmem>>, vector<8x512xf32>
    %248 = vector.extract_strided_slice %247 {offsets = [0, 0], sizes = [8, 128], strides = [1, 1]} : vector<8x512xf32> to vector<8x128xf32>
    %249 = vector.extract_strided_slice %240 {offsets = [0, 0], sizes = [8, 128], strides = [1, 1]} : vector<8x384xf32> to vector<8x128xf32>
    %250 = arith.addf %248, %249 : vector<8x128xf32>
    %251 = arith.negf %250 : vector<8x128xf32>
    %252 = math.exp %251 : vector<8x128xf32>
    %cst_86 = arith.constant 1.000000e+00 : f32
    %253 = vector.broadcast %cst_86 : f32 to vector<8x128xf32>
    %254 = arith.addf %253, %252 : vector<8x128xf32>
    %255 = arith.divf %253, %254 : vector<8x128xf32>
    %256 = vector.extract_strided_slice %247 {offsets = [0, 128], sizes = [8, 128], strides = [1, 1]} : vector<8x512xf32> to vector<8x128xf32>
    %257 = vector.extract_strided_slice %240 {offsets = [0, 128], sizes = [8, 128], strides = [1, 1]} : vector<8x384xf32> to vector<8x128xf32>
    %258 = arith.addf %256, %257 : vector<8x128xf32>
    %259 = arith.negf %258 : vector<8x128xf32>
    %260 = math.exp %259 : vector<8x128xf32>
    %cst_87 = arith.constant 1.000000e+00 : f32
    %261 = vector.broadcast %cst_87 : f32 to vector<8x128xf32>
    %262 = arith.addf %261, %260 : vector<8x128xf32>
    %263 = arith.divf %261, %262 : vector<8x128xf32>
    %264 = vector.extract_strided_slice %247 {offsets = [0, 256], sizes = [8, 128], strides = [1, 1]} : vector<8x512xf32> to vector<8x128xf32>
    %265 = vector.extract_strided_slice %240 {offsets = [0, 256], sizes = [8, 128], strides = [1, 1]} : vector<8x384xf32> to vector<8x128xf32>
    %c0_88 = arith.constant 0 : index
    %c0_89 = arith.constant 0 : index
    %266 = vector.load %arg5[%c0_88, %c0_89] : memref<1x128xf32, #tpu.memory_space<vmem>>, vector<1x128xf32>
    %267 = vector.broadcast %266 : vector<1x128xf32> to vector<8x128xf32>
    %268 = arith.addf %265, %267 : vector<8x128xf32>
    %269 = arith.mulf %255, %268 : vector<8x128xf32>
    %270 = arith.addf %264, %269 : vector<8x128xf32>
    %271 = math.tanh %270 : vector<8x128xf32>
    %cst_90 = arith.constant 1.000000e+00 : f32
    %272 = vector.broadcast %cst_90 : f32 to vector<8x128xf32>
    %273 = arith.subf %272, %263 : vector<8x128xf32>
    %274 = arith.mulf %273, %271 : vector<8x128xf32>
    %275 = arith.mulf %263, %200 : vector<8x128xf32>
    %276 = arith.addf %274, %275 : vector<8x128xf32>
    %277 = arith.truncf %276 : vector<8x128xf32> to vector<8x128xbf16>
    %c0_91 = arith.constant 0 : index
    %c0_92 = arith.constant 0 : index
    %278 = vector.load %arg6[%c0_91, %c0_92] : memref<128x384xbf16, #tpu.memory_space<vmem>>, vector<128x384xbf16>
    %cst_93 = arith.constant dense<0.000000e+00> : vector<8x384xf32>
    %279 = tpu.matmul %277, %278, %cst_93 {dimension_numbers = #tpu.dot_dimension_numbers<[1], [0], [0], [1], [0, 0, 1, 1], [], []>} : vector<8x128xbf16>, vector<128x384xbf16>, vector<8x384xf32> -> vector<8x384xf32>
    %c0_94 = arith.constant 0 : index
    %c0_95 = arith.constant 0 : index
    %280 = vector.load %arg8[%c0_94, %c0_95] : memref<1x384xf32, #tpu.memory_space<vmem>>, vector<1x384xf32>
    %281 = vector.broadcast %280 : vector<1x384xf32> to vector<8x384xf32>
    %282 = arith.addf %279, %281 : vector<8x384xf32>
    %283 = vector.extract_strided_slice %282 {offsets = [0, 0], sizes = [8, 128], strides = [1, 1]} : vector<8x384xf32> to vector<8x128xf32>
    %284 = vector.extract_strided_slice %243 {offsets = [0, 0], sizes = [8, 128], strides = [1, 1]} : vector<8x384xf32> to vector<8x128xf32>
    %285 = arith.addf %283, %284 : vector<8x128xf32>
    %286 = arith.negf %285 : vector<8x128xf32>
    %287 = math.exp %286 : vector<8x128xf32>
    %cst_96 = arith.constant 1.000000e+00 : f32
    %288 = vector.broadcast %cst_96 : f32 to vector<8x128xf32>
    %289 = arith.addf %288, %287 : vector<8x128xf32>
    %290 = arith.divf %288, %289 : vector<8x128xf32>
    %291 = vector.extract_strided_slice %282 {offsets = [0, 128], sizes = [8, 128], strides = [1, 1]} : vector<8x384xf32> to vector<8x128xf32>
    %292 = vector.extract_strided_slice %243 {offsets = [0, 128], sizes = [8, 128], strides = [1, 1]} : vector<8x384xf32> to vector<8x128xf32>
    %293 = arith.addf %291, %292 : vector<8x128xf32>
    %294 = arith.negf %293 : vector<8x128xf32>
    %295 = math.exp %294 : vector<8x128xf32>
    %cst_97 = arith.constant 1.000000e+00 : f32
    %296 = vector.broadcast %cst_97 : f32 to vector<8x128xf32>
    %297 = arith.addf %296, %295 : vector<8x128xf32>
    %298 = arith.divf %296, %297 : vector<8x128xf32>
    %299 = vector.extract_strided_slice %282 {offsets = [0, 256], sizes = [8, 128], strides = [1, 1]} : vector<8x384xf32> to vector<8x128xf32>
    %300 = vector.extract_strided_slice %243 {offsets = [0, 256], sizes = [8, 128], strides = [1, 1]} : vector<8x384xf32> to vector<8x128xf32>
    %c0_98 = arith.constant 0 : index
    %c0_99 = arith.constant 0 : index
    %301 = vector.load %arg9[%c0_98, %c0_99] : memref<1x128xf32, #tpu.memory_space<vmem>>, vector<1x128xf32>
    %302 = vector.broadcast %301 : vector<1x128xf32> to vector<8x128xf32>
    %303 = arith.addf %300, %302 : vector<8x128xf32>
    %304 = arith.mulf %290, %303 : vector<8x128xf32>
    %305 = arith.addf %299, %304 : vector<8x128xf32>
    %306 = math.tanh %305 : vector<8x128xf32>
    %cst_100 = arith.constant 1.000000e+00 : f32
    %307 = vector.broadcast %cst_100 : f32 to vector<8x128xf32>
    %308 = arith.subf %307, %298 : vector<8x128xf32>
    %309 = arith.mulf %308, %306 : vector<8x128xf32>
    %310 = arith.mulf %298, %235 : vector<8x128xf32>
    %311 = arith.addf %309, %310 : vector<8x128xf32>
    %312 = vector.extract_strided_slice %247 {offsets = [0, 384], sizes = [8, 128], strides = [1, 1]} : vector<8x512xf32> to vector<8x128xf32>
    %313 = arith.addf %237, %312 : vector<8x128xf32>
    %c4_i32 = arith.constant 4 : i32
    %314 = arith.truncf %276 : vector<8x128xf32> to vector<8x128xbf16>
    %c0_101 = arith.constant 0 : index
    %c0_102 = arith.constant 0 : index
    %315 = vector.load %arg4[%c0_101, %c0_102] : memref<128x384xbf16, #tpu.memory_space<vmem>>, vector<128x384xbf16>
    %cst_103 = arith.constant dense<0.000000e+00> : vector<8x384xf32>
    %316 = tpu.matmul %314, %315, %cst_103 {dimension_numbers = #tpu.dot_dimension_numbers<[1], [0], [0], [1], [0, 0, 1, 1], [], []>} : vector<8x128xbf16>, vector<128x384xbf16>, vector<8x384xf32> -> vector<8x384xf32>
    %317 = arith.truncf %311 : vector<8x128xf32> to vector<8x128xbf16>
    %c0_104 = arith.constant 0 : index
    %c0_105 = arith.constant 0 : index
    %318 = vector.load %arg7[%c0_104, %c0_105] : memref<128x384xbf16, #tpu.memory_space<vmem>>, vector<128x384xbf16>
    %cst_106 = arith.constant dense<0.000000e+00> : vector<8x384xf32>
    %319 = tpu.matmul %317, %318, %cst_106 {dimension_numbers = #tpu.dot_dimension_numbers<[1], [0], [0], [1], [0, 0, 1, 1], [], []>} : vector<8x128xbf16>, vector<128x384xbf16>, vector<8x384xf32> -> vector<8x384xf32>
    %c8_i32_107 = arith.constant 8 : i32
    %320 = arith.muli %c4_i32, %c8_i32_107 : i32
    %321 = tpu.assume_multiple %320, 8 : i32
    %322 = arith.index_cast %321 : i32 to index
    %c0_108 = arith.constant 0 : index
    %323 = vector.load %arg14[%322, %c0_108] : memref<64x512xf32, #tpu.memory_space<vmem>>, vector<8x512xf32>
    %324 = vector.extract_strided_slice %323 {offsets = [0, 0], sizes = [8, 128], strides = [1, 1]} : vector<8x512xf32> to vector<8x128xf32>
    %325 = vector.extract_strided_slice %316 {offsets = [0, 0], sizes = [8, 128], strides = [1, 1]} : vector<8x384xf32> to vector<8x128xf32>
    %326 = arith.addf %324, %325 : vector<8x128xf32>
    %327 = arith.negf %326 : vector<8x128xf32>
    %328 = math.exp %327 : vector<8x128xf32>
    %cst_109 = arith.constant 1.000000e+00 : f32
    %329 = vector.broadcast %cst_109 : f32 to vector<8x128xf32>
    %330 = arith.addf %329, %328 : vector<8x128xf32>
    %331 = arith.divf %329, %330 : vector<8x128xf32>
    %332 = vector.extract_strided_slice %323 {offsets = [0, 128], sizes = [8, 128], strides = [1, 1]} : vector<8x512xf32> to vector<8x128xf32>
    %333 = vector.extract_strided_slice %316 {offsets = [0, 128], sizes = [8, 128], strides = [1, 1]} : vector<8x384xf32> to vector<8x128xf32>
    %334 = arith.addf %332, %333 : vector<8x128xf32>
    %335 = arith.negf %334 : vector<8x128xf32>
    %336 = math.exp %335 : vector<8x128xf32>
    %cst_110 = arith.constant 1.000000e+00 : f32
    %337 = vector.broadcast %cst_110 : f32 to vector<8x128xf32>
    %338 = arith.addf %337, %336 : vector<8x128xf32>
    %339 = arith.divf %337, %338 : vector<8x128xf32>
    %340 = vector.extract_strided_slice %323 {offsets = [0, 256], sizes = [8, 128], strides = [1, 1]} : vector<8x512xf32> to vector<8x128xf32>
    %341 = vector.extract_strided_slice %316 {offsets = [0, 256], sizes = [8, 128], strides = [1, 1]} : vector<8x384xf32> to vector<8x128xf32>
    %c0_111 = arith.constant 0 : index
    %c0_112 = arith.constant 0 : index
    %342 = vector.load %arg5[%c0_111, %c0_112] : memref<1x128xf32, #tpu.memory_space<vmem>>, vector<1x128xf32>
    %343 = vector.broadcast %342 : vector<1x128xf32> to vector<8x128xf32>
    %344 = arith.addf %341, %343 : vector<8x128xf32>
    %345 = arith.mulf %331, %344 : vector<8x128xf32>
    %346 = arith.addf %340, %345 : vector<8x128xf32>
    %347 = math.tanh %346 : vector<8x128xf32>
    %cst_113 = arith.constant 1.000000e+00 : f32
    %348 = vector.broadcast %cst_113 : f32 to vector<8x128xf32>
    %349 = arith.subf %348, %339 : vector<8x128xf32>
    %350 = arith.mulf %349, %347 : vector<8x128xf32>
    %351 = arith.mulf %339, %276 : vector<8x128xf32>
    %352 = arith.addf %350, %351 : vector<8x128xf32>
    %353 = arith.truncf %352 : vector<8x128xf32> to vector<8x128xbf16>
    %c0_114 = arith.constant 0 : index
    %c0_115 = arith.constant 0 : index
    %354 = vector.load %arg6[%c0_114, %c0_115] : memref<128x384xbf16, #tpu.memory_space<vmem>>, vector<128x384xbf16>
    %cst_116 = arith.constant dense<0.000000e+00> : vector<8x384xf32>
    %355 = tpu.matmul %353, %354, %cst_116 {dimension_numbers = #tpu.dot_dimension_numbers<[1], [0], [0], [1], [0, 0, 1, 1], [], []>} : vector<8x128xbf16>, vector<128x384xbf16>, vector<8x384xf32> -> vector<8x384xf32>
    %c0_117 = arith.constant 0 : index
    %c0_118 = arith.constant 0 : index
    %356 = vector.load %arg8[%c0_117, %c0_118] : memref<1x384xf32, #tpu.memory_space<vmem>>, vector<1x384xf32>
    %357 = vector.broadcast %356 : vector<1x384xf32> to vector<8x384xf32>
    %358 = arith.addf %355, %357 : vector<8x384xf32>
    %359 = vector.extract_strided_slice %358 {offsets = [0, 0], sizes = [8, 128], strides = [1, 1]} : vector<8x384xf32> to vector<8x128xf32>
    %360 = vector.extract_strided_slice %319 {offsets = [0, 0], sizes = [8, 128], strides = [1, 1]} : vector<8x384xf32> to vector<8x128xf32>
    %361 = arith.addf %359, %360 : vector<8x128xf32>
    %362 = arith.negf %361 : vector<8x128xf32>
    %363 = math.exp %362 : vector<8x128xf32>
    %cst_119 = arith.constant 1.000000e+00 : f32
    %364 = vector.broadcast %cst_119 : f32 to vector<8x128xf32>
    %365 = arith.addf %364, %363 : vector<8x128xf32>
    %366 = arith.divf %364, %365 : vector<8x128xf32>
    %367 = vector.extract_strided_slice %358 {offsets = [0, 128], sizes = [8, 128], strides = [1, 1]} : vector<8x384xf32> to vector<8x128xf32>
    %368 = vector.extract_strided_slice %319 {offsets = [0, 128], sizes = [8, 128], strides = [1, 1]} : vector<8x384xf32> to vector<8x128xf32>
    %369 = arith.addf %367, %368 : vector<8x128xf32>
    %370 = arith.negf %369 : vector<8x128xf32>
    %371 = math.exp %370 : vector<8x128xf32>
    %cst_120 = arith.constant 1.000000e+00 : f32
    %372 = vector.broadcast %cst_120 : f32 to vector<8x128xf32>
    %373 = arith.addf %372, %371 : vector<8x128xf32>
    %374 = arith.divf %372, %373 : vector<8x128xf32>
    %375 = vector.extract_strided_slice %358 {offsets = [0, 256], sizes = [8, 128], strides = [1, 1]} : vector<8x384xf32> to vector<8x128xf32>
    %376 = vector.extract_strided_slice %319 {offsets = [0, 256], sizes = [8, 128], strides = [1, 1]} : vector<8x384xf32> to vector<8x128xf32>
    %c0_121 = arith.constant 0 : index
    %c0_122 = arith.constant 0 : index
    %377 = vector.load %arg9[%c0_121, %c0_122] : memref<1x128xf32, #tpu.memory_space<vmem>>, vector<1x128xf32>
    %378 = vector.broadcast %377 : vector<1x128xf32> to vector<8x128xf32>
    %379 = arith.addf %376, %378 : vector<8x128xf32>
    %380 = arith.mulf %366, %379 : vector<8x128xf32>
    %381 = arith.addf %375, %380 : vector<8x128xf32>
    %382 = math.tanh %381 : vector<8x128xf32>
    %cst_123 = arith.constant 1.000000e+00 : f32
    %383 = vector.broadcast %cst_123 : f32 to vector<8x128xf32>
    %384 = arith.subf %383, %374 : vector<8x128xf32>
    %385 = arith.mulf %384, %382 : vector<8x128xf32>
    %386 = arith.mulf %374, %311 : vector<8x128xf32>
    %387 = arith.addf %385, %386 : vector<8x128xf32>
    %388 = vector.extract_strided_slice %323 {offsets = [0, 384], sizes = [8, 128], strides = [1, 1]} : vector<8x512xf32> to vector<8x128xf32>
    %389 = arith.addf %313, %388 : vector<8x128xf32>
    %c5_i32 = arith.constant 5 : i32
    %390 = arith.truncf %352 : vector<8x128xf32> to vector<8x128xbf16>
    %c0_124 = arith.constant 0 : index
    %c0_125 = arith.constant 0 : index
    %391 = vector.load %arg4[%c0_124, %c0_125] : memref<128x384xbf16, #tpu.memory_space<vmem>>, vector<128x384xbf16>
    %cst_126 = arith.constant dense<0.000000e+00> : vector<8x384xf32>
    %392 = tpu.matmul %390, %391, %cst_126 {dimension_numbers = #tpu.dot_dimension_numbers<[1], [0], [0], [1], [0, 0, 1, 1], [], []>} : vector<8x128xbf16>, vector<128x384xbf16>, vector<8x384xf32> -> vector<8x384xf32>
    %393 = arith.truncf %387 : vector<8x128xf32> to vector<8x128xbf16>
    %c0_127 = arith.constant 0 : index
    %c0_128 = arith.constant 0 : index
    %394 = vector.load %arg7[%c0_127, %c0_128] : memref<128x384xbf16, #tpu.memory_space<vmem>>, vector<128x384xbf16>
    %cst_129 = arith.constant dense<0.000000e+00> : vector<8x384xf32>
    %395 = tpu.matmul %393, %394, %cst_129 {dimension_numbers = #tpu.dot_dimension_numbers<[1], [0], [0], [1], [0, 0, 1, 1], [], []>} : vector<8x128xbf16>, vector<128x384xbf16>, vector<8x384xf32> -> vector<8x384xf32>
    %c8_i32_130 = arith.constant 8 : i32
    %396 = arith.muli %c5_i32, %c8_i32_130 : i32
    %397 = tpu.assume_multiple %396, 8 : i32
    %398 = arith.index_cast %397 : i32 to index
    %c0_131 = arith.constant 0 : index
    %399 = vector.load %arg14[%398, %c0_131] : memref<64x512xf32, #tpu.memory_space<vmem>>, vector<8x512xf32>
    %400 = vector.extract_strided_slice %399 {offsets = [0, 0], sizes = [8, 128], strides = [1, 1]} : vector<8x512xf32> to vector<8x128xf32>
    %401 = vector.extract_strided_slice %392 {offsets = [0, 0], sizes = [8, 128], strides = [1, 1]} : vector<8x384xf32> to vector<8x128xf32>
    %402 = arith.addf %400, %401 : vector<8x128xf32>
    %403 = arith.negf %402 : vector<8x128xf32>
    %404 = math.exp %403 : vector<8x128xf32>
    %cst_132 = arith.constant 1.000000e+00 : f32
    %405 = vector.broadcast %cst_132 : f32 to vector<8x128xf32>
    %406 = arith.addf %405, %404 : vector<8x128xf32>
    %407 = arith.divf %405, %406 : vector<8x128xf32>
    %408 = vector.extract_strided_slice %399 {offsets = [0, 128], sizes = [8, 128], strides = [1, 1]} : vector<8x512xf32> to vector<8x128xf32>
    %409 = vector.extract_strided_slice %392 {offsets = [0, 128], sizes = [8, 128], strides = [1, 1]} : vector<8x384xf32> to vector<8x128xf32>
    %410 = arith.addf %408, %409 : vector<8x128xf32>
    %411 = arith.negf %410 : vector<8x128xf32>
    %412 = math.exp %411 : vector<8x128xf32>
    %cst_133 = arith.constant 1.000000e+00 : f32
    %413 = vector.broadcast %cst_133 : f32 to vector<8x128xf32>
    %414 = arith.addf %413, %412 : vector<8x128xf32>
    %415 = arith.divf %413, %414 : vector<8x128xf32>
    %416 = vector.extract_strided_slice %399 {offsets = [0, 256], sizes = [8, 128], strides = [1, 1]} : vector<8x512xf32> to vector<8x128xf32>
    %417 = vector.extract_strided_slice %392 {offsets = [0, 256], sizes = [8, 128], strides = [1, 1]} : vector<8x384xf32> to vector<8x128xf32>
    %c0_134 = arith.constant 0 : index
    %c0_135 = arith.constant 0 : index
    %418 = vector.load %arg5[%c0_134, %c0_135] : memref<1x128xf32, #tpu.memory_space<vmem>>, vector<1x128xf32>
    %419 = vector.broadcast %418 : vector<1x128xf32> to vector<8x128xf32>
    %420 = arith.addf %417, %419 : vector<8x128xf32>
    %421 = arith.mulf %407, %420 : vector<8x128xf32>
    %422 = arith.addf %416, %421 : vector<8x128xf32>
    %423 = math.tanh %422 : vector<8x128xf32>
    %cst_136 = arith.constant 1.000000e+00 : f32
    %424 = vector.broadcast %cst_136 : f32 to vector<8x128xf32>
    %425 = arith.subf %424, %415 : vector<8x128xf32>
    %426 = arith.mulf %425, %423 : vector<8x128xf32>
    %427 = arith.mulf %415, %352 : vector<8x128xf32>
    %428 = arith.addf %426, %427 : vector<8x128xf32>
    %429 = arith.truncf %428 : vector<8x128xf32> to vector<8x128xbf16>
    %c0_137 = arith.constant 0 : index
    %c0_138 = arith.constant 0 : index
    %430 = vector.load %arg6[%c0_137, %c0_138] : memref<128x384xbf16, #tpu.memory_space<vmem>>, vector<128x384xbf16>
    %cst_139 = arith.constant dense<0.000000e+00> : vector<8x384xf32>
    %431 = tpu.matmul %429, %430, %cst_139 {dimension_numbers = #tpu.dot_dimension_numbers<[1], [0], [0], [1], [0, 0, 1, 1], [], []>} : vector<8x128xbf16>, vector<128x384xbf16>, vector<8x384xf32> -> vector<8x384xf32>
    %c0_140 = arith.constant 0 : index
    %c0_141 = arith.constant 0 : index
    %432 = vector.load %arg8[%c0_140, %c0_141] : memref<1x384xf32, #tpu.memory_space<vmem>>, vector<1x384xf32>
    %433 = vector.broadcast %432 : vector<1x384xf32> to vector<8x384xf32>
    %434 = arith.addf %431, %433 : vector<8x384xf32>
    %435 = vector.extract_strided_slice %434 {offsets = [0, 0], sizes = [8, 128], strides = [1, 1]} : vector<8x384xf32> to vector<8x128xf32>
    %436 = vector.extract_strided_slice %395 {offsets = [0, 0], sizes = [8, 128], strides = [1, 1]} : vector<8x384xf32> to vector<8x128xf32>
    %437 = arith.addf %435, %436 : vector<8x128xf32>
    %438 = arith.negf %437 : vector<8x128xf32>
    %439 = math.exp %438 : vector<8x128xf32>
    %cst_142 = arith.constant 1.000000e+00 : f32
    %440 = vector.broadcast %cst_142 : f32 to vector<8x128xf32>
    %441 = arith.addf %440, %439 : vector<8x128xf32>
    %442 = arith.divf %440, %441 : vector<8x128xf32>
    %443 = vector.extract_strided_slice %434 {offsets = [0, 128], sizes = [8, 128], strides = [1, 1]} : vector<8x384xf32> to vector<8x128xf32>
    %444 = vector.extract_strided_slice %395 {offsets = [0, 128], sizes = [8, 128], strides = [1, 1]} : vector<8x384xf32> to vector<8x128xf32>
    %445 = arith.addf %443, %444 : vector<8x128xf32>
    %446 = arith.negf %445 : vector<8x128xf32>
    %447 = math.exp %446 : vector<8x128xf32>
    %cst_143 = arith.constant 1.000000e+00 : f32
    %448 = vector.broadcast %cst_143 : f32 to vector<8x128xf32>
    %449 = arith.addf %448, %447 : vector<8x128xf32>
    %450 = arith.divf %448, %449 : vector<8x128xf32>
    %451 = vector.extract_strided_slice %434 {offsets = [0, 256], sizes = [8, 128], strides = [1, 1]} : vector<8x384xf32> to vector<8x128xf32>
    %452 = vector.extract_strided_slice %395 {offsets = [0, 256], sizes = [8, 128], strides = [1, 1]} : vector<8x384xf32> to vector<8x128xf32>
    %c0_144 = arith.constant 0 : index
    %c0_145 = arith.constant 0 : index
    %453 = vector.load %arg9[%c0_144, %c0_145] : memref<1x128xf32, #tpu.memory_space<vmem>>, vector<1x128xf32>
    %454 = vector.broadcast %453 : vector<1x128xf32> to vector<8x128xf32>
    %455 = arith.addf %452, %454 : vector<8x128xf32>
    %456 = arith.mulf %442, %455 : vector<8x128xf32>
    %457 = arith.addf %451, %456 : vector<8x128xf32>
    %458 = math.tanh %457 : vector<8x128xf32>
    %cst_146 = arith.constant 1.000000e+00 : f32
    %459 = vector.broadcast %cst_146 : f32 to vector<8x128xf32>
    %460 = arith.subf %459, %450 : vector<8x128xf32>
    %461 = arith.mulf %460, %458 : vector<8x128xf32>
    %462 = arith.mulf %450, %387 : vector<8x128xf32>
    %463 = arith.addf %461, %462 : vector<8x128xf32>
    %464 = vector.extract_strided_slice %399 {offsets = [0, 384], sizes = [8, 128], strides = [1, 1]} : vector<8x512xf32> to vector<8x128xf32>
    %465 = arith.addf %389, %464 : vector<8x128xf32>
    %c6_i32 = arith.constant 6 : i32
    %466 = arith.truncf %428 : vector<8x128xf32> to vector<8x128xbf16>
    %c0_147 = arith.constant 0 : index
    %c0_148 = arith.constant 0 : index
    %467 = vector.load %arg4[%c0_147, %c0_148] : memref<128x384xbf16, #tpu.memory_space<vmem>>, vector<128x384xbf16>
    %cst_149 = arith.constant dense<0.000000e+00> : vector<8x384xf32>
    %468 = tpu.matmul %466, %467, %cst_149 {dimension_numbers = #tpu.dot_dimension_numbers<[1], [0], [0], [1], [0, 0, 1, 1], [], []>} : vector<8x128xbf16>, vector<128x384xbf16>, vector<8x384xf32> -> vector<8x384xf32>
    %469 = arith.truncf %463 : vector<8x128xf32> to vector<8x128xbf16>
    %c0_150 = arith.constant 0 : index
    %c0_151 = arith.constant 0 : index
    %470 = vector.load %arg7[%c0_150, %c0_151] : memref<128x384xbf16, #tpu.memory_space<vmem>>, vector<128x384xbf16>
    %cst_152 = arith.constant dense<0.000000e+00> : vector<8x384xf32>
    %471 = tpu.matmul %469, %470, %cst_152 {dimension_numbers = #tpu.dot_dimension_numbers<[1], [0], [0], [1], [0, 0, 1, 1], [], []>} : vector<8x128xbf16>, vector<128x384xbf16>, vector<8x384xf32> -> vector<8x384xf32>
    %c8_i32_153 = arith.constant 8 : i32
    %472 = arith.muli %c6_i32, %c8_i32_153 : i32
    %473 = tpu.assume_multiple %472, 8 : i32
    %474 = arith.index_cast %473 : i32 to index
    %c0_154 = arith.constant 0 : index
    %475 = vector.load %arg14[%474, %c0_154] : memref<64x512xf32, #tpu.memory_space<vmem>>, vector<8x512xf32>
    %476 = vector.extract_strided_slice %475 {offsets = [0, 0], sizes = [8, 128], strides = [1, 1]} : vector<8x512xf32> to vector<8x128xf32>
    %477 = vector.extract_strided_slice %468 {offsets = [0, 0], sizes = [8, 128], strides = [1, 1]} : vector<8x384xf32> to vector<8x128xf32>
    %478 = arith.addf %476, %477 : vector<8x128xf32>
    %479 = arith.negf %478 : vector<8x128xf32>
    %480 = math.exp %479 : vector<8x128xf32>
    %cst_155 = arith.constant 1.000000e+00 : f32
    %481 = vector.broadcast %cst_155 : f32 to vector<8x128xf32>
    %482 = arith.addf %481, %480 : vector<8x128xf32>
    %483 = arith.divf %481, %482 : vector<8x128xf32>
    %484 = vector.extract_strided_slice %475 {offsets = [0, 128], sizes = [8, 128], strides = [1, 1]} : vector<8x512xf32> to vector<8x128xf32>
    %485 = vector.extract_strided_slice %468 {offsets = [0, 128], sizes = [8, 128], strides = [1, 1]} : vector<8x384xf32> to vector<8x128xf32>
    %486 = arith.addf %484, %485 : vector<8x128xf32>
    %487 = arith.negf %486 : vector<8x128xf32>
    %488 = math.exp %487 : vector<8x128xf32>
    %cst_156 = arith.constant 1.000000e+00 : f32
    %489 = vector.broadcast %cst_156 : f32 to vector<8x128xf32>
    %490 = arith.addf %489, %488 : vector<8x128xf32>
    %491 = arith.divf %489, %490 : vector<8x128xf32>
    %492 = vector.extract_strided_slice %475 {offsets = [0, 256], sizes = [8, 128], strides = [1, 1]} : vector<8x512xf32> to vector<8x128xf32>
    %493 = vector.extract_strided_slice %468 {offsets = [0, 256], sizes = [8, 128], strides = [1, 1]} : vector<8x384xf32> to vector<8x128xf32>
    %c0_157 = arith.constant 0 : index
    %c0_158 = arith.constant 0 : index
    %494 = vector.load %arg5[%c0_157, %c0_158] : memref<1x128xf32, #tpu.memory_space<vmem>>, vector<1x128xf32>
    %495 = vector.broadcast %494 : vector<1x128xf32> to vector<8x128xf32>
    %496 = arith.addf %493, %495 : vector<8x128xf32>
    %497 = arith.mulf %483, %496 : vector<8x128xf32>
    %498 = arith.addf %492, %497 : vector<8x128xf32>
    %499 = math.tanh %498 : vector<8x128xf32>
    %cst_159 = arith.constant 1.000000e+00 : f32
    %500 = vector.broadcast %cst_159 : f32 to vector<8x128xf32>
    %501 = arith.subf %500, %491 : vector<8x128xf32>
    %502 = arith.mulf %501, %499 : vector<8x128xf32>
    %503 = arith.mulf %491, %428 : vector<8x128xf32>
    %504 = arith.addf %502, %503 : vector<8x128xf32>
    %505 = arith.truncf %504 : vector<8x128xf32> to vector<8x128xbf16>
    %c0_160 = arith.constant 0 : index
    %c0_161 = arith.constant 0 : index
    %506 = vector.load %arg6[%c0_160, %c0_161] : memref<128x384xbf16, #tpu.memory_space<vmem>>, vector<128x384xbf16>
    %cst_162 = arith.constant dense<0.000000e+00> : vector<8x384xf32>
    %507 = tpu.matmul %505, %506, %cst_162 {dimension_numbers = #tpu.dot_dimension_numbers<[1], [0], [0], [1], [0, 0, 1, 1], [], []>} : vector<8x128xbf16>, vector<128x384xbf16>, vector<8x384xf32> -> vector<8x384xf32>
    %c0_163 = arith.constant 0 : index
    %c0_164 = arith.constant 0 : index
    %508 = vector.load %arg8[%c0_163, %c0_164] : memref<1x384xf32, #tpu.memory_space<vmem>>, vector<1x384xf32>
    %509 = vector.broadcast %508 : vector<1x384xf32> to vector<8x384xf32>
    %510 = arith.addf %507, %509 : vector<8x384xf32>
    %511 = vector.extract_strided_slice %510 {offsets = [0, 0], sizes = [8, 128], strides = [1, 1]} : vector<8x384xf32> to vector<8x128xf32>
    %512 = vector.extract_strided_slice %471 {offsets = [0, 0], sizes = [8, 128], strides = [1, 1]} : vector<8x384xf32> to vector<8x128xf32>
    %513 = arith.addf %511, %512 : vector<8x128xf32>
    %514 = arith.negf %513 : vector<8x128xf32>
    %515 = math.exp %514 : vector<8x128xf32>
    %cst_165 = arith.constant 1.000000e+00 : f32
    %516 = vector.broadcast %cst_165 : f32 to vector<8x128xf32>
    %517 = arith.addf %516, %515 : vector<8x128xf32>
    %518 = arith.divf %516, %517 : vector<8x128xf32>
    %519 = vector.extract_strided_slice %510 {offsets = [0, 128], sizes = [8, 128], strides = [1, 1]} : vector<8x384xf32> to vector<8x128xf32>
    %520 = vector.extract_strided_slice %471 {offsets = [0, 128], sizes = [8, 128], strides = [1, 1]} : vector<8x384xf32> to vector<8x128xf32>
    %521 = arith.addf %519, %520 : vector<8x128xf32>
    %522 = arith.negf %521 : vector<8x128xf32>
    %523 = math.exp %522 : vector<8x128xf32>
    %cst_166 = arith.constant 1.000000e+00 : f32
    %524 = vector.broadcast %cst_166 : f32 to vector<8x128xf32>
    %525 = arith.addf %524, %523 : vector<8x128xf32>
    %526 = arith.divf %524, %525 : vector<8x128xf32>
    %527 = vector.extract_strided_slice %510 {offsets = [0, 256], sizes = [8, 128], strides = [1, 1]} : vector<8x384xf32> to vector<8x128xf32>
    %528 = vector.extract_strided_slice %471 {offsets = [0, 256], sizes = [8, 128], strides = [1, 1]} : vector<8x384xf32> to vector<8x128xf32>
    %c0_167 = arith.constant 0 : index
    %c0_168 = arith.constant 0 : index
    %529 = vector.load %arg9[%c0_167, %c0_168] : memref<1x128xf32, #tpu.memory_space<vmem>>, vector<1x128xf32>
    %530 = vector.broadcast %529 : vector<1x128xf32> to vector<8x128xf32>
    %531 = arith.addf %528, %530 : vector<8x128xf32>
    %532 = arith.mulf %518, %531 : vector<8x128xf32>
    %533 = arith.addf %527, %532 : vector<8x128xf32>
    %534 = math.tanh %533 : vector<8x128xf32>
    %cst_169 = arith.constant 1.000000e+00 : f32
    %535 = vector.broadcast %cst_169 : f32 to vector<8x128xf32>
    %536 = arith.subf %535, %526 : vector<8x128xf32>
    %537 = arith.mulf %536, %534 : vector<8x128xf32>
    %538 = arith.mulf %526, %463 : vector<8x128xf32>
    %539 = arith.addf %537, %538 : vector<8x128xf32>
    %540 = vector.extract_strided_slice %475 {offsets = [0, 384], sizes = [8, 128], strides = [1, 1]} : vector<8x512xf32> to vector<8x128xf32>
    %541 = arith.addf %465, %540 : vector<8x128xf32>
    %c7_i32 = arith.constant 7 : i32
    %542 = arith.truncf %504 : vector<8x128xf32> to vector<8x128xbf16>
    %c0_170 = arith.constant 0 : index
    %c0_171 = arith.constant 0 : index
    %543 = vector.load %arg4[%c0_170, %c0_171] : memref<128x384xbf16, #tpu.memory_space<vmem>>, vector<128x384xbf16>
    %cst_172 = arith.constant dense<0.000000e+00> : vector<8x384xf32>
    %544 = tpu.matmul %542, %543, %cst_172 {dimension_numbers = #tpu.dot_dimension_numbers<[1], [0], [0], [1], [0, 0, 1, 1], [], []>} : vector<8x128xbf16>, vector<128x384xbf16>, vector<8x384xf32> -> vector<8x384xf32>
    %545 = arith.truncf %539 : vector<8x128xf32> to vector<8x128xbf16>
    %c0_173 = arith.constant 0 : index
    %c0_174 = arith.constant 0 : index
    %546 = vector.load %arg7[%c0_173, %c0_174] : memref<128x384xbf16, #tpu.memory_space<vmem>>, vector<128x384xbf16>
    %cst_175 = arith.constant dense<0.000000e+00> : vector<8x384xf32>
    %547 = tpu.matmul %545, %546, %cst_175 {dimension_numbers = #tpu.dot_dimension_numbers<[1], [0], [0], [1], [0, 0, 1, 1], [], []>} : vector<8x128xbf16>, vector<128x384xbf16>, vector<8x384xf32> -> vector<8x384xf32>
    %c8_i32_176 = arith.constant 8 : i32
    %548 = arith.muli %c7_i32, %c8_i32_176 : i32
    %549 = tpu.assume_multiple %548, 8 : i32
    %550 = arith.index_cast %549 : i32 to index
    %c0_177 = arith.constant 0 : index
    %551 = vector.load %arg14[%550, %c0_177] : memref<64x512xf32, #tpu.memory_space<vmem>>, vector<8x512xf32>
    %552 = vector.extract_strided_slice %551 {offsets = [0, 0], sizes = [8, 128], strides = [1, 1]} : vector<8x512xf32> to vector<8x128xf32>
    %553 = vector.extract_strided_slice %544 {offsets = [0, 0], sizes = [8, 128], strides = [1, 1]} : vector<8x384xf32> to vector<8x128xf32>
    %554 = arith.addf %552, %553 : vector<8x128xf32>
    %555 = arith.negf %554 : vector<8x128xf32>
    %556 = math.exp %555 : vector<8x128xf32>
    %cst_178 = arith.constant 1.000000e+00 : f32
    %557 = vector.broadcast %cst_178 : f32 to vector<8x128xf32>
    %558 = arith.addf %557, %556 : vector<8x128xf32>
    %559 = arith.divf %557, %558 : vector<8x128xf32>
    %560 = vector.extract_strided_slice %551 {offsets = [0, 128], sizes = [8, 128], strides = [1, 1]} : vector<8x512xf32> to vector<8x128xf32>
    %561 = vector.extract_strided_slice %544 {offsets = [0, 128], sizes = [8, 128], strides = [1, 1]} : vector<8x384xf32> to vector<8x128xf32>
    %562 = arith.addf %560, %561 : vector<8x128xf32>
    %563 = arith.negf %562 : vector<8x128xf32>
    %564 = math.exp %563 : vector<8x128xf32>
    %cst_179 = arith.constant 1.000000e+00 : f32
    %565 = vector.broadcast %cst_179 : f32 to vector<8x128xf32>
    %566 = arith.addf %565, %564 : vector<8x128xf32>
    %567 = arith.divf %565, %566 : vector<8x128xf32>
    %568 = vector.extract_strided_slice %551 {offsets = [0, 256], sizes = [8, 128], strides = [1, 1]} : vector<8x512xf32> to vector<8x128xf32>
    %569 = vector.extract_strided_slice %544 {offsets = [0, 256], sizes = [8, 128], strides = [1, 1]} : vector<8x384xf32> to vector<8x128xf32>
    %c0_180 = arith.constant 0 : index
    %c0_181 = arith.constant 0 : index
    %570 = vector.load %arg5[%c0_180, %c0_181] : memref<1x128xf32, #tpu.memory_space<vmem>>, vector<1x128xf32>
    %571 = vector.broadcast %570 : vector<1x128xf32> to vector<8x128xf32>
    %572 = arith.addf %569, %571 : vector<8x128xf32>
    %573 = arith.mulf %559, %572 : vector<8x128xf32>
    %574 = arith.addf %568, %573 : vector<8x128xf32>
    %575 = math.tanh %574 : vector<8x128xf32>
    %cst_182 = arith.constant 1.000000e+00 : f32
    %576 = vector.broadcast %cst_182 : f32 to vector<8x128xf32>
    %577 = arith.subf %576, %567 : vector<8x128xf32>
    %578 = arith.mulf %577, %575 : vector<8x128xf32>
    %579 = arith.mulf %567, %504 : vector<8x128xf32>
    %580 = arith.addf %578, %579 : vector<8x128xf32>
    %581 = arith.truncf %580 : vector<8x128xf32> to vector<8x128xbf16>
    %c0_183 = arith.constant 0 : index
    %c0_184 = arith.constant 0 : index
    %582 = vector.load %arg6[%c0_183, %c0_184] : memref<128x384xbf16, #tpu.memory_space<vmem>>, vector<128x384xbf16>
    %cst_185 = arith.constant dense<0.000000e+00> : vector<8x384xf32>
    %583 = tpu.matmul %581, %582, %cst_185 {dimension_numbers = #tpu.dot_dimension_numbers<[1], [0], [0], [1], [0, 0, 1, 1], [], []>} : vector<8x128xbf16>, vector<128x384xbf16>, vector<8x384xf32> -> vector<8x384xf32>
    %c0_186 = arith.constant 0 : index
    %c0_187 = arith.constant 0 : index
    %584 = vector.load %arg8[%c0_186, %c0_187] : memref<1x384xf32, #tpu.memory_space<vmem>>, vector<1x384xf32>
    %585 = vector.broadcast %584 : vector<1x384xf32> to vector<8x384xf32>
    %586 = arith.addf %583, %585 : vector<8x384xf32>
    %587 = vector.extract_strided_slice %586 {offsets = [0, 0], sizes = [8, 128], strides = [1, 1]} : vector<8x384xf32> to vector<8x128xf32>
    %588 = vector.extract_strided_slice %547 {offsets = [0, 0], sizes = [8, 128], strides = [1, 1]} : vector<8x384xf32> to vector<8x128xf32>
    %589 = arith.addf %587, %588 : vector<8x128xf32>
    %590 = arith.negf %589 : vector<8x128xf32>
    %591 = math.exp %590 : vector<8x128xf32>
    %cst_188 = arith.constant 1.000000e+00 : f32
    %592 = vector.broadcast %cst_188 : f32 to vector<8x128xf32>
    %593 = arith.addf %592, %591 : vector<8x128xf32>
    %594 = arith.divf %592, %593 : vector<8x128xf32>
    %595 = vector.extract_strided_slice %586 {offsets = [0, 128], sizes = [8, 128], strides = [1, 1]} : vector<8x384xf32> to vector<8x128xf32>
    %596 = vector.extract_strided_slice %547 {offsets = [0, 128], sizes = [8, 128], strides = [1, 1]} : vector<8x384xf32> to vector<8x128xf32>
    %597 = arith.addf %595, %596 : vector<8x128xf32>
    %598 = arith.negf %597 : vector<8x128xf32>
    %599 = math.exp %598 : vector<8x128xf32>
    %cst_189 = arith.constant 1.000000e+00 : f32
    %600 = vector.broadcast %cst_189 : f32 to vector<8x128xf32>
    %601 = arith.addf %600, %599 : vector<8x128xf32>
    %602 = arith.divf %600, %601 : vector<8x128xf32>
    %603 = vector.extract_strided_slice %586 {offsets = [0, 256], sizes = [8, 128], strides = [1, 1]} : vector<8x384xf32> to vector<8x128xf32>
    %604 = vector.extract_strided_slice %547 {offsets = [0, 256], sizes = [8, 128], strides = [1, 1]} : vector<8x384xf32> to vector<8x128xf32>
    %c0_190 = arith.constant 0 : index
    %c0_191 = arith.constant 0 : index
    %605 = vector.load %arg9[%c0_190, %c0_191] : memref<1x128xf32, #tpu.memory_space<vmem>>, vector<1x128xf32>
    %606 = vector.broadcast %605 : vector<1x128xf32> to vector<8x128xf32>
    %607 = arith.addf %604, %606 : vector<8x128xf32>
    %608 = arith.mulf %594, %607 : vector<8x128xf32>
    %609 = arith.addf %603, %608 : vector<8x128xf32>
    %610 = math.tanh %609 : vector<8x128xf32>
    %cst_192 = arith.constant 1.000000e+00 : f32
    %611 = vector.broadcast %cst_192 : f32 to vector<8x128xf32>
    %612 = arith.subf %611, %602 : vector<8x128xf32>
    %613 = arith.mulf %612, %610 : vector<8x128xf32>
    %614 = arith.mulf %602, %539 : vector<8x128xf32>
    %615 = arith.addf %613, %614 : vector<8x128xf32>
    %616 = vector.extract_strided_slice %551 {offsets = [0, 384], sizes = [8, 128], strides = [1, 1]} : vector<8x512xf32> to vector<8x128xf32>
    %617 = arith.addf %541, %616 : vector<8x128xf32>
    %c8_i32_193 = arith.constant 8 : i32
    %cst_194 = arith.constant 1.250000e-01 : f32
    %618 = vector.broadcast %cst_194 : f32 to vector<8x128xf32>
    %619 = arith.mulf %617, %618 : vector<8x128xf32>
    %620 = arith.addf %615, %619 : vector<8x128xf32>
    %621 = arith.negf %620 : vector<8x128xf32>
    %622 = math.exp %621 : vector<8x128xf32>
    %cst_195 = arith.constant 1.000000e+00 : f32
    %623 = vector.broadcast %cst_195 : f32 to vector<8x128xf32>
    %624 = arith.addf %623, %622 : vector<8x128xf32>
    %625 = arith.divf %623, %624 : vector<8x128xf32>
    %626 = arith.mulf %620, %625 : vector<8x128xf32>
    %c0_196 = arith.constant 0 : index
    %c0_197 = arith.constant 0 : index
    %627 = vector.load %arg10[%c0_196, %c0_197] : memref<128x128xf32, #tpu.memory_space<vmem>>, vector<128x128xf32>
    %cst_198 = arith.constant dense<0.000000e+00> : vector<8x128xf32>
    %628 = tpu.matmul %626, %627, %cst_198 {dimension_numbers = #tpu.dot_dimension_numbers<[1], [0], [0], [1], [0, 0, 1, 1], [], []>} : vector<8x128xf32>, vector<128x128xf32>, vector<8x128xf32> -> vector<8x128xf32>
    %c0_199 = arith.constant 0 : index
    %c0_200 = arith.constant 0 : index
    %629 = vector.load %arg11[%c0_199, %c0_200] : memref<1x128xf32, #tpu.memory_space<vmem>>, vector<1x128xf32>
    %630 = vector.broadcast %629 : vector<1x128xf32> to vector<8x128xf32>
    %631 = arith.addf %628, %630 : vector<8x128xf32>
    %c0_201 = arith.constant 0 : index
    %c0_202 = arith.constant 0 : index
    %632 = vector.load %arg12[%c0_201, %c0_202] : memref<8x128xf32, #tpu.memory_space<vmem>>, vector<8x128xf32>
    tpu.vector_store %arg12[%c0_201, %c0_202], %631 {strides = array<i32>} : memref<8x128xf32, #tpu.memory_space<vmem>>, vector<8x128xf32>,
    return
  }
  func.func @transform_1(%arg0: i32) -> (i32, i32) {
    %c0_i32 = arith.constant 0 : i32
    %c0_i32_0 = arith.constant 0 : i32
    %c0_i32_1 = arith.constant 0 : i32
    return %c0_i32, %c0_i32_0 : i32, i32
  }
  func.func @transform_2(%arg0: i32) -> (i32, i32) {
    %c0_i32 = arith.constant 0 : i32
    %c0_i32_0 = arith.constant 0 : i32
    %c0_i32_1 = arith.constant 0 : i32
    return %c0_i32, %c0_i32_0 : i32, i32
  }
  func.func @transform_3(%arg0: i32) -> (i32, i32) {
    %c0_i32 = arith.constant 0 : i32
    %c0_i32_0 = arith.constant 0 : i32
    %c0_i32_1 = arith.constant 0 : i32
    return %c0_i32, %c0_i32_0 : i32, i32
  }
  func.func @transform_4(%arg0: i32) -> (i32, i32) {
    %c0_i32 = arith.constant 0 : i32
    %c0_i32_0 = arith.constant 0 : i32
    %c0_i32_1 = arith.constant 0 : i32
    return %c0_i32, %c0_i32_0 : i32, i32
  }
  func.func @transform_5(%arg0: i32) -> (i32, i32) {
    %c0_i32 = arith.constant 0 : i32
    %c0_i32_0 = arith.constant 0 : i32
    %c0_i32_1 = arith.constant 0 : i32
    return %c0_i32, %c0_i32_0 : i32, i32
  }
  func.func @transform_6(%arg0: i32) -> (i32, i32) {
    %c0_i32 = arith.constant 0 : i32
    %c0_i32_0 = arith.constant 0 : i32
    %c0_i32_1 = arith.constant 0 : i32
    return %c0_i32, %c0_i32_0 : i32, i32
  }
  func.func @transform_7(%arg0: i32) -> (i32, i32) {
    %c0_i32 = arith.constant 0 : i32
    %c0_i32_0 = arith.constant 0 : i32
    %c0_i32_1 = arith.constant 0 : i32
    return %c0_i32, %c0_i32_0 : i32, i32
  }
  func.func @transform_8(%arg0: i32) -> (i32, i32) {
    %c0_i32 = arith.constant 0 : i32
    %c0_i32_0 = arith.constant 0 : i32
    %c0_i32_1 = arith.constant 0 : i32
    return %c0_i32, %c0_i32_0 : i32, i32
  }
  func.func @transform_9(%arg0: i32) -> (i32, i32) {
    %c0_i32 = arith.constant 0 : i32
    %c0_i32_0 = arith.constant 0 : i32
    %c0_i32_1 = arith.constant 0 : i32
    return %c0_i32, %c0_i32_0 : i32, i32
  }
  func.func @transform_10(%arg0: i32) -> (i32, i32) {
    %c0_i32 = arith.constant 0 : i32
    %c0_i32_0 = arith.constant 0 : i32
    %c0_i32_1 = arith.constant 0 : i32
    return %c0_i32, %c0_i32_0 : i32, i32
  }
  func.func @transform_11(%arg0: i32) -> (i32, i32) {
    %c0_i32 = arith.constant 0 : i32
    %c0_i32_0 = arith.constant 0 : i32
    %c0_i32_1 = arith.constant 0 : i32
    return %c0_i32, %c0_i32_0 : i32, i32
  }
}

</mosaic_0001>

<bundles_post_ra>
// kernel: tpu_custom_call.1
= control target key start
LH: loop header
LB: loop body
LE: loop exit
PB: predicated region body
PF: predicated region fallthrough
CT: control target
= control target key end

     0   :  { %16 = vsyncpa [#allocation6], 0  ;;  %s6676_s0 = inlined_call_operand.vmem [shape: f32[64,16], index: 0, kind: input, shape index: {}]   ;;  %s6677_s1 = inlined_call_operand.vmem [shape: f32[16,512], index: 1, kind: input, shape index: {}]   ;;  %s6678_s2 = inlined_call_operand.vmem [shape: f32[1,512], index: 2, kind: input, shape index: {}]   ;;  %s6679_s3 = inlined_call_operand.hbm [shape: bf16[128,384], index: 3, kind: input, shape index: {}]   ;;  %s6680_s4 = inlined_call_operand.vmem [shape: f32[1,128], index: 4, kind: input, shape index: {}]   ;;  %s6681_s5 = inlined_call_operand.hbm [shape: bf16[128,384], index: 5, kind: input, shape index: {}]   ;;  %s6682_s6 = inlined_call_operand.hbm [shape: bf16[128,384], index: 6, kind: input, shape index: {}]   ;;  %s6683_s7 = inlined_call_operand.vmem [shape: f32[1,384], index: 7, kind: input, shape index: {}]   ;;  %s6684_s8 = inlined_call_operand.vmem [shape: f32[1,128], index: 8, kind: input, shape index: {}]   ;;  %s6685_s9 = inlined_call_operand.hbm [shape: f32[128,128], index: 9, kind: input, shape index: {}]   ;;  %s6686_s10 = inlined_call_operand.vmem [shape: f32[1,128], index: 10, kind: input, shape index: {}]   ;;  %s6687_s11 = inlined_call_operand.hbm [shape: f32[8,128], index: 11, kind: output, shape index: {}]  }
   0x1   :  { %17 = vsyncpa [#allocation9], 0 }
   0x2   :  { %18 = vsyncpa [#allocation12], 0 }
   0x3   :  { %19 = vsyncpa [#allocation7], 0  ;;  %s4904_s17 = smov [#allocation8]   ;;  %s4905_s19 = smov [#allocation5]  }
   0x4   :  { %s43_s18 = sshll.u32 %s4904_s17, 4  ;;  %s29_s20 = sshll.u32 %s4905_s19, 4  ;;  %s44_s18 = int_to_ptr.vmem [resolvable:$true] %s43_s18  ;;  %s30_s20 = int_to_ptr.vmem [resolvable:$true] %s29_s20 }
   0x5   :  { %s4802_s21 = scalar_lea.vmem %s44_s18, 3072  ;;  %p4807_p1 = scmp.lt.s32.totalorder %s44_s18, %s44_s18 }
   0x6   :  { %p4803_p0 = scmp.ne.s32.totalorder %s44_s18, %s4802_s21  ;;  %p4808_p2 = scmp.lt.s32.totalorder %s4802_s21, %s4802_s21 }
   0x8   :  { %p4809_p3 = por %p4808_p2, %p4807_p1 }
   0xa   :  { %p4810_p4 = pnand %p4809_p3, %p4803_p0 }
   0xc   :  { %4813 = shalt.err (!%p4810_p4)
}
   0xd   :  { %s4906_s22 = smov 192   ;;  %s4907_s23 = smov 12  }
   0xe   :  { %49 = dma.hbm_to_vmem [thread:$0]  %s6681_s5, 3072, %s44_s18, [#allocation9], %s4906_s22, %s4906_s22, %s4907_s23  }
   0xf   :  { %s4822_s26 = scalar_lea.vmem %s30_s20, 3072  ;;  %p4827_p6 = scmp.lt.s32.totalorder %s30_s20, %s30_s20 }
  0x10   :  { %p4823_p5 = scmp.ne.s32.totalorder %s30_s20, %s4822_s26  ;;  %p4828_p7 = scmp.lt.s32.totalorder %s4822_s26, %s4822_s26 }
  0x12   :  { %p4829_p8 = por %p4828_p7, %p4827_p6 }
  0x14   :  { %p4830_p9 = pnand %p4829_p8, %p4823_p5 }
  0x16   :  { %4833 = shalt.err (!%p4830_p9)
}
  0x17   :  { %35 = dma.hbm_to_vmem [thread:$0]  %s6679_s3, 3072, %s30_s20, [#allocation6], %s4906_s22, %s4906_s22, %s4907_s23  }
  0x18   :  { %s4908_s29 = smov [#allocation10]   ;;  %s4909_s12 = smov [#allocation11]  }
  0x19   :  { %s55_s30 = sshll.u32 %s4908_s29, 4  ;;  %s71_s13 = sshll.u32 %s4909_s12, 4  ;;  %s56_s30 = int_to_ptr.vmem [resolvable:$true] %s55_s30  ;;  %s72_s13 = int_to_ptr.vmem [resolvable:$true] %s71_s13 }
  0x1a   :  { %s4842_s14 = scalar_lea.vmem %s56_s30, 3072  ;;  %p4847_p11 = scmp.lt.s32.totalorder %s56_s30, %s56_s30 }
  0x1b   :  { %p4843_p10 = scmp.ne.s32.totalorder %s56_s30, %s4842_s14  ;;  %p4848_p12 = scmp.lt.s32.totalorder %s4842_s14, %s4842_s14 }
  0x1d   :  { %p4849_p13 = por %p4848_p12, %p4847_p11 }
  0x1f   :  { %p4850_p0 = pnand %p4849_p13, %p4843_p10 }
  0x21   :  { %4853 = shalt.err (!%p4850_p0)
}
  0x22   :  { %61 = dma.hbm_to_vmem [thread:$0]  %s6682_s6, 3072, %s56_s30, [#allocation9], %s4906_s22, %s4906_s22, %s4907_s23  }
  0x23   :  { %s4862_s16 = scalar_lea.vmem %s72_s13, 2048  ;;  %p4867_p2 = scmp.lt.s32.totalorder %s72_s13, %s72_s13 }
  0x24   :  { %p4863_p1 = scmp.ne.s32.totalorder %s72_s13, %s4862_s16  ;;  %p4868_p3 = scmp.lt.s32.totalorder %s4862_s16, %s4862_s16 }
  0x26   :  { %p4869_p4 = por %p4868_p3, %p4867_p2 }
  0x28   :  { %p4870_p5 = pnand %p4869_p4, %p4863_p1 }
  0x2a   :  { %4873 = shalt.err (!%p4870_p5)
}
  0x2b   :  { %s4910_s3 = smov 128   ;;  %s4911_s17 = smov 8  }
  0x2c   :  { %77 = dma.hbm_to_vmem [thread:$0]  %s6685_s9, 2048, %s72_s13, [#allocation12], %s4910_s3, %s4910_s3, %s4911_s17  }
  0x2d   :  { %4894 = dma.done.wait [#allocation6], 3072  }
  0x2e   :  { %4895 = vsyncadd [#allocation6], 4294964224 }
  0x2f   :  { %4896 = dma.done.wait [#allocation9], 6144  }
  0x30   :  { %4897 = vsyncadd [#allocation9], 4294961152 }
  0x31   :  { %4898 = dma.done.wait [#allocation12], 2048  }
  0x32   :  { %4899 = vsyncadd [#allocation12], 4294965248  ;;  %v126_v0 = vld [vmem:[%s6676_s0] sm:$0xff]  ;;  %v128_v1 = vld [vmem:[%s6676_s0 + $0x8] sm:$0xff] }
  0x33   :  { %v4997_v2 = vld [vmem:[%s6676_s0 + $0x10] sm:$0xff]  ;;  %v5002_v3 = vld [vmem:[%s6676_s0 + $0x18] sm:$0xff]  ;;  %v5007_v4 = vld [vmem:[%s6676_s0 + $0x20] sm:$0xff] }
  0x34   :  { %v5012_v5 = vld [vmem:[%s6676_s0 + $0x28] sm:$0xff]  ;;  %v5017_v6 = vld [vmem:[%s6676_s0 + $0x30] sm:$0xff]  ;;  %v5022_v7 = vld [vmem:[%s6676_s0 + $0x38] sm:$0xff] }
  0x35   :  { %149 = vsyncadd [#allocation4], 1024 }
  0x36   :  { %4900 = dma.done.wait [#allocation4], 1024 }
  0x37   :  { %4901 = vsyncadd [#allocation4], 4294966272  ;;  %v6724_v8 = vmov 0.0   ;;  %v166_v9 = vld [vmem:[%s6677_s1 + $0x28] sm:$0xff]  ;;  %v165_v10 = vld [vmem:[%s6677_s1 + $0x20] sm:$0xff]  ;;  %vm191_vm0 = vcmask 130048  }
  0x38   :  { %280 = vmatprep.mubr.f32.mxu0 %v6724_v8  ;;  %393 = vmatprep.mubr.f32.mxu1 %v6724_v8  ;;  %v162_v11 = vld [vmem:[%s6677_s1 + $0x8] sm:$0xff]  ;;  %v161_v12 = vld [vmem:[%s6677_s1] sm:$0xff]  ;;  %v168_v16 = vld [vmem:[%s6677_s1 + $0x38] sm:$0xff]  ;;  %v6688_v40 = vmov 0   ;;  %vm4914_vm1 = vmmov 0   ;;  %s4915_s18 = smov [#allocation13]  }
  0x39   :  { %244 = vmatprep.subr.mxu0 %v166_v9  ;;  %v5038_v13 = vld [vmem:[#allocation5 + $0xac] ss:$12 sps:$4 sm:$0xff]   ;;  %v5040_v14 = vld [vmem:[#allocation5 + $0xa8] ss:$12 sps:$4 sm:$0xff]   ;;  %v5054_v18 = vld [vmem:[#allocation5 + $0x90] ss:$12 sps:$4 sm:$0xff]   ;;  %357 = vmatprep.subr.mxu1 %v168_v16 }
  0x3a   :  { %245 = vmatpush1.msra.mxu0 %v165_v10  ;;  %v5042_v15 = vld [vmem:[#allocation5 + $0x94] ss:$12 sps:$4 sm:$0xff]   ;;  %v5057_v19 = vld [vmem:[#allocation5 + $0x7c] ss:$12 sps:$4 sm:$0xff]   ;;  %v5068_v22 = vld [vmem:[#allocation5 + $0x78] ss:$12 sps:$4 sm:$0xff]  }
  0x3b   :  { %246 = vmatprep.subr.mxu0 %v162_v11  ;;  %v167_v17 = vld [vmem:[%s6677_s1 + $0x30] sm:$0xff]  ;;  %v164_v20 = vld [vmem:[%s6677_s1 + $0x18] sm:$0xff]  ;;  %v5073_v24 = vld [vmem:[#allocation5 + $0x60] ss:$12 sps:$4 sm:$0xff]   ;;  %s3469_s0 = sshll.u32 %s4915_s18, 4  ;;  %s3470_s0 = int_to_ptr.vmem [resolvable:$true] %s3469_s0 }
  0x3c   :  { %247 = vmatpush1.msra.mxu0 %v161_v12  ;;  %358 = vmatpush1.msra.mxu1 %v167_v17  ;;  %v163_v21 = vld [vmem:[%s6677_s1 + $0x10] sm:$0xff]  ;;  %v5084_v26 = vld [vmem:[#allocation5 + $0x4c] ss:$12 sps:$4 sm:$0xff]   ;;  %v5112_v32 = vld [vmem:[#allocation5 + $0x1c] ss:$12 sps:$4 sm:$0xff]   ;;  %s4874_s19 = scalar_lea.vmem %s3470_s0, 128  ;;  %p4879_p7 = scmp.lt.s32.totalorder %s3470_s0, %s3470_s0 }
  0x3d   :  { %3501 = vmatmul.mubr.msk.f32.vlgmr.msra.gmra.mxu0 %vm191_vm0, %v126_v0  ;;  %634 = vmatprep.subr.bf16.mxu0 %v5038_v13  ;;  %v5071_v23 = vld [vmem:[#allocation5 + $0x64] ss:$12 sps:$4 sm:$0xff]   ;;  %v5094_v28 = vld [vmem:[#allocation5 + $0x48] ss:$12 sps:$4 sm:$0xff]   ;;  %v5103_v30 = vld [vmem:[#allocation5 + $0x80] ss:$12 sps:$4 sm:$0xff]   ;;  %p4875_p6 = scmp.ne.s32.totalorder %s3470_s0, %s4874_s19  ;;  %p4880_p8 = scmp.lt.s32.totalorder %s4874_s19, %s4874_s19 }
  0x3e   :  { %635 = vmatpush1.bf16.msra.mxu0 %v5040_v14  ;;  %286 = vmatprep.mubr.f32.mxu0 %v6724_v8  ;;  %v5080_v25 = vld [vmem:[#allocation5 + $0xb0] ss:$12 sps:$4 sm:$0xff]   ;;  %v5088_v27 = vld [vmem:[#allocation5 + $0x98] ss:$12 sps:$4 sm:$0xff]   ;;  %v5099_v29 = vld [vmem:[#allocation5 + $0x34] ss:$12 sps:$4 sm:$0xff]  }
  0x3f   :  { %636 = vmatprep.subr.bf16.mxu0 %v5042_v15  ;;  %359 = vmatprep.subr.mxu1 %v164_v20  ;;  %v5105_v31 = vld [vmem:[#allocation5 + $0x30] ss:$12 sps:$4 sm:$0xff]   ;;  %v5115_v33 = vld [vmem:[#allocation5 + $0x68] ss:$12 sps:$4 sm:$0xff]   ;;  %v5121_v34 = vld [vmem:[#allocation5 + $0x18] ss:$12 sps:$4 sm:$0xff]   ;;  %p4881_p9 = por %p4880_p8, %p4879_p7 }
  0x40   :  { %360 = vmatpush1.msra.mxu1 %v163_v21  ;;  %v5128_v35 = vld [vmem:[#allocation5 + $0x4] ss:$12 sps:$4 sm:$0xff]   ;;  %v5137_v37 = vld [vmem:[#allocation5] ss:$12 sps:$4 sm:$0xff]   ;;  %v5167_v41 = vld [vmem:[#allocation5 + $0x8] ss:$12 sps:$4 sm:$0xff]  }
  0x41   :  { %3502 = vmatmul.mubr.msk.f32.gmra.mxu0 %vm191_vm0, %v128_v1  ;;  %3509 = vmatmul.mubr.msk.f32.vlgmr.msra.gmra.mxu1 %vm191_vm0, %v126_v0  ;;  %v5131_v36 = vld [vmem:[#allocation5 + $0x50] ss:$12 sps:$4 sm:$0xff]   ;;  %v5145_v38 = vld [vmem:[#allocation5 + $0x38] ss:$12 sps:$4 sm:$0xff]   ;;  %v5157_v39 = vld [vmem:[#allocation5 + $0x20] ss:$12 sps:$4 sm:$0xff]   ;;  %p4882_p10 = pnand %p4881_p9, %p4875_p6 }
  0x42   :  { %637 = vmatpush1.bf16.msra.mxu0 %v5054_v18  ;;  %292 = vmatprep.mubr.f32.mxu0 %v6724_v8  ;;  %v5181_v42 = vld [vmem:[#allocation10 + $0xac] ss:$12 sps:$4 sm:$0xff]   ;;  %v5183_v43 = vld [vmem:[#allocation10 + $0xa8] ss:$12 sps:$4 sm:$0xff]   ;;  %v5189_v45 = vld [vmem:[#allocation10 + $0xb0] ss:$12 sps:$4 sm:$0xff]  }
  0x43   :  { %638 = vmatprep.subr.bf16.mxu0 %v5057_v19  ;;  %3859 = vmatprep.subr.bf16.mxu1 %v6724_v8  ;;  %v5187_v44 = vld [vmem:[#allocation10 + $0x94] ss:$12 sps:$4 sm:$0xff]   ;;  %v5191_v46 = vld [vmem:[#allocation10 + $0x90] ss:$12 sps:$4 sm:$0xff]   ;;  %v5199_v48 = vld [vmem:[#allocation10 + $0x98] ss:$12 sps:$4 sm:$0xff]  }
  0x44   :  { %399 = vmatprep.mubr.f32.mxu1 %v6724_v8  ;;  %3860 = vmatpush3.bf16.msra.mxu1 %v5080_v25  ;;  %v5197_v47 = vld [vmem:[#allocation10 + $0x7c] ss:$12 sps:$4 sm:$0xff]   ;;  %v5201_v49 = vld [vmem:[#allocation10 + $0x78] ss:$12 sps:$4 sm:$0xff]   ;;  %v5209_v51 = vld [vmem:[#allocation10 + $0x80] ss:$12 sps:$4 sm:$0xff]  }
  0x45   :  { %3503 = vmatmul.mubr.msk.f32.gmra.mxu0 %vm191_vm0, %v4997_v2  ;;  %3510 = vmatmul.mubr.msk.f32.gmra.mxu1 %vm191_vm0, %v128_v1  ;;  %v5207_v50 = vld [vmem:[#allocation10 + $0x64] ss:$12 sps:$4 sm:$0xff]   ;;  %v5211_v52 = vld [vmem:[#allocation10 + $0x60] ss:$12 sps:$4 sm:$0xff]   ;;  %v5219_v54 = vld [vmem:[#allocation10 + $0x68] ss:$12 sps:$4 sm:$0xff]  }
  0x46   :  { %639 = vmatpush1.bf16.msra.mxu0 %v5068_v22  ;;  %298 = vmatprep.mubr.f32.mxu0 %v6724_v8  ;;  %v5217_v53 = vld [vmem:[#allocation10 + $0x4c] ss:$12 sps:$4 sm:$0xff]   ;;  %v5221_v55 = vld [vmem:[#allocation10 + $0x48] ss:$12 sps:$4 sm:$0xff]   ;;  %v5229_v57 = vld [vmem:[#allocation10 + $0x50] ss:$12 sps:$4 sm:$0xff]  }
  0x47   :  { %640 = vmatprep.subr.bf16.mxu0 %v5071_v23  ;;  %3861 = vmatprep.subr.bf16.mxu1 %v6724_v8  ;;  %v5227_v56 = vld [vmem:[#allocation10 + $0x34] ss:$12 sps:$4 sm:$0xff]   ;;  %v5231_v58 = vld [vmem:[#allocation10 + $0x30] ss:$12 sps:$4 sm:$0xff]   ;;  %v5239_v60 = vld [vmem:[#allocation10 + $0x38] ss:$12 sps:$4 sm:$0xff]  }
  0x48   :  { %405 = vmatprep.mubr.f32.mxu1 %v6724_v8  ;;  %3862 = vmatpush3.bf16.msra.mxu1 %v5088_v27  ;;  %v5237_v59 = vld [vmem:[#allocation10 + $0x1c] ss:$12 sps:$4 sm:$0xff]   ;;  %6873 = vst [vmem:[#allocation21_spill] sm:$0xff] %v5239_v60  ;;  %v5241_v61 = vld [vmem:[#allocation10 + $0x18] ss:$12 sps:$4 sm:$0xff]  }
  0x49   :  { %3504 = vmatmul.mubr.msk.f32.gmra.mxu0 %vm191_vm0, %v5002_v3  ;;  %3511 = vmatmul.mubr.msk.f32.gmra.mxu1 %vm191_vm0, %v4997_v2  ;;  %6872 = vst [vmem:[#allocation20_spill] sm:$0xff] %v5237_v59  ;;  %6874 = vst [vmem:[#allocation22_spill] sm:$0xff] %v5241_v61  ;;  %v5247_v62 = vld [vmem:[#allocation10 + $0x4] ss:$12 sps:$4 sm:$0xff]   ;;  %v5249_v63 = vld [vmem:[#allocation10 + $0x20] ss:$12 sps:$4 sm:$0xff]  }
  0x4a   :  { %641 = vmatpush1.bf16.msra.mxu0 %v5073_v24  ;;  %304 = vmatprep.mubr.f32.mxu0 %v6724_v8  ;;  %6875 = vst [vmem:[#allocation23_spill] sm:$0xff] %v5247_v62  ;;  %6876 = vst [vmem:[#allocation24_spill] sm:$0xff] %v5249_v63  ;;  %v5251_v0 = vld [vmem:[#allocation10] ss:$12 sps:$4 sm:$0xff]   ;;  %v5257_v1 = vld [vmem:[#allocation10 + $0x8] ss:$12 sps:$4 sm:$0xff]  }
  0x4b   :  { %642 = vmatprep.subr.bf16.mxu0 %v5084_v26  ;;  %3863 = vmatprep.subr.bf16.mxu1 %v6724_v8  ;;  %6877 = vst [vmem:[#allocation25_spill] sm:$0xff] %v5251_v0  ;;  %6878 = vst [vmem:[#allocation26_spill] sm:$0xff] %v5257_v1  ;;  %v5261_v2 = vld [vmem:[#allocation8 + $0xac] ss:$12 sps:$4 sm:$0xff]   ;;  %v5285_v9 = vld [vmem:[#allocation8 + $0x7c] ss:$12 sps:$4 sm:$0xff]  }
  0x4c   :  { %411 = vmatprep.mubr.f32.mxu1 %v6724_v8  ;;  %3864 = vmatpush3.bf16.msra.mxu1 %v5103_v30  ;;  %6879 = vst [vmem:[#allocation27_spill] sm:$0xff] %v5261_v2  ;;  %6885 = vst [vmem:[#allocation33_spill] sm:$0xff] %v5285_v9  ;;  %v5288_v10 = vld [vmem:[#allocation8 + $0x78] ss:$12 sps:$4 sm:$0xff]   ;;  %v5290_v11 = vld [vmem:[#allocation8 + $0x80] ss:$12 sps:$4 sm:$0xff]  }
  0x4d   :  { %3505 = vmatmul.mubr.msk.f32.gmra.mxu0 %vm191_vm0, %v5007_v4  ;;  %3512 = vmatmul.mubr.msk.f32.gmra.mxu1 %vm191_vm0, %v5002_v3  ;;  %v5266_v3 = vld [vmem:[#allocation8 + $0xa8] ss:$12 sps:$4 sm:$0xff]   ;;  %6886 = vst [vmem:[#allocation34_spill] sm:$0xff] %v5288_v10  ;;  %6887 = vst [vmem:[#allocation35_spill] sm:$0xff] %v5290_v11  ;;  %v5295_v12 = vld [vmem:[#allocation8 + $0x64] ss:$12 sps:$4 sm:$0xff]  }
  0x4e   :  { %643 = vmatpush1.bf16.msra.mxu0 %v5094_v28  ;;  %310 = vmatprep.mubr.f32.mxu0 %v6724_v8  ;;  %6880 = vst [vmem:[#allocation28_spill] sm:$0xff] %v5266_v3  ;;  %6888 = vst [vmem:[#allocation36_spill] sm:$0xff] %v5295_v12  ;;  %v5298_v16 = vld [vmem:[#allocation8 + $0x60] ss:$12 sps:$4 sm:$0xff]   ;;  %v5300_v17 = vld [vmem:[#allocation8 + $0x68] ss:$12 sps:$4 sm:$0xff]  }
  0x4f   :  { %644 = vmatprep.subr.bf16.mxu0 %v5099_v29  ;;  %3865 = vmatprep.subr.bf16.mxu1 %v6724_v8  ;;  %6889 = vst [vmem:[#allocation37_spill] sm:$0xff] %v5298_v16  ;;  %6890 = vst [vmem:[#allocation38_spill] sm:$0xff] %v5300_v17  ;;  %v5305_v20 = vld [vmem:[#allocation8 + $0x4c] ss:$12 sps:$4 sm:$0xff]   ;;  %v5307_v21 = vld [vmem:[#allocation8 + $0x48] ss:$12 sps:$4 sm:$0xff]  }
  0x50   :  { %417 = vmatprep.mubr.f32.mxu1 %v6724_v8  ;;  %3866 = vmatpush3.bf16.msra.mxu1 %v5115_v33  ;;  %6891 = vst [vmem:[#allocation39_spill] sm:$0xff] %v5305_v20  ;;  %6892 = vst [vmem:[#allocation40_spill] sm:$0xff] %v5307_v21 }
  0x51   :  { %3506 = vmatmul.mubr.msk.f32.gmra.mxu0 %vm191_vm0, %v5012_v5  ;;  %3513 = vmatmul.mubr.msk.f32.gmra.mxu1 %vm191_vm0, %v5007_v4  ;;  %v5268_v4 = vld [vmem:[#allocation8 + $0xb0] ss:$12 sps:$4 sm:$0xff]  }
  0x52   :  { %645 = vmatpush1.bf16.msra.mxu0 %v5105_v31  ;;  %316 = vmatprep.mubr.f32.mxu0 %v6724_v8  ;;  %6881 = vst [vmem:[#allocation29_spill] sm:$0xff] %v5268_v4 }
  0x53   :  { %646 = vmatprep.subr.bf16.mxu0 %v5112_v32  ;;  %3867 = vmatprep.subr.bf16.mxu1 %v6724_v8 }
  0x54   :  { %423 = vmatprep.mubr.f32.mxu1 %v6724_v8  ;;  %3868 = vmatpush3.bf16.msra.mxu1 %v5131_v36 }
  0x55   :  { %3507 = vmatmul.mubr.msk.f32.gmra.mxu0 %vm191_vm0, %v5017_v6  ;;  %3514 = vmatmul.mubr.msk.f32.gmra.mxu1 %vm191_vm0, %v5012_v5  ;;  %v5273_v5 = vld [vmem:[#allocation8 + $0x94] ss:$12 sps:$4 sm:$0xff]  }
  0x56   :  { %647 = vmatpush1.bf16.msra.mxu0 %v5121_v34  ;;  %322 = vmatprep.mubr.f32.mxu0 %v6724_v8  ;;  %6882 = vst [vmem:[#allocation30_spill] sm:$0xff] %v5273_v5 }
  0x57   :  { %648 = vmatprep.subr.bf16.mxu0 %v5128_v35  ;;  %3869 = vmatprep.subr.bf16.mxu1 %v6724_v8 }
  0x58   :  { %429 = vmatprep.mubr.f32.mxu1 %v6724_v8  ;;  %3870 = vmatpush3.bf16.msra.mxu1 %v5145_v38 }
  0x59   :  { %3508 = vmatmul.mubr.msk.f32.gmra.mxu0 %vm191_vm0, %v5022_v7  ;;  %3515 = vmatmul.mubr.msk.f32.gmra.mxu1 %vm191_vm0, %v5017_v6  ;;  %v5278_v6 = vld [vmem:[#allocation8 + $0x90] ss:$12 sps:$4 sm:$0xff]  }
  0x5a   :  { %649 = vmatpush1.bf16.msra.mxu0 %v5137_v37  ;;  %666 = vmatprep.mubr.bf16.mxu0 %v6688_v40  ;;  %6883 = vst [vmem:[#allocation31_spill] sm:$0xff] %v5278_v6 }
  0x5b   :  { %3871 = vmatprep.subr.bf16.mxu1 %v6724_v8  ;;  %435 = vmatprep.mubr.f32.mxu1 %v6724_v8 }
  0x5c   :  { %3872 = vmatpush3.bf16.msra.mxu1 %v5157_v39  ;;  %875 = vmatprep.subr.bf16.mxu0 %v5181_v42 }
  0x5d   :  { %667 = vmatmul.mubr.bf16.vlgmr.msra.gmra.mxu0 %v6688_v40  ;;  %3516 = vmatmul.mubr.msk.f32.gmra.mxu1 %vm191_vm0, %v5022_v7  ;;  %v5280_v7 = vld [vmem:[#allocation8 + $0x98] ss:$12 sps:$4 sm:$0xff]  }
  0x5e   :  { %907 = vmatprep.mubr.bf16.mxu0 %v6688_v40  ;;  %3873 = vmatprep.subr.bf16.mxu1 %v6724_v8  ;;  %6884 = vst [vmem:[#allocation32_spill] sm:$0xff] %v5280_v7 }
  0x5f   :  { %3875 = vmatprep.mubr.msk.bf16.mxu1 %vm4914_vm1, %v6724_v8  ;;  %876 = vmatpush1.bf16.msra.mxu0 %v5183_v43 }
  0x60   :  { %3874 = vmatpush3.bf16.msra.mxu1 %v5167_v41  ;;  %877 = vmatprep.subr.bf16.mxu0 %v5187_v44 }
  0x61   :  { %3879 = vmatprep.subr.bf16.mxu1 %v6724_v8 }
  0x63   :  { %3876 = vmatmul.mubr.bf16.vlgmr.msra.gmra.mxu1 %v6688_v40  ;;  %878 = vmatpush1.bf16.msra.mxu0 %v5191_v46 }
  0x64   :  { %3895 = vmatprep.mubr.msk.bf16.mxu1 %vm4914_vm1, %v6724_v8  ;;  %3880 = vmatpush3.bf16.msra.mxu1 %v5189_v45 }
  0x65   :  { %3881 = vmatprep.subr.bf16.mxu1 %v6724_v8  ;;  %879 = vmatprep.subr.bf16.mxu0 %v5197_v47 }
  0x67   :  { %880 = vmatpush1.bf16.msra.mxu0 %v5201_v49 }
  0x68   :  { %3882 = vmatpush3.bf16.msra.mxu1 %v5199_v48  ;;  %881 = vmatprep.subr.bf16.mxu0 %v5207_v50 }
  0x69   :  { %3883 = vmatprep.subr.bf16.mxu1 %v6724_v8 }
  0x6b   :  { %882 = vmatpush1.bf16.msra.mxu0 %v5211_v52 }
  0x6c   :  { %3884 = vmatpush3.bf16.msra.mxu1 %v5209_v51  ;;  %883 = vmatprep.subr.bf16.mxu0 %v5217_v53 }
  0x6d   :  { %3885 = vmatprep.subr.bf16.mxu1 %v6724_v8 }
  0x6f   :  { %884 = vmatpush1.bf16.msra.mxu0 %v5221_v55 }
  0x70   :  { %3886 = vmatpush3.bf16.msra.mxu1 %v5219_v54  ;;  %885 = vmatprep.subr.bf16.mxu0 %v5227_v56 }
  0x71   :  { %3887 = vmatprep.subr.bf16.mxu1 %v6724_v8 }
  0x73   :  { %886 = vmatpush1.bf16.msra.mxu0 %v5231_v58 }
  0x74   :  { %3888 = vmatpush3.bf16.msra.mxu1 %v5229_v57  ;;  %887 = vmatprep.subr.bf16.mxu0 %v5237_v59 }
  0x75   :  { %3889 = vmatprep.subr.bf16.mxu1 %v6724_v8 }
  0x77   :  { %888 = vmatpush1.bf16.msra.mxu0 %v5241_v61 }
  0x78   :  { %3890 = vmatpush3.bf16.msra.mxu1 %v5239_v60  ;;  %889 = vmatprep.subr.bf16.mxu0 %v5247_v62 }
  0x79   :  { %3891 = vmatprep.subr.bf16.mxu1 %v6724_v8 }
  0x7b   :  { %890 = vmatpush1.bf16.msra.mxu0 %v5251_v0 }
  0x7c   :  { %3892 = vmatpush3.bf16.msra.mxu1 %v5249_v63  ;;  %1170 = vmatprep.subr.bf16.mxu0 %v5261_v2 }
  0x7d   :  { %3893 = vmatprep.subr.bf16.mxu1 %v6724_v8 }
  0x7e   :  { %908 = vmatmul.mubr.bf16.vlgmr.msra.gmra.mxu0 %v6688_v40 }
  0x7f   :  { %1202 = vmatprep.mubr.bf16.mxu0 %v6688_v40  ;;  %1171 = vmatpush1.bf16.msra.mxu0 %v5266_v3 }
  0x80   :  { %3894 = vmatpush3.bf16.msra.mxu1 %v5257_v1  ;;  %1172 = vmatprep.subr.bf16.mxu0 %v5273_v5 }
  0x81   :  { %3899 = vmatprep.subr.bf16.mxu1 %v6724_v8 }
  0x83   :  { %3896 = vmatmul.mubr.bf16.vlgmr.msra.gmra.mxu1 %v6688_v40  ;;  %1173 = vmatpush1.bf16.msra.mxu0 %v5278_v6  ;;  %v5309_v40 = vld [vmem:[#allocation8 + $0x50] ss:$12 sps:$4 sm:$0xff]  }
  0x84   :  { %3900 = vmatpush3.bf16.msra.mxu1 %v5268_v4  ;;  %3915 = vmatprep.mubr.msk.bf16.mxu1 %vm4914_vm1, %v6724_v8  ;;  %6893 = vst [vmem:[#allocation41_spill] sm:$0xff] %v5309_v40 }
  0x85   :  { %3901 = vmatprep.subr.bf16.mxu1 %v6724_v8  ;;  %1174 = vmatprep.subr.bf16.mxu0 %v5285_v9 }
  0x87   :  { %1175 = vmatpush1.bf16.msra.mxu0 %v5288_v10  ;;  %v5327_v10 = vld [vmem:[#allocation8 + $0x18] ss:$12 sps:$4 sm:$0xff]  }
  0x88   :  { %3902 = vmatpush3.bf16.msra.mxu1 %v5280_v7  ;;  %1176 = vmatprep.subr.bf16.mxu0 %v5295_v12  ;;  %v5317_v12 = vld [vmem:[#allocation8 + $0x30] ss:$12 sps:$4 sm:$0xff]   ;;  %6898 = vst [vmem:[#allocation46_spill] sm:$0xff] %v5327_v10 }
  0x89   :  { %3903 = vmatprep.subr.bf16.mxu1 %v6724_v8  ;;  %6895 = vst [vmem:[#allocation43_spill] sm:$0xff] %v5317_v12 }
  0x8b   :  { %1177 = vmatpush1.bf16.msra.mxu0 %v5298_v16  ;;  %v5319_v16 = vld [vmem:[#allocation8 + $0x38] ss:$12 sps:$4 sm:$0xff]  }
  0x8c   :  { %3904 = vmatpush3.bf16.msra.mxu1 %v5290_v11  ;;  %v5312_v11 = vld [vmem:[#allocation8 + $0x34] ss:$12 sps:$4 sm:$0xff]   ;;  %1178 = vmatprep.subr.bf16.mxu0 %v5305_v20  ;;  %6896 = vst [vmem:[#allocation44_spill] sm:$0xff] %v5319_v16 }
  0x8d   :  { %3905 = vmatprep.subr.bf16.mxu1 %v6724_v8  ;;  %6894 = vst [vmem:[#allocation42_spill] sm:$0xff] %v5312_v11  ;;  %v5329_v20 = vld [vmem:[#allocation8 + $0x20] ss:$12 sps:$4 sm:$0xff]  }
  0x8e   :  { %6899 = vst [vmem:[#allocation47_spill] sm:$0xff] %v5329_v20 }
  0x8f   :  { %1179 = vmatpush1.bf16.msra.mxu0 %v5307_v21  ;;  %v5339_v21 = vld [vmem:[#allocation8 + $0x8] ss:$12 sps:$4 sm:$0xff]  }
  0x90   :  { %3906 = vmatpush3.bf16.msra.mxu1 %v5300_v17  ;;  %1180 = vmatprep.subr.bf16.mxu0 %v5312_v11  ;;  %v5323_v17 = vld [vmem:[#allocation8 + $0x1c] ss:$12 sps:$4 sm:$0xff]   ;;  %v5337_v11 = vld [vmem:[#allocation8] ss:$12 sps:$4 sm:$0xff]   ;;  %6902 = vst [vmem:[#allocation50_spill] sm:$0xff] %v5339_v21 }
  0x91   :  { %3907 = vmatprep.subr.bf16.mxu1 %v6724_v8  ;;  %6897 = vst [vmem:[#allocation45_spill] sm:$0xff] %v5323_v17  ;;  %6901 = vst [vmem:[#allocation49_spill] sm:$0xff] %v5337_v11 }
  0x93   :  { %1181 = vmatpush1.bf16.msra.mxu0 %v5317_v12 }
  0x94   :  { %3908 = vmatpush3.bf16.msra.mxu1 %v5309_v40  ;;  %1182 = vmatprep.subr.bf16.mxu0 %v5323_v17  ;;  %v5333_v40 = vld [vmem:[#allocation8 + $0x4] ss:$12 sps:$4 sm:$0xff]   ;;  %v171_v17 = vlaneseq }
  0x95   :  { %3909 = vmatprep.subr.bf16.mxu1 %v6724_v8  ;;  %6900 = vst [vmem:[#allocation48_spill] sm:$0xff] %v5333_v40 }
  0x97   :  { %1183 = vmatpush1.bf16.msra.mxu0 %v5327_v10  ;;  %v5347_v10 = vshrl.u32 %v171_v17, 7 }
  0x98   :  { %3910 = vmatpush3.bf16.msra.mxu1 %v5319_v16  ;;  %1184 = vmatprep.subr.bf16.mxu0 %v5333_v40  ;;  %v169_v16 = vld [vmem:[%s6678_s2] sm:$0xf] }
  0x99   :  { %3911 = vmatprep.subr.bf16.mxu1 %v6724_v8  ;;  %6903 = vst [vmem:[#allocation51_spill] sm:$0xff] %v5347_v10  ;;  %v6745_v12 = vsub.s32 1, %v5347_v10  ;;  %v6752_v6 = vsub.s32 2, %v5347_v10 }
  0x9b   :  { %1185 = vmatpush1.bf16.msra.mxu0 %v5337_v11  ;;  %v5363_v17 = vrot.slane %v169_v16, %v6745_v12  ;;  %v5379_v12 = vrot.slane %v169_v16, %v6752_v6 }
  0x9c   :  { %3912 = vmatpush3.bf16.msra.mxu1 %v5329_v20  ;;  %1281 = vmatprep.subr.bf16.mxu0 %v5038_v13  ;;  %v6740_v20 = vsub.s32 0, %v5347_v10 }
  0x9d   :  { %3913 = vmatprep.subr.bf16.mxu1 %v6724_v8 }
  0x9e   :  { %v174_v13 = vrot.slane %v169_v16, %v6740_v20 }
  0xa0   :  { %3914 = vmatpush3.bf16.msra.mxu1 %v5339_v21 }
  0xa1   :  { %3919 = vmatprep.subr.bf16.mxu1 %v6724_v8  ;;  %v185_v8 = vsub.s32 3, %v5347_v10 }
  0xa3   :  { %v5373_v2 = vrot.slane %v169_v16, %v185_v8 }
  0xfd   :  { %v5353_v40 = vpop.f32.mrf.mxu0 }
  0xff   :  { %v5356_v11 = vpop.f32.mrf.mxu0 }
 0x101   :  { %v288_v21 = vpop.f32.mrf.mxu0  ;;  %v5371_v4 = vpop.f32.mrf.mxu1 }
 0x102   :  { %v5365_v9 = vadd.f32 %v288_v21, %v174_v13 }
 0x103   :  { %v290_v7 = vpop.f32.mrf.mxu0  ;;  %v397_v1 = vpop.f32.mrf.mxu1 }
 0x104   :  { %6904 = vst [vmem:[#allocation52_spill] sm:$0xff] %v5365_v9  ;;  %v5369_v5 = vadd.f32 %v290_v7, %v5363_v17  ;;  %v398_v7 = vadd.f32 %v397_v1, %v5373_v2 }
 0x105   :  { %v294_v3 = vpop.f32.mrf.mxu0  ;;  %v401_v9 = vpop.f32.mrf.mxu1 }
 0x106   :  { %6905 = vst [vmem:[#allocation53_spill] sm:$0xff] %v5369_v5  ;;  %v5375_v20 = vadd.f32 %v294_v3, %v174_v13  ;;  %v5386_v5 = vadd.f32 %v401_v9, %v5379_v12 }
 0x107   :  { %v296_v0 = vpop.f32.mrf.mxu0  ;;  %v403_v3 = vpop.f32.mrf.mxu1 }
 0x108   :  { %6906 = vst [vmem:[#allocation54_spill] sm:$0xff] %v5375_v20  ;;  %v5382_v21 = vadd.f32 %v296_v0, %v5363_v17  ;;  %6908 = vst [vmem:[#allocation56_spill] sm:$0xff] %v5386_v5  ;;  %v404_v63 = vadd.f32 %v403_v3, %v5373_v2 }
 0x109   :  { %v300_v62 = vpop.f32.mrf.mxu0  ;;  %v407_v16 = vpop.f32.mrf.mxu1 }
 0x10a   :  { %6907 = vst [vmem:[#allocation55_spill] sm:$0xff] %v5382_v21  ;;  %v5388_v8 = vadd.f32 %v300_v62, %v174_v13  ;;  %v1577_v0 = vadd.f32 %v404_v63, %v398_v7  ;;  %v5395_v21 = vadd.f32 %v407_v16, %v5379_v12 }
 0x10b   :  { %v302_v20 = vpop.f32.mrf.mxu0  ;;  %v409_v1 = vpop.f32.mrf.mxu1 }
 0x10c   :  { %6909 = vst [vmem:[#allocation57_spill] sm:$0xff] %v5388_v8  ;;  %v5392_v10 = vadd.f32 %v302_v20, %v5363_v17  ;;  %6911 = vst [vmem:[#allocation59_spill] sm:$0xff] %v5395_v21  ;;  %v410_v62 = vadd.f32 %v409_v1, %v5373_v2 }
 0x10d   :  { %v306_v6 = vpop.f32.mrf.mxu0  ;;  %v413_v5 = vpop.f32.mrf.mxu1 }
 0x10e   :  { %6910 = vst [vmem:[#allocation58_spill] sm:$0xff] %v5392_v10  ;;  %v5397_v61 = vadd.f32 %v306_v6, %v174_v13  ;;  %v1874_v59 = vadd.f32 %v1577_v0, %v410_v62  ;;  %v5404_v20 = vadd.f32 %v413_v5, %v5379_v12 }
 0x10f   :  { %v308_v9 = vpop.f32.mrf.mxu0  ;;  %v415_v63 = vpop.f32.mrf.mxu1 }
 0x110   :  { %6912 = vst [vmem:[#allocation60_spill] sm:$0xff] %v5397_v61  ;;  %v5401_v8 = vadd.f32 %v308_v9, %v5363_v17  ;;  %6914 = vst [vmem:[#allocation62_spill] sm:$0xff] %v5404_v20  ;;  %v416_v6 = vadd.f32 %v415_v63, %v5373_v2 }
 0x111   :  { %v312_v3 = vpop.f32.mrf.mxu0  ;;  %v419_v61 = vpop.f32.mrf.mxu1 }
 0x112   :  { %6913 = vst [vmem:[#allocation61_spill] sm:$0xff] %v5401_v8  ;;  %v5406_v10 = vadd.f32 %v312_v3, %v174_v13  ;;  %v2171_v21 = vadd.f32 %v1874_v59, %v416_v6  ;;  %v5413_v9 = vadd.f32 %v419_v61, %v5379_v12 }
 0x113   :  { %v314_v7 = vpop.f32.mrf.mxu0  ;;  %v421_v0 = vpop.f32.mrf.mxu1 }
 0x114   :  { %6915 = vst [vmem:[#allocation63_spill] sm:$0xff] %v5406_v10  ;;  %v5410_v16 = vadd.f32 %v314_v7, %v5363_v17  ;;  %6917 = vst [vmem:[#allocation65_spill] sm:$0xff] %v5413_v9  ;;  %v422_v62 = vadd.f32 %v421_v0, %v5373_v2 }
 0x115   :  { %v318_v1 = vpop.f32.mrf.mxu0  ;;  %v425_v10 = vpop.f32.mrf.mxu1 }
 0x116   :  { %6916 = vst [vmem:[#allocation64_spill] sm:$0xff] %v5410_v16  ;;  %v5415_v8 = vadd.f32 %v318_v1, %v174_v13  ;;  %v2468_v20 = vadd.f32 %v2171_v21, %v422_v62  ;;  %v5422_v7 = vadd.f32 %v425_v10, %v5379_v12  ;;  %v283_v1 = vadd.f32 %v5353_v40, %v174_v13 }
 0x117   :  { %v320_v5 = vpop.f32.mrf.mxu0  ;;  %v427_v59 = vpop.f32.mrf.mxu1 }
 0x118   :  { %6918 = vst [vmem:[#allocation66_spill] sm:$0xff] %v5415_v8  ;;  %v5419_v3 = vadd.f32 %v320_v5, %v5363_v17  ;;  %6920 = vst [vmem:[#allocation68_spill] sm:$0xff] %v5422_v7  ;;  %v428_v6 = vadd.f32 %v427_v59, %v5373_v2 }
 0x119   :  { %v324_v63 = vpop.f32.mrf.mxu0  ;;  %v431_v0 = vpop.f32.mrf.mxu1 }
 0x11a   :  { %6919 = vst [vmem:[#allocation67_spill] sm:$0xff] %v5419_v3  ;;  %v5424_v16 = vadd.f32 %v324_v63, %v174_v13  ;;  %v2765_v3 = vadd.f32 %v2468_v20, %v428_v6  ;;  %v5432_v9 = vadd.f32 %v431_v0, %v5379_v12  ;;  %v285_v13 = vadd.f32 %v5356_v11, %v5363_v17  ;;  %v5446_v11 = vld [vmem:[%s6680_s4] ss:$0 sm:$0xff] }
 0x11b   :  { %v326_v61 = vpop.f32.mrf.mxu0  ;;  %v433_v10 = vpop.f32.mrf.mxu1 }
 0x11c   :  { %6921 = vst [vmem:[#allocation69_spill] sm:$0xff] %v5424_v16  ;;  %v5429_v8 = vadd.f32 %v326_v61, %v5363_v17  ;;  %6923 = vst [vmem:[#allocation71_spill] sm:$0xff] %v5432_v9  ;;  %v434_v63 = vadd.f32 %v433_v10, %v5373_v2  ;;  %v6965_v9 = vld [vmem:[#allocation49_spill] sm:$0xff] }
 0x11d   :  { %v668_v5 = vpop.f32.mrf.mxu0  ;;  %v437_v7 = vpop.f32.mrf.mxu1 }
 0x11e   :  { %6922 = vst [vmem:[#allocation70_spill] sm:$0xff] %v5429_v8  ;;  %v963_v21 = vadd.f32 %v668_v5, %v283_v1  ;;  %v3062_v59 = vadd.f32 %v2765_v3, %v434_v63  ;;  %v5436_v40 = vadd.f32 %v437_v7, %v5379_v12 }
 0x11f   :  { %v670_v62 = vpop.f32.mrf.mxu0  ;;  %v439_v20 = vpop.f32.mrf.mxu1 }
 0x120   :  { %v3565_v16 = vmul.f32 -1.442695, %v963_v21  ;;  %6924 = vst [vmem:[#allocation72_spill] sm:$0xff] %v5436_v40  ;;  %v440_v6 = vadd.f32 %v439_v20, %v5373_v2  ;;  %v970_v1 = vadd.f32 %v670_v62, %v285_v13  ;;  %v396_v62 = vadd.f32 %v5371_v4, %v5379_v12 }
 0x121   :  { %v672_v60 = vpop.f32.mrf.mxu0  ;;  %v6926_v4 = vmov 0.0   ;;  %v6927_v12 = vmov 0  }
 0x122   :  { %4482 = vpow2.f32 %v3565_v16  ;;  %v5441_v0 = vadd.f32 %v3062_v59, %v440_v6  ;;  %v3566_v10 = vmul.f32 -1.442695, %v970_v1 }
 0x123   :  { %v673_v61 = vpop.f32.mrf.mxu0  ;;  %v709_v5 = vpop.f32.mrf.mxu1 }
 0x124   :  { %6925 = vst [vmem:[#allocation73_spill] sm:$0xff] %v5441_v0  ;;  %4484 = vpow2.f32 %v3566_v10  ;;  %v984_v2 = vadd.f32 %v5446_v11, %v709_v5  ;;  %v6964_v0 = vld [vmem:[#allocation48_spill] sm:$0xff] }
 0x125   :  { %v3877_v21 = vpop.f32.mrf.mxu1 }
 0x127   :  { %v712_v8 = vpop.f32.mrf.mxu1 }
 0x129   :  { %v3878_v60 = vpop.f32.mrf.mxu1 }
 0x12f   :  { %v4483_v3 = vpop.eup %4482 }
 0x130   :  { %v967_v7 = vadd.f32 1.0, %v4483_v3 }
 0x131   :  { %v4485_v63 = vpop.eup %4484 }
 0x132   :  { %4486 = vrcp.f32 %v967_v7  ;;  %v974_v17 = vadd.f32 1.0, %v4485_v63 }
 0x134   :  { %4488 = vrcp.f32 %v974_v17 }
 0x13f   :  { %v4487_v16 = vpop.eup %4486 }
 0x140   :  { %v985_v8 = vmul.f32 %v4487_v16, %v984_v2 }
 0x141   :  { %v4489_v13 = vpop.eup %4488 }
 0x142   :  { %v986_v59 = vadd.f32 %v985_v8, %v396_v62  ;;  %v988_v20 = vsub.f32 1.0, %v4489_v13  ;;  %v990_v1 = vmul.f32 0.0, %v4489_v13 }
 0x144   :  { %4490 = vtanh.f32 %v986_v59 }
 0x151   :  { %v4491_v61 = vpop.eup %4490 }
 0x152   :  { %v989_v6 = vmul.f32 %v4491_v61, %v988_v20 }
 0x154   :  { %v5451_v10 = vadd.f32 %v990_v1, %v989_v6 }
 0x156   :  { %v992_v21 = vpack.c.bf16 %v5451_v10, %v5451_v10 }
 0x158   :  { %1203 = vmatmul.mubr.bf16.vlgmr.msra.gmra.mxu0 %v992_v21  ;;  %3916 = vmatmul.mubr.bf16.vlgmr.msra.gmra.mxu1 %v992_v21 }
 0x159   :  { %1282 = vmatpush1.bf16.msra.mxu0 %v5040_v14  ;;  %3920 = vmatpush3.bf16.msra.mxu1 %v5080_v25  ;;  %v909_v14 = vpop.f32.mrf.mxu0 }
 0x15a   :  { %1283 = vmatprep.subr.bf16.mxu0 %v5042_v15  ;;  %3921 = vmatprep.subr.bf16.mxu1 %v6926_v4 }
 0x15b   :  { %1313 = vmatprep.mubr.bf16.mxu0 %v6927_v12  ;;  %3935 = vmatprep.mubr.msk.bf16.mxu1 %vm4914_vm1, %v6926_v4  ;;  %v911_v15 = vpop.f32.mrf.mxu0 }
 0x15d   :  { %1284 = vmatpush1.bf16.msra.mxu0 %v5054_v18  ;;  %3922 = vmatpush3.bf16.msra.mxu1 %v5088_v27  ;;  %v913_v18 = vpop.f32.mrf.mxu0  ;;  %v6929_v27 = vld [vmem:[#allocation20_spill] sm:$0xff] }
 0x15e   :  { %1285 = vmatprep.subr.bf16.mxu0 %v5057_v19  ;;  %3923 = vmatprep.subr.bf16.mxu1 %v6926_v4  ;;  %v5490_v19 = vpop.f32.mrf.mxu1 }
 0x161   :  { %1286 = vmatpush1.bf16.msra.mxu0 %v5068_v22  ;;  %3924 = vmatpush3.bf16.msra.mxu1 %v5103_v30  ;;  %v914_v22 = vpop.f32.mrf.mxu0  ;;  %v6932_v30 = vld [vmem:[#allocation23_spill] sm:$0xff] }
 0x162   :  { %1287 = vmatprep.subr.bf16.mxu0 %v5071_v23  ;;  %3925 = vmatprep.subr.bf16.mxu1 %v6926_v4  ;;  %v3897_v23 = vpop.f32.mrf.mxu1  ;;  %v5543_v22 = vld [vmem:[%s6684_s8] ss:$0 sm:$0xff] }
 0x165   :  { %1288 = vmatpush1.bf16.msra.mxu0 %v5073_v24  ;;  %3926 = vmatpush3.bf16.msra.mxu1 %v5115_v33  ;;  %v953_v24 = vpop.f32.mrf.mxu1  ;;  %v6935_v33 = vld [vmem:[#allocation27_spill] sm:$0xff] }
 0x166   :  { %1289 = vmatprep.subr.bf16.mxu0 %v5084_v26  ;;  %3927 = vmatprep.subr.bf16.mxu1 %v6926_v4  ;;  %v6928_v26 = vld [vmem:[#allocation21_spill] sm:$0xff] }
 0x167   :  { %v3898_v25 = vpop.f32.mrf.mxu1 }
 0x169   :  { %1290 = vmatpush1.bf16.msra.mxu0 %v5094_v28  ;;  %3928 = vmatpush3.bf16.msra.mxu1 %v5131_v36  ;;  %v6930_v28 = vld [vmem:[#allocation22_spill] sm:$0xff] }
 0x16a   :  { %1291 = vmatprep.subr.bf16.mxu0 %v5099_v29  ;;  %3929 = vmatprep.subr.bf16.mxu1 %v6926_v4  ;;  %v6931_v29 = vld [vmem:[#allocation24_spill] sm:$0xff] }
 0x16d   :  { %1292 = vmatpush1.bf16.msra.mxu0 %v5105_v31  ;;  %3930 = vmatpush3.bf16.msra.mxu1 %v5145_v38  ;;  %v6933_v31 = vld [vmem:[#allocation25_spill] sm:$0xff] }
 0x16e   :  { %1293 = vmatprep.subr.bf16.mxu0 %v5112_v32  ;;  %3931 = vmatprep.subr.bf16.mxu1 %v6926_v4  ;;  %v6934_v32 = vld [vmem:[#allocation26_spill] sm:$0xff] }
 0x171   :  { %1294 = vmatpush1.bf16.msra.mxu0 %v5121_v34  ;;  %3932 = vmatpush3.bf16.msra.mxu1 %v5157_v39  ;;  %v1025_v34 = vld [vmem:[%s6683_s7] sm:$0x7] }
 0x172   :  { %1295 = vmatprep.subr.bf16.mxu0 %v5128_v35  ;;  %3933 = vmatprep.subr.bf16.mxu1 %v6926_v4  ;;  %v6936_v35 = vld [vmem:[#allocation51_spill] sm:$0xff] }
 0x173   :  { %v6937_v36 = vsub.s32 0, %v6936_v35  ;;  %v6939_v60 = vsub.s32 1, %v6936_v35  ;;  %v6940_v25 = vsub.s32 2, %v6936_v35 }
 0x175   :  { %1296 = vmatpush1.bf16.msra.mxu0 %v5137_v37  ;;  %3934 = vmatpush3.bf16.msra.mxu1 %v5167_v41  ;;  %v5532_v37 = vrot.slane %v1025_v34, %v6937_v36  ;;  %v5536_v3 = vrot.slane %v1025_v34, %v6939_v60  ;;  %v5547_v36 = vrot.slane %v1025_v34, %v6940_v25 }
 0x176   :  { %1363 = vmatprep.subr.bf16.mxu0 %v5181_v42  ;;  %3939 = vmatprep.subr.bf16.mxu1 %v6926_v4 }
 0x177   :  { %6938 = vst [vmem:[#allocation21_spill] sm:$0xff] %v5532_v37 }
 0x178   :  { %1314 = vmatmul.mubr.bf16.vlgmr.msra.gmra.mxu0 %v992_v21  ;;  %3936 = vmatmul.mubr.bf16.vlgmr.msra.gmra.mxu1 %v992_v21 }
 0x179   :  { %1364 = vmatpush1.bf16.msra.mxu0 %v5183_v43  ;;  %3940 = vmatpush3.bf16.msra.mxu1 %v5189_v45 }
 0x17a   :  { %1365 = vmatprep.subr.bf16.mxu0 %v5187_v44  ;;  %3941 = vmatprep.subr.bf16.mxu1 %v6926_v4 }
 0x17b   :  { %1395 = vmatprep.mubr.bf16.mxu0 %v6927_v12  ;;  %3955 = vmatprep.mubr.msk.bf16.mxu1 %vm4914_vm1, %v6926_v4 }
 0x17d   :  { %1366 = vmatpush1.bf16.msra.mxu0 %v5191_v46  ;;  %3942 = vmatpush3.bf16.msra.mxu1 %v5199_v48 }
 0x17e   :  { %1367 = vmatprep.subr.bf16.mxu0 %v5197_v47  ;;  %3943 = vmatprep.subr.bf16.mxu1 %v6926_v4 }
 0x181   :  { %1368 = vmatpush1.bf16.msra.mxu0 %v5201_v49  ;;  %3944 = vmatpush3.bf16.msra.mxu1 %v5209_v51 }
 0x182   :  { %1369 = vmatprep.subr.bf16.mxu0 %v5207_v50  ;;  %3945 = vmatprep.subr.bf16.mxu1 %v6926_v4 }
 0x185   :  { %1370 = vmatpush1.bf16.msra.mxu0 %v5211_v52  ;;  %3946 = vmatpush3.bf16.msra.mxu1 %v5219_v54 }
 0x186   :  { %1371 = vmatprep.subr.bf16.mxu0 %v5217_v53  ;;  %3947 = vmatprep.subr.bf16.mxu1 %v6926_v4 }
 0x189   :  { %1372 = vmatpush1.bf16.msra.mxu0 %v5221_v55  ;;  %3948 = vmatpush3.bf16.msra.mxu1 %v5229_v57 }
 0x18a   :  { %1373 = vmatprep.subr.bf16.mxu0 %v5227_v56  ;;  %3949 = vmatprep.subr.bf16.mxu1 %v6926_v4 }
 0x18d   :  { %1374 = vmatpush1.bf16.msra.mxu0 %v5231_v58  ;;  %3950 = vmatpush3.bf16.msra.mxu1 %v6928_v26 }
 0x18e   :  { %1375 = vmatprep.subr.bf16.mxu0 %v6929_v27  ;;  %3951 = vmatprep.subr.bf16.mxu1 %v6926_v4 }
 0x191   :  { %1376 = vmatpush1.bf16.msra.mxu0 %v6930_v28  ;;  %3952 = vmatpush3.bf16.msra.mxu1 %v6931_v29 }
 0x192   :  { %1377 = vmatprep.subr.bf16.mxu0 %v6932_v30  ;;  %3953 = vmatprep.subr.bf16.mxu1 %v6926_v4 }
 0x195   :  { %1378 = vmatpush1.bf16.msra.mxu0 %v6933_v31  ;;  %3954 = vmatpush3.bf16.msra.mxu1 %v6934_v32 }
 0x196   :  { %1474 = vmatprep.subr.bf16.mxu0 %v6935_v33  ;;  %3959 = vmatprep.subr.bf16.mxu1 %v6926_v4 }
 0x218   :  { %v1204_v38 = vpop.f32.mrf.mxu0  ;;  %v1245_v5 = vpop.f32.mrf.mxu1 }
 0x219   :  { %v1205_v7 = vadd.f32 %v1204_v38, %v5532_v37  ;;  %v6941_v38 = vld [vmem:[#allocation52_spill] sm:$0xff] }
 0x21a   :  { %v1206_v63 = vpop.f32.mrf.mxu0  ;;  %v3917_v17 = vpop.f32.mrf.mxu1 }
 0x21b   :  { %v1251_v2 = vadd.f32 %v1205_v7, %v909_v14  ;;  %v1207_v16 = vadd.f32 %v1206_v63, %v5536_v3  ;;  %v1272_v63 = vadd.f32 %v5543_v22, %v5490_v19 }
 0x21c   :  { %v1208_v62 = vpop.f32.mrf.mxu0  ;;  %v1248_v8 = vpop.f32.mrf.mxu1 }
 0x21d   :  { %v3592_v59 = vmul.f32 -1.442695, %v1251_v2  ;;  %v1258_v61 = vadd.f32 %v1207_v16, %v911_v15  ;;  %v1246_v8 = vadd.f32 %v1245_v5, %v5547_v36 }
 0x21e   :  { %v1209_v13 = vpop.f32.mrf.mxu0  ;;  %v3918_v20 = vpop.f32.mrf.mxu1 }
 0x21f   :  { %4492 = vpow2.f32 %v3592_v59  ;;  %v3593_v6 = vmul.f32 -1.442695, %v1258_v61  ;;  %v6942_v20 = vld [vmem:[#allocation53_spill] sm:$0xff] }
 0x221   :  { %4494 = vpow2.f32 %v3593_v6 }
 0x22c   :  { %v4493_v1 = vpop.eup %4492 }
 0x22d   :  { %v1255_v21 = vadd.f32 1.0, %v4493_v1 }
 0x22e   :  { %v4495_v18 = vpop.eup %4494 }
 0x22f   :  { %4496 = vrcp.f32 %v1255_v21  ;;  %v1262_v14 = vadd.f32 1.0, %v4495_v18 }
 0x231   :  { %4498 = vrcp.f32 %v1262_v14 }
 0x238   :  { %v1315_v23 = vpop.f32.mrf.mxu0  ;;  %v1356_v24 = vpop.f32.mrf.mxu1 }
 0x239   :  { %v1451_v15 = vadd.f32 %v1315_v23, %v6941_v38 }
 0x23a   :  { %v1317_v60 = vpop.f32.mrf.mxu0  ;;  %v3937_v7 = vpop.f32.mrf.mxu1 }
 0x23b   :  { %v3595_v17 = vmul.f32 -1.442695, %v1451_v15  ;;  %v1458_v61 = vadd.f32 %v1317_v60, %v6942_v20  ;;  %v6943_v60 = vld [vmem:[#allocation28_spill] sm:$0xff]  ;;  %v6944_v7 = vld [vmem:[#allocation29_spill] sm:$0xff]  ;;  %v6950_v20 = vld [vmem:[#allocation34_spill] sm:$0xff] }
 0x23c   :  { %v4497_v2 = vpop.eup %4496  ;;  %v1319_v16 = vpop.f32.mrf.mxu0 }
 0x23d   :  { %v1359_v62 = vpop.f32.mrf.mxu1  ;;  %v1273_v59 = vmul.f32 %v4497_v2, %v1272_v63  ;;  %4500 = vpow2.f32 %v3595_v17  ;;  %v3596_v6 = vmul.f32 -1.442695, %v1458_v61  ;;  %v6945_v17 = vld [vmem:[#allocation30_spill] sm:$0xff]  ;;  %v1465_v2 = vadd.f32 %v5446_v11, %v1356_v24  ;;  %v6951_v61 = vld [vmem:[#allocation35_spill] sm:$0xff]  ;;  %v6953_v24 = vld [vmem:[#allocation37_spill] sm:$0xff] }
 0x23e   :  { %v1320_v13 = vpop.f32.mrf.mxu0  ;;  %v4499_v1 = vpop.eup %4498  ;;  %v6946_v62 = vld [vmem:[#allocation31_spill] sm:$0xff] }
 0x23f   :  { %v3938_v35 = vpop.f32.mrf.mxu1  ;;  %v1274_v34 = vadd.f32 %v1273_v59, %v1246_v8  ;;  %v1276_v18 = vsub.f32 1.0, %v4499_v1  ;;  %v1278_v25 = vmul.f32 0.0, %v4499_v1  ;;  %v6947_v8 = vld [vmem:[#allocation32_spill] sm:$0xff]  ;;  %v6948_v13 = vld [vmem:[#allocation33_spill] sm:$0xff]  ;;  %v6954_v1 = vld [vmem:[#allocation38_spill] sm:$0xff] }
 0x240   :  { %v6949_v35 = vld [vmem:[#allocation56_spill] sm:$0xff] }
 0x241   :  { %4502 = vtanh.f32 %v1274_v34 }
 0x242   :  { %4504 = vpow2.f32 %v3596_v6  ;;  %v6952_v6 = vld [vmem:[#allocation36_spill] sm:$0xff] }
 0x24a   :  { %v4501_v21 = vpop.eup %4500 }
 0x24b   :  { %v1455_v19 = vadd.f32 1.0, %v4501_v21  ;;  %v6955_v21 = vld [vmem:[#allocation39_spill] sm:$0xff] }
 0x24d   :  { %4506 = vrcp.f32 %v1455_v19  ;;  %v6956_v19 = vld [vmem:[#allocation40_spill] sm:$0xff] }
 0x24e   :  { %v4503_v14 = vpop.eup %4502 }
 0x24f   :  { %v1277_v23 = vmul.f32 %v4503_v14, %v1276_v18  ;;  %v4505_v15 = vpop.eup %4504  ;;  %v6957_v18 = vld [vmem:[#allocation41_spill] sm:$0xff]  ;;  %v6958_v14 = vld [vmem:[#allocation42_spill] sm:$0xff] }
 0x250   :  { %v1462_v63 = vadd.f32 1.0, %v4505_v15  ;;  %v6961_v15 = vld [vmem:[#allocation45_spill] sm:$0xff] }
 0x251   :  { %v5554_v38 = vadd.f32 %v1278_v25, %v1277_v23  ;;  %v6959_v25 = vld [vmem:[#allocation43_spill] sm:$0xff] }
 0x252   :  { %4508 = vrcp.f32 %v1462_v63 }
 0x253   :  { %v1362_v5 = vpack.c.bf16 %v5554_v38, %v5554_v38 }
 0x255   :  { %1396 = vmatmul.mubr.bf16.vlgmr.msra.gmra.mxu0 %v1362_v5  ;;  %3956 = vmatmul.mubr.bf16.vlgmr.msra.gmra.mxu1 %v1362_v5  ;;  %v6960_v5 = vld [vmem:[#allocation44_spill] sm:$0xff] }
 0x256   :  { %1475 = vmatpush1.bf16.msra.mxu0 %v6943_v60  ;;  %3960 = vmatpush3.bf16.msra.mxu1 %v6944_v7 }
 0x257   :  { %1476 = vmatprep.subr.bf16.mxu0 %v6945_v17  ;;  %3961 = vmatprep.subr.bf16.mxu1 %v6926_v4 }
 0x258   :  { %1506 = vmatprep.mubr.bf16.mxu0 %v6927_v12  ;;  %3975 = vmatprep.mubr.msk.bf16.mxu1 %vm4914_vm1, %v6926_v4 }
 0x25a   :  { %v4507_v16 = vpop.eup %4506  ;;  %1477 = vmatpush1.bf16.msra.mxu0 %v6946_v62  ;;  %3962 = vmatpush3.bf16.msra.mxu1 %v6947_v8 }
 0x25b   :  { %v1466_v59 = vmul.f32 %v4507_v16, %v1465_v2  ;;  %1478 = vmatprep.subr.bf16.mxu0 %v6948_v13  ;;  %3963 = vmatprep.subr.bf16.mxu1 %v6926_v4 }
 0x25d   :  { %v1467_v34 = vadd.f32 %v1466_v59, %v6949_v35  ;;  %v6962_v35 = vld [vmem:[#allocation46_spill] sm:$0xff] }
 0x25e   :  { %1479 = vmatpush1.bf16.msra.mxu0 %v6950_v20  ;;  %3964 = vmatpush3.bf16.msra.mxu1 %v6951_v61 }
 0x25f   :  { %4510 = vtanh.f32 %v1467_v34  ;;  %1480 = vmatprep.subr.bf16.mxu0 %v6952_v6  ;;  %3965 = vmatprep.subr.bf16.mxu1 %v6926_v4  ;;  %v4509_v23 = vpop.eup %4508  ;;  %v6963_v34 = vld [vmem:[#allocation47_spill] sm:$0xff] }
 0x260   :  { %v1469_v63 = vsub.f32 1.0, %v4509_v23  ;;  %v1471_v59 = vmul.f32 %v4509_v23, %v5451_v10  ;;  %v5602_v10 = vld [vmem:[#allocation5 + $0xa8] ss:$12 sps:$4 sm:$0xff]   ;;  %v5605_v23 = vld [vmem:[#allocation5 + $0xb0] ss:$12 sps:$4 sm:$0xff]  }
 0x261   :  { %6968 = vst [vmem:[#allocation22_spill] sm:$0xff] %v5602_v10  ;;  %6969 = vst [vmem:[#allocation24_spill] sm:$0xff] %v5605_v23 }
 0x262   :  { %1481 = vmatpush1.bf16.msra.mxu0 %v6953_v24  ;;  %3966 = vmatpush3.bf16.msra.mxu1 %v6954_v1 }
 0x263   :  { %1482 = vmatprep.subr.bf16.mxu0 %v6955_v21  ;;  %3967 = vmatprep.subr.bf16.mxu1 %v6926_v4 }
 0x266   :  { %1483 = vmatpush1.bf16.msra.mxu0 %v6956_v19  ;;  %3968 = vmatpush3.bf16.msra.mxu1 %v6957_v18 }
 0x267   :  { %1484 = vmatprep.subr.bf16.mxu0 %v6958_v14  ;;  %3969 = vmatprep.subr.bf16.mxu1 %v6926_v4 }
 0x26a   :  { %1485 = vmatpush1.bf16.msra.mxu0 %v6959_v25  ;;  %3970 = vmatpush3.bf16.msra.mxu1 %v6960_v5 }
 0x26b   :  { %1486 = vmatprep.subr.bf16.mxu0 %v6961_v15  ;;  %3971 = vmatprep.subr.bf16.mxu1 %v6926_v4  ;;  %v6966_v15 = vld [vmem:[#allocation50_spill] sm:$0xff] }
 0x26c   :  { %v4511_v2 = vpop.eup %4510 }
 0x26d   :  { %v1470_v16 = vmul.f32 %v4511_v2, %v1469_v63  ;;  %v5598_v63 = vld [vmem:[#allocation5 + $0xac] ss:$12 sps:$4 sm:$0xff]   ;;  %v5608_v2 = vld [vmem:[#allocation5 + $0x94] ss:$12 sps:$4 sm:$0xff]  }
 0x26e   :  { %1487 = vmatpush1.bf16.msra.mxu0 %v6962_v35  ;;  %3972 = vmatpush3.bf16.msra.mxu1 %v6963_v34  ;;  %6967 = vst [vmem:[#allocation20_spill] sm:$0xff] %v5598_v63  ;;  %6970 = vst [vmem:[#allocation23_spill] sm:$0xff] %v5608_v2 }
 0x26f   :  { %1488 = vmatprep.subr.bf16.mxu0 %v6964_v0  ;;  %3973 = vmatprep.subr.bf16.mxu1 %v6926_v4  ;;  %v5592_v40 = vadd.f32 %v1471_v59, %v1470_v16  ;;  %v5615_v16 = vld [vmem:[#allocation5 + $0x90] ss:$12 sps:$4 sm:$0xff]   ;;  %v5618_v59 = vld [vmem:[#allocation5 + $0x98] ss:$12 sps:$4 sm:$0xff]  }
 0x270   :  { %6971 = vst [vmem:[#allocation25_spill] sm:$0xff] %v5615_v16  ;;  %6972 = vst [vmem:[#allocation26_spill] sm:$0xff] %v5618_v59 }
 0x271   :  { %v1473_v5 = vpack.c.bf16 %v5592_v40, %v5592_v40 }
 0x272   :  { %1489 = vmatpush1.bf16.msra.mxu0 %v6965_v9  ;;  %3974 = vmatpush3.bf16.msra.mxu1 %v6966_v15 }
 0x273   :  { %1578 = vmatprep.subr.bf16.mxu0 %v5598_v63  ;;  %3979 = vmatprep.subr.bf16.mxu1 %v6926_v4  ;;  %v5631_v63 = vld [vmem:[#allocation5 + $0x64] ss:$12 sps:$4 sm:$0xff]  }
 0x274   :  { %6976 = vst [vmem:[#allocation53_spill] sm:$0xff] %v5631_v63 }
 0x275   :  { %1507 = vmatmul.mubr.bf16.vlgmr.msra.gmra.mxu0 %v1473_v5  ;;  %3976 = vmatmul.mubr.bf16.vlgmr.msra.gmra.mxu1 %v1473_v5 }
 0x276   :  { %1579 = vmatpush1.bf16.msra.mxu0 %v5602_v10  ;;  %3980 = vmatpush3.bf16.msra.mxu1 %v5605_v23  ;;  %v5621_v23 = vld [vmem:[#allocation5 + $0x7c] ss:$12 sps:$4 sm:$0xff]   ;;  %v5628_v10 = vld [vmem:[#allocation5 + $0x80] ss:$12 sps:$4 sm:$0xff]  }
 0x277   :  { %1580 = vmatprep.subr.bf16.mxu0 %v5608_v2  ;;  %3981 = vmatprep.subr.bf16.mxu1 %v6926_v4  ;;  %6973 = vst [vmem:[#allocation27_spill] sm:$0xff] %v5621_v23  ;;  %v5625_v2 = vld [vmem:[#allocation5 + $0x78] ss:$12 sps:$4 sm:$0xff]   ;;  %6975 = vst [vmem:[#allocation52_spill] sm:$0xff] %v5628_v10 }
 0x278   :  { %1610 = vmatprep.mubr.bf16.mxu0 %v6927_v12  ;;  %3995 = vmatprep.mubr.msk.bf16.mxu1 %vm4914_vm1, %v6926_v4  ;;  %6974 = vst [vmem:[#allocation51_spill] sm:$0xff] %v5625_v2 }
 0x27a   :  { %1581 = vmatpush1.bf16.msra.mxu0 %v5615_v16  ;;  %3982 = vmatpush3.bf16.msra.mxu1 %v5618_v59  ;;  %v5635_v59 = vld [vmem:[#allocation5 + $0x60] ss:$12 sps:$4 sm:$0xff]  }
 0x27b   :  { %1582 = vmatprep.subr.bf16.mxu0 %v5621_v23  ;;  %3983 = vmatprep.subr.bf16.mxu1 %v6926_v4  ;;  %6977 = vst [vmem:[#allocation28_spill] sm:$0xff] %v5635_v59  ;;  %v5638_v23 = vld [vmem:[#allocation5 + $0x68] ss:$12 sps:$4 sm:$0xff]   ;;  %v5641_v16 = vld [vmem:[#allocation5 + $0x4c] ss:$12 sps:$4 sm:$0xff]  }
 0x27c   :  { %6978 = vst [vmem:[#allocation29_spill] sm:$0xff] %v5638_v23  ;;  %6979 = vst [vmem:[#allocation30_spill] sm:$0xff] %v5641_v16 }
 0x27e   :  { %1583 = vmatpush1.bf16.msra.mxu0 %v5625_v2  ;;  %3984 = vmatpush3.bf16.msra.mxu1 %v5628_v10  ;;  %v5645_v10 = vld [vmem:[#allocation5 + $0x48] ss:$12 sps:$4 sm:$0xff]  }
 0x27f   :  { %1584 = vmatprep.subr.bf16.mxu0 %v5631_v63  ;;  %3985 = vmatprep.subr.bf16.mxu1 %v6926_v4  ;;  %v5648_v63 = vld [vmem:[#allocation5 + $0x50] ss:$12 sps:$4 sm:$0xff]   ;;  %v5651_v2 = vld [vmem:[#allocation5 + $0x34] ss:$12 sps:$4 sm:$0xff]  }
 0x280   :  { %6980 = vst [vmem:[#allocation31_spill] sm:$0xff] %v5648_v63  ;;  %6981 = vst [vmem:[#allocation32_spill] sm:$0xff] %v5651_v2 }
 0x282   :  { %1585 = vmatpush1.bf16.msra.mxu0 %v5635_v59  ;;  %3986 = vmatpush3.bf16.msra.mxu1 %v5638_v23  ;;  %v5655_v23 = vld [vmem:[#allocation5 + $0x30] ss:$12 sps:$4 sm:$0xff]  }
 0x283   :  { %1586 = vmatprep.subr.bf16.mxu0 %v5641_v16  ;;  %3987 = vmatprep.subr.bf16.mxu1 %v6926_v4  ;;  %6982 = vst [vmem:[#allocation33_spill] sm:$0xff] %v5655_v23  ;;  %v5658_v16 = vld [vmem:[#allocation5 + $0x38] ss:$12 sps:$4 sm:$0xff]   ;;  %v5661_v59 = vld [vmem:[#allocation5 + $0x1c] ss:$12 sps:$4 sm:$0xff]  }
 0x286   :  { %1587 = vmatpush1.bf16.msra.mxu0 %v5645_v10  ;;  %3988 = vmatpush3.bf16.msra.mxu1 %v5648_v63  ;;  %v5665_v63 = vld [vmem:[#allocation5 + $0x18] ss:$12 sps:$4 sm:$0xff]  }
 0x287   :  { %1588 = vmatprep.subr.bf16.mxu0 %v5651_v2  ;;  %3989 = vmatprep.subr.bf16.mxu1 %v6926_v4  ;;  %v5669_v2 = vld [vmem:[#allocation5 + $0x4] ss:$12 sps:$4 sm:$0xff]  }
 0x28a   :  { %1589 = vmatpush1.bf16.msra.mxu0 %v5655_v23  ;;  %3990 = vmatpush3.bf16.msra.mxu1 %v5658_v16  ;;  %v5673_v23 = vld [vmem:[#allocation5] ss:$12 sps:$4 sm:$0xff]  }
 0x28b   :  { %1590 = vmatprep.subr.bf16.mxu0 %v5661_v59  ;;  %3991 = vmatprep.subr.bf16.mxu1 %v6926_v4 }
 0x28e   :  { %1591 = vmatpush1.bf16.msra.mxu0 %v5665_v63  ;;  %3992 = vmatpush3.bf16.msra.mxu1 %v5157_v39 }
 0x28f   :  { %1592 = vmatprep.subr.bf16.mxu0 %v5669_v2  ;;  %3993 = vmatprep.subr.bf16.mxu1 %v6926_v4 }
 0x292   :  { %1593 = vmatpush1.bf16.msra.mxu0 %v5673_v23  ;;  %3994 = vmatpush3.bf16.msra.mxu1 %v5167_v41 }
 0x293   :  { %1660 = vmatprep.subr.bf16.mxu0 %v5181_v42  ;;  %3999 = vmatprep.subr.bf16.mxu1 %v6926_v4 }
 0x295   :  { %1611 = vmatmul.mubr.bf16.vlgmr.msra.gmra.mxu0 %v1473_v5  ;;  %3996 = vmatmul.mubr.bf16.vlgmr.msra.gmra.mxu1 %v1473_v5 }
 0x296   :  { %1661 = vmatpush1.bf16.msra.mxu0 %v5183_v43  ;;  %4000 = vmatpush3.bf16.msra.mxu1 %v5189_v45 }
 0x297   :  { %1662 = vmatprep.subr.bf16.mxu0 %v5187_v44  ;;  %4001 = vmatprep.subr.bf16.mxu1 %v6926_v4 }
 0x298   :  { %1692 = vmatprep.mubr.bf16.mxu0 %v6927_v12  ;;  %4015 = vmatprep.mubr.msk.bf16.mxu1 %vm4914_vm1, %v6926_v4 }
 0x29a   :  { %1663 = vmatpush1.bf16.msra.mxu0 %v5191_v46  ;;  %4002 = vmatpush3.bf16.msra.mxu1 %v5199_v48 }
 0x29b   :  { %1664 = vmatprep.subr.bf16.mxu0 %v5197_v47  ;;  %4003 = vmatprep.subr.bf16.mxu1 %v6926_v4 }
 0x29e   :  { %1665 = vmatpush1.bf16.msra.mxu0 %v5201_v49  ;;  %4004 = vmatpush3.bf16.msra.mxu1 %v5209_v51 }
 0x29f   :  { %1666 = vmatprep.subr.bf16.mxu0 %v5207_v50  ;;  %4005 = vmatprep.subr.bf16.mxu1 %v6926_v4 }
 0x2a2   :  { %1667 = vmatpush1.bf16.msra.mxu0 %v5211_v52  ;;  %4006 = vmatpush3.bf16.msra.mxu1 %v5219_v54 }
 0x2a3   :  { %1668 = vmatprep.subr.bf16.mxu0 %v5217_v53  ;;  %4007 = vmatprep.subr.bf16.mxu1 %v6926_v4 }
 0x2a6   :  { %1669 = vmatpush1.bf16.msra.mxu0 %v5221_v55  ;;  %4008 = vmatpush3.bf16.msra.mxu1 %v5229_v57 }
 0x2a7   :  { %1670 = vmatprep.subr.bf16.mxu0 %v5227_v56  ;;  %4009 = vmatprep.subr.bf16.mxu1 %v6926_v4 }
 0x2aa   :  { %1671 = vmatpush1.bf16.msra.mxu0 %v5231_v58  ;;  %4010 = vmatpush3.bf16.msra.mxu1 %v6928_v26 }
 0x2ab   :  { %1672 = vmatprep.subr.bf16.mxu0 %v6929_v27  ;;  %4011 = vmatprep.subr.bf16.mxu1 %v6926_v4 }
 0x2ae   :  { %1673 = vmatpush1.bf16.msra.mxu0 %v6930_v28  ;;  %4012 = vmatpush3.bf16.msra.mxu1 %v6931_v29 }
 0x2af   :  { %1674 = vmatprep.subr.bf16.mxu0 %v6932_v30  ;;  %4013 = vmatprep.subr.bf16.mxu1 %v6926_v4 }
 0x2b2   :  { %1675 = vmatpush1.bf16.msra.mxu0 %v6933_v31  ;;  %4014 = vmatpush3.bf16.msra.mxu1 %v6934_v32 }
 0x2b3   :  { %1771 = vmatprep.subr.bf16.mxu0 %v6935_v33  ;;  %4019 = vmatprep.subr.bf16.mxu1 %v6926_v4 }
 0x315   :  { %v1397_v39 = vpop.f32.mrf.mxu0  ;;  %v1438_v41 = vpop.f32.mrf.mxu1 }
 0x317   :  { %v1399_v42 = vpop.f32.mrf.mxu0  ;;  %v3957_v43 = vpop.f32.mrf.mxu1 }
 0x318   :  { %v6983_v43 = vld [vmem:[#allocation54_spill] sm:$0xff] }
 0x319   :  { %v1401_v44 = vpop.f32.mrf.mxu0  ;;  %v1441_v45 = vpop.f32.mrf.mxu1 }
 0x31b   :  { %v1402_v46 = vpop.f32.mrf.mxu0  ;;  %v3958_v47 = vpop.f32.mrf.mxu1 }
 0x31c   :  { %v1569_v46 = vadd.f32 %v5543_v22, %v1438_v41 }
 0x335   :  { %v1508_v48 = vpop.f32.mrf.mxu0  ;;  %v1549_v49 = vpop.f32.mrf.mxu1 }
 0x336   :  { %v1509_v50 = vadd.f32 %v1508_v48, %v5532_v37 }
 0x337   :  { %v1510_v51 = vpop.f32.mrf.mxu0  ;;  %v3977_v52 = vpop.f32.mrf.mxu1 }
 0x338   :  { %v1555_v53 = vadd.f32 %v1509_v50, %v1397_v39  ;;  %v1511_v54 = vadd.f32 %v1510_v51, %v5536_v3  ;;  %v1550_v51 = vadd.f32 %v1549_v49, %v5547_v36 }
 0x339   :  { %v1512_v55 = vpop.f32.mrf.mxu0  ;;  %v1552_v56 = vpop.f32.mrf.mxu1 }
 0x33a   :  { %v3597_v57 = vmul.f32 -1.442695, %v1555_v53  ;;  %v1562_v27 = vadd.f32 %v1511_v54, %v1399_v42  ;;  %v6984_v56 = vld [vmem:[#allocation55_spill] sm:$0xff] }
 0x33b   :  { %v1513_v58 = vpop.f32.mrf.mxu0  ;;  %v3978_v26 = vpop.f32.mrf.mxu1 }
 0x33c   :  { %4512 = vpow2.f32 %v3597_v57  ;;  %v3598_v28 = vmul.f32 -1.442695, %v1562_v27 }
 0x33e   :  { %4514 = vpow2.f32 %v3598_v28 }
 0x349   :  { %v4513_v29 = vpop.eup %4512 }
 0x34a   :  { %v1559_v30 = vadd.f32 1.0, %v4513_v29 }
 0x34b   :  { %v4515_v31 = vpop.eup %4514 }
 0x34c   :  { %4516 = vrcp.f32 %v1559_v30  ;;  %v1566_v32 = vadd.f32 1.0, %v4515_v31 }
 0x34e   :  { %4518 = vrcp.f32 %v1566_v32 }
 0x355   :  { %v1612_v33 = vpop.f32.mrf.mxu0  ;;  %v1653_v5 = vpop.f32.mrf.mxu1 }
 0x356   :  { %v1748_v39 = vadd.f32 %v1612_v33, %v6983_v43 }
 0x357   :  { %v1614_v44 = vpop.f32.mrf.mxu0  ;;  %v3997_v45 = vpop.f32.mrf.mxu1 }
 0x358   :  { %v3599_v47 = vmul.f32 -1.442695, %v1748_v39  ;;  %v1755_v57 = vadd.f32 %v1614_v44, %v6984_v56  ;;  %v7000_v44 = vld [vmem:[#allocation30_spill] sm:$0xff]  ;;  %v7001_v45 = vld [vmem:[#allocation31_spill] sm:$0xff] }
 0x359   :  { %v4517_v48 = vpop.eup %4516  ;;  %v1616_v50 = vpop.f32.mrf.mxu0  ;;  %v5827_v56 = vld [vmem:[#allocation10 + $0x7c] ss:$12 sps:$4 sm:$0xff]  }
 0x35a   :  { %v1656_v42 = vpop.f32.mrf.mxu1  ;;  %v1570_v52 = vmul.f32 %v4517_v48, %v1569_v46  ;;  %4520 = vpow2.f32 %v3599_v47  ;;  %v3600_v58 = vmul.f32 -1.442695, %v1755_v57  ;;  %v7002_v46 = vld [vmem:[#allocation32_spill] sm:$0xff]  ;;  %v7003_v47 = vld [vmem:[#allocation33_spill] sm:$0xff]  ;;  %v5831_v57 = vld [vmem:[#allocation10 + $0x78] ss:$12 sps:$4 sm:$0xff]  }
 0x35b   :  { %v1617_v53 = vpop.f32.mrf.mxu0  ;;  %v4519_v26 = vpop.eup %4518  ;;  %v5795_v48 = vld [vmem:[#allocation5 + $0x20] ss:$12 sps:$4 sm:$0xff]   ;;  %v5801_v50 = vld [vmem:[#allocation5 + $0x8] ss:$12 sps:$4 sm:$0xff]  }
 0x35c   :  { %v3998_v54 = vpop.f32.mrf.mxu1  ;;  %v1571_v55 = vadd.f32 %v1570_v52, %v1550_v51  ;;  %v1573_v28 = vsub.f32 1.0, %v4519_v26  ;;  %v1575_v31 = vmul.f32 %v4519_v26, %v5554_v38  ;;  %v1762_v38 = vadd.f32 %v5446_v11, %v1653_v5  ;;  %v6999_v5 = vld [vmem:[#allocation29_spill] sm:$0xff]  ;;  %v5804_v42 = vld [vmem:[#allocation10 + $0xac] ss:$12 sps:$4 sm:$0xff]  }
 0x35d   :  { %v5808_v51 = vld [vmem:[#allocation10 + $0xa8] ss:$12 sps:$4 sm:$0xff]   ;;  %v5811_v52 = vld [vmem:[#allocation10 + $0xb0] ss:$12 sps:$4 sm:$0xff]  }
 0x35e   :  { %4522 = vtanh.f32 %v1571_v55  ;;  %v5814_v53 = vld [vmem:[#allocation10 + $0x94] ss:$12 sps:$4 sm:$0xff]   ;;  %v5821_v54 = vld [vmem:[#allocation10 + $0x90] ss:$12 sps:$4 sm:$0xff]   ;;  %v5824_v55 = vld [vmem:[#allocation10 + $0x98] ss:$12 sps:$4 sm:$0xff]  }
 0x35f   :  { %4524 = vpow2.f32 %v3600_v58  ;;  %v5834_v58 = vld [vmem:[#allocation10 + $0x80] ss:$12 sps:$4 sm:$0xff]   ;;  %v5837_v26 = vld [vmem:[#allocation10 + $0x64] ss:$12 sps:$4 sm:$0xff]  }
 0x367   :  { %v4521_v27 = vpop.eup %4520 }
 0x368   :  { %v1752_v41 = vadd.f32 1.0, %v4521_v27  ;;  %v5841_v27 = vld [vmem:[#allocation10 + $0x60] ss:$12 sps:$4 sm:$0xff]  }
 0x36a   :  { %4526 = vrcp.f32 %v1752_v41  ;;  %v5844_v41 = vld [vmem:[#allocation10 + $0x68] ss:$12 sps:$4 sm:$0xff]  }
 0x36b   :  { %v4523_v29 = vpop.eup %4522  ;;  %7004 = vst [vmem:[#allocation56_spill] sm:$0xff] %v5844_v41 }
 0x36c   :  { %v1574_v30 = vmul.f32 %v4523_v29, %v1573_v28  ;;  %v4525_v33 = vpop.eup %4524  ;;  %v5847_v28 = vld [vmem:[#allocation10 + $0x4c] ss:$12 sps:$4 sm:$0xff]   ;;  %v5851_v29 = vld [vmem:[#allocation10 + $0x48] ss:$12 sps:$4 sm:$0xff]  }
 0x36d   :  { %v1759_v43 = vadd.f32 1.0, %v4525_v33  ;;  %7005 = vst [vmem:[#allocation34_spill] sm:$0xff] %v5847_v28  ;;  %7006 = vst [vmem:[#allocation35_spill] sm:$0xff] %v5851_v29  ;;  %v5864_v33 = vld [vmem:[#allocation10 + $0x38] ss:$12 sps:$4 sm:$0xff]  }
 0x36e   :  { %v5721_v49 = vadd.f32 %v1575_v31, %v1574_v30  ;;  %v5854_v30 = vld [vmem:[#allocation10 + $0x50] ss:$12 sps:$4 sm:$0xff]   ;;  %v5857_v31 = vld [vmem:[#allocation10 + $0x34] ss:$12 sps:$4 sm:$0xff]   ;;  %7010 = vst [vmem:[#allocation39_spill] sm:$0xff] %v5864_v33 }
 0x36f   :  { %4528 = vrcp.f32 %v1759_v43  ;;  %7007 = vst [vmem:[#allocation36_spill] sm:$0xff] %v5854_v30  ;;  %7008 = vst [vmem:[#allocation37_spill] sm:$0xff] %v5857_v31  ;;  %v5867_v43 = vld [vmem:[#allocation10 + $0x1c] ss:$12 sps:$4 sm:$0xff]  }
 0x370   :  { %v1659_v32 = vpack.c.bf16 %v5721_v49, %v5721_v49  ;;  %7011 = vst [vmem:[#allocation40_spill] sm:$0xff] %v5867_v43 }
 0x372   :  { %1693 = vmatmul.mubr.bf16.vlgmr.msra.gmra.mxu0 %v1659_v32  ;;  %4016 = vmatmul.mubr.bf16.vlgmr.msra.gmra.mxu1 %v1659_v32  ;;  %v5861_v32 = vld [vmem:[#allocation10 + $0x30] ss:$12 sps:$4 sm:$0xff]  }
 0x373   :  { %1772 = vmatpush1.bf16.msra.mxu0 %v6943_v60  ;;  %4020 = vmatpush3.bf16.msra.mxu1 %v6944_v7  ;;  %v6985_v7 = vld [vmem:[#allocation59_spill] sm:$0xff]  ;;  %7009 = vst [vmem:[#allocation38_spill] sm:$0xff] %v5861_v32 }
 0x374   :  { %1773 = vmatprep.subr.bf16.mxu0 %v6945_v17  ;;  %4021 = vmatprep.subr.bf16.mxu1 %v6926_v4 }
 0x375   :  { %1803 = vmatprep.mubr.bf16.mxu0 %v6927_v12  ;;  %4035 = vmatprep.mubr.msk.bf16.mxu1 %vm4914_vm1, %v6926_v4 }
 0x377   :  { %v4527_v39 = vpop.eup %4526  ;;  %1774 = vmatpush1.bf16.msra.mxu0 %v6946_v62  ;;  %4022 = vmatpush3.bf16.msra.mxu1 %v6947_v8  ;;  %v6986_v62 = vld [vmem:[#allocation44_spill] sm:$0xff]  ;;  %v6987_v8 = vld [vmem:[#allocation45_spill] sm:$0xff] }
 0x378   :  { %v1763_v60 = vmul.f32 %v4527_v39, %v1762_v38  ;;  %1775 = vmatprep.subr.bf16.mxu0 %v6948_v13  ;;  %4023 = vmatprep.subr.bf16.mxu1 %v6926_v4  ;;  %v5871_v38 = vld [vmem:[#allocation10 + $0x18] ss:$12 sps:$4 sm:$0xff]   ;;  %v5874_v39 = vld [vmem:[#allocation10 + $0x20] ss:$12 sps:$4 sm:$0xff]  }
 0x379   :  { %7012 = vst [vmem:[#allocation41_spill] sm:$0xff] %v5871_v38  ;;  %7013 = vst [vmem:[#allocation42_spill] sm:$0xff] %v5874_v39 }
 0x37a   :  { %v1764_v17 = vadd.f32 %v1763_v60, %v6985_v7  ;;  %v5877_v60 = vld [vmem:[#allocation10 + $0x4] ss:$12 sps:$4 sm:$0xff]   ;;  %v5881_v7 = vld [vmem:[#allocation10] ss:$12 sps:$4 sm:$0xff]  }
 0x37b   :  { %1776 = vmatpush1.bf16.msra.mxu0 %v6950_v20  ;;  %4024 = vmatpush3.bf16.msra.mxu1 %v6951_v61  ;;  %7014 = vst [vmem:[#allocation43_spill] sm:$0xff] %v5877_v60  ;;  %7015 = vst [vmem:[#allocation46_spill] sm:$0xff] %v5881_v7 }
 0x37c   :  { %4530 = vtanh.f32 %v1764_v17  ;;  %1777 = vmatprep.subr.bf16.mxu0 %v6952_v6  ;;  %4025 = vmatprep.subr.bf16.mxu1 %v6926_v4  ;;  %v4529_v11 = vpop.eup %4528  ;;  %v5884_v17 = vld [vmem:[#allocation10 + $0x8] ss:$12 sps:$4 sm:$0xff]  }
 0x37d   :  { %v1766_v13 = vsub.f32 1.0, %v4529_v11  ;;  %v1768_v6 = vmul.f32 %v4529_v11, %v5592_v40  ;;  %v6989_v40 = vld [vmem:[#allocation22_spill] sm:$0xff]  ;;  %7016 = vst [vmem:[#allocation47_spill] sm:$0xff] %v5884_v17 }
 0x37e   :  { %v5887_v11 = vld [vmem:[#allocation8 + $0xac] ss:$12 sps:$4 sm:$0xff]  }
 0x37f   :  { %1778 = vmatpush1.bf16.msra.mxu0 %v6953_v24  ;;  %4026 = vmatpush3.bf16.msra.mxu1 %v6954_v1  ;;  %7017 = vst [vmem:[#allocation48_spill] sm:$0xff] %v5887_v11 }
 0x380   :  { %1779 = vmatprep.subr.bf16.mxu0 %v6955_v21  ;;  %4027 = vmatprep.subr.bf16.mxu1 %v6926_v4  ;;  %v6988_v21 = vld [vmem:[#allocation20_spill] sm:$0xff] }
 0x383   :  { %1780 = vmatpush1.bf16.msra.mxu0 %v6956_v19  ;;  %4028 = vmatpush3.bf16.msra.mxu1 %v6957_v18  ;;  %v6991_v19 = vld [vmem:[#allocation23_spill] sm:$0xff]  ;;  %v6993_v18 = vld [vmem:[#allocation26_spill] sm:$0xff] }
 0x384   :  { %1781 = vmatprep.subr.bf16.mxu0 %v6958_v14  ;;  %4029 = vmatprep.subr.bf16.mxu1 %v6926_v4  ;;  %v6994_v14 = vld [vmem:[#allocation27_spill] sm:$0xff] }
 0x387   :  { %1782 = vmatpush1.bf16.msra.mxu0 %v6959_v25  ;;  %4030 = vmatpush3.bf16.msra.mxu1 %v6986_v62  ;;  %v6995_v25 = vld [vmem:[#allocation51_spill] sm:$0xff] }
 0x388   :  { %1783 = vmatprep.subr.bf16.mxu0 %v6987_v8  ;;  %4031 = vmatprep.subr.bf16.mxu1 %v6926_v4 }
 0x389   :  { %v4531_v20 = vpop.eup %4530 }
 0x38a   :  { %v1767_v61 = vmul.f32 %v4531_v20, %v1766_v13 }
 0x38b   :  { %1784 = vmatpush1.bf16.msra.mxu0 %v6962_v35  ;;  %4032 = vmatpush3.bf16.msra.mxu1 %v6963_v34  ;;  %v6997_v35 = vld [vmem:[#allocation53_spill] sm:$0xff]  ;;  %v6998_v34 = vld [vmem:[#allocation28_spill] sm:$0xff] }
 0x38c   :  { %1785 = vmatprep.subr.bf16.mxu0 %v6964_v0  ;;  %4033 = vmatprep.subr.bf16.mxu1 %v6926_v4  ;;  %v5759_v24 = vadd.f32 %v1768_v6, %v1767_v61  ;;  %v6990_v0 = vld [vmem:[#allocation24_spill] sm:$0xff] }
 0x38e   :  { %v1770_v1 = vpack.c.bf16 %v5759_v24, %v5759_v24 }
 0x38f   :  { %1786 = vmatpush1.bf16.msra.mxu0 %v6965_v9  ;;  %4034 = vmatpush3.bf16.msra.mxu1 %v6966_v15  ;;  %v6992_v9 = vld [vmem:[#allocation25_spill] sm:$0xff]  ;;  %v6996_v15 = vld [vmem:[#allocation52_spill] sm:$0xff] }
 0x390   :  { %1875 = vmatprep.subr.bf16.mxu0 %v6988_v21  ;;  %4039 = vmatprep.subr.bf16.mxu1 %v6926_v4 }
 0x392   :  { %1804 = vmatmul.mubr.bf16.vlgmr.msra.gmra.mxu0 %v1770_v1  ;;  %4036 = vmatmul.mubr.bf16.vlgmr.msra.gmra.mxu1 %v1770_v1 }
 0x393   :  { %1876 = vmatpush1.bf16.msra.mxu0 %v6989_v40  ;;  %4040 = vmatpush3.bf16.msra.mxu1 %v6990_v0 }
 0x394   :  { %1877 = vmatprep.subr.bf16.mxu0 %v6991_v19  ;;  %4041 = vmatprep.subr.bf16.mxu1 %v6926_v4 }
 0x395   :  { %1907 = vmatprep.mubr.bf16.mxu0 %v6927_v12  ;;  %4055 = vmatprep.mubr.msk.bf16.mxu1 %vm4914_vm1, %v6926_v4 }
 0x397   :  { %1878 = vmatpush1.bf16.msra.mxu0 %v6992_v9  ;;  %4042 = vmatpush3.bf16.msra.mxu1 %v6993_v18 }
 0x398   :  { %1879 = vmatprep.subr.bf16.mxu0 %v6994_v14  ;;  %4043 = vmatprep.subr.bf16.mxu1 %v6926_v4 }
 0x39b   :  { %1880 = vmatpush1.bf16.msra.mxu0 %v6995_v25  ;;  %4044 = vmatpush3.bf16.msra.mxu1 %v6996_v15 }
 0x39c   :  { %1881 = vmatprep.subr.bf16.mxu0 %v6997_v35  ;;  %4045 = vmatprep.subr.bf16.mxu1 %v6926_v4 }
 0x39f   :  { %1882 = vmatpush1.bf16.msra.mxu0 %v6998_v34  ;;  %4046 = vmatpush3.bf16.msra.mxu1 %v6999_v5 }
 0x3a0   :  { %1883 = vmatprep.subr.bf16.mxu0 %v7000_v44  ;;  %4047 = vmatprep.subr.bf16.mxu1 %v6926_v4 }
 0x3a3   :  { %1884 = vmatpush1.bf16.msra.mxu0 %v5645_v10  ;;  %4048 = vmatpush3.bf16.msra.mxu1 %v7001_v45 }
 0x3a4   :  { %1885 = vmatprep.subr.bf16.mxu0 %v7002_v46  ;;  %4049 = vmatprep.subr.bf16.mxu1 %v6926_v4 }
 0x3a7   :  { %1886 = vmatpush1.bf16.msra.mxu0 %v7003_v47  ;;  %4050 = vmatpush3.bf16.msra.mxu1 %v5658_v16 }
 0x3a8   :  { %1887 = vmatprep.subr.bf16.mxu0 %v5661_v59  ;;  %4051 = vmatprep.subr.bf16.mxu1 %v6926_v4 }
 0x3ab   :  { %1888 = vmatpush1.bf16.msra.mxu0 %v5665_v63  ;;  %4052 = vmatpush3.bf16.msra.mxu1 %v5795_v48 }
 0x3ac   :  { %1889 = vmatprep.subr.bf16.mxu0 %v5669_v2  ;;  %4053 = vmatprep.subr.bf16.mxu1 %v6926_v4 }
 0x3af   :  { %1890 = vmatpush1.bf16.msra.mxu0 %v5673_v23  ;;  %4054 = vmatpush3.bf16.msra.mxu1 %v5801_v50 }
 0x3b0   :  { %1957 = vmatprep.subr.bf16.mxu0 %v5804_v42  ;;  %4059 = vmatprep.subr.bf16.mxu1 %v6926_v4 }
 0x3b2   :  { %1908 = vmatmul.mubr.bf16.vlgmr.msra.gmra.mxu0 %v1770_v1  ;;  %4056 = vmatmul.mubr.bf16.vlgmr.msra.gmra.mxu1 %v1770_v1 }
 0x3b3   :  { %1958 = vmatpush1.bf16.msra.mxu0 %v5808_v51  ;;  %4060 = vmatpush3.bf16.msra.mxu1 %v5811_v52 }
 0x3b4   :  { %1959 = vmatprep.subr.bf16.mxu0 %v5814_v53  ;;  %4061 = vmatprep.subr.bf16.mxu1 %v6926_v4 }
 0x3b5   :  { %1989 = vmatprep.mubr.bf16.mxu0 %v6927_v12  ;;  %4075 = vmatprep.mubr.msk.bf16.mxu1 %vm4914_vm1, %v6926_v4 }
 0x3b7   :  { %1960 = vmatpush1.bf16.msra.mxu0 %v5821_v54  ;;  %4062 = vmatpush3.bf16.msra.mxu1 %v5824_v55 }
 0x3b8   :  { %1961 = vmatprep.subr.bf16.mxu0 %v5827_v56  ;;  %4063 = vmatprep.subr.bf16.mxu1 %v6926_v4 }
 0x3bb   :  { %1962 = vmatpush1.bf16.msra.mxu0 %v5831_v57  ;;  %4064 = vmatpush3.bf16.msra.mxu1 %v5834_v58 }
 0x3bc   :  { %1963 = vmatprep.subr.bf16.mxu0 %v5837_v26  ;;  %4065 = vmatprep.subr.bf16.mxu1 %v6926_v4 }
 0x3bf   :  { %1964 = vmatpush1.bf16.msra.mxu0 %v5841_v27  ;;  %4066 = vmatpush3.bf16.msra.mxu1 %v5844_v41 }
 0x3c0   :  { %1965 = vmatprep.subr.bf16.mxu0 %v5847_v28  ;;  %4067 = vmatprep.subr.bf16.mxu1 %v6926_v4 }
 0x3c3   :  { %1966 = vmatpush1.bf16.msra.mxu0 %v5851_v29  ;;  %4068 = vmatpush3.bf16.msra.mxu1 %v5854_v30 }
 0x3c4   :  { %1967 = vmatprep.subr.bf16.mxu0 %v5857_v31  ;;  %4069 = vmatprep.subr.bf16.mxu1 %v6926_v4 }
 0x3c7   :  { %1968 = vmatpush1.bf16.msra.mxu0 %v5861_v32  ;;  %4070 = vmatpush3.bf16.msra.mxu1 %v5864_v33 }
 0x3c8   :  { %1969 = vmatprep.subr.bf16.mxu0 %v5867_v43  ;;  %4071 = vmatprep.subr.bf16.mxu1 %v6926_v4 }
 0x3cb   :  { %1970 = vmatpush1.bf16.msra.mxu0 %v5871_v38  ;;  %4072 = vmatpush3.bf16.msra.mxu1 %v5874_v39 }
 0x3cc   :  { %1971 = vmatprep.subr.bf16.mxu0 %v5877_v60  ;;  %4073 = vmatprep.subr.bf16.mxu1 %v6926_v4 }
 0x3cf   :  { %1972 = vmatpush1.bf16.msra.mxu0 %v5881_v7  ;;  %4074 = vmatpush3.bf16.msra.mxu1 %v5884_v17 }
 0x3d0   :  { %2068 = vmatprep.subr.bf16.mxu0 %v5887_v11  ;;  %4079 = vmatprep.subr.bf16.mxu1 %v6926_v4 }
 0x432   :  { %v1694_v62 = vpop.f32.mrf.mxu0  ;;  %v1735_v8 = vpop.f32.mrf.mxu1 }
 0x434   :  { %v1696_v13 = vpop.f32.mrf.mxu0  ;;  %v4017_v20 = vpop.f32.mrf.mxu1 }
 0x436   :  { %v1698_v61 = vpop.f32.mrf.mxu0  ;;  %v1738_v6 = vpop.f32.mrf.mxu1 }
 0x438   :  { %v1699_v1 = vpop.f32.mrf.mxu0  ;;  %v4018_v60 = vpop.f32.mrf.mxu1 }
 0x452   :  { %v1805_v39 = vpop.f32.mrf.mxu0  ;;  %v1846_v7 = vpop.f32.mrf.mxu1 }
 0x453   :  { %v1806_v38 = vadd.f32 %v1805_v39, %v5532_v37 }
 0x454   :  { %v1807_v43 = vpop.f32.mrf.mxu0  ;;  %v4037_v17 = vpop.f32.mrf.mxu1 }
 0x455   :  { %v1852_v33 = vadd.f32 %v1806_v38, %v1694_v62  ;;  %v1808_v32 = vadd.f32 %v1807_v43, %v5536_v3  ;;  %v7018_v17 = vld [vmem:[#allocation57_spill] sm:$0xff] }
 0x456   :  { %v1809_v11 = vpop.f32.mrf.mxu0  ;;  %v1849_v31 = vpop.f32.mrf.mxu1 }
 0x457   :  { %v3601_v30 = vmul.f32 -1.442695, %v1852_v33  ;;  %v1859_v20 = vadd.f32 %v1808_v32, %v1696_v13  ;;  %v1866_v31 = vadd.f32 %v5543_v22, %v1735_v8  ;;  %v1847_v32 = vadd.f32 %v1846_v7, %v5547_v36 }
 0x458   :  { %v1810_v29 = vpop.f32.mrf.mxu0  ;;  %v4038_v28 = vpop.f32.mrf.mxu1 }
 0x459   :  { %4532 = vpow2.f32 %v3601_v30  ;;  %v3602_v61 = vmul.f32 -1.442695, %v1859_v20 }
 0x45b   :  { %4534 = vpow2.f32 %v3602_v61 }
 0x466   :  { %v4533_v6 = vpop.eup %4532 }
 0x467   :  { %v1856_v60 = vadd.f32 1.0, %v4533_v6  ;;  %v7019_v6 = vld [vmem:[#allocation58_spill] sm:$0xff] }
 0x468   :  { %v4535_v1 = vpop.eup %4534 }
 0x469   :  { %4536 = vrcp.f32 %v1856_v60  ;;  %v1863_v41 = vadd.f32 1.0, %v4535_v1 }
 0x46b   :  { %4538 = vrcp.f32 %v1863_v41 }
 0x472   :  { %v1909_v39 = vpop.f32.mrf.mxu0  ;;  %v1950_v37 = vpop.f32.mrf.mxu1 }
 0x473   :  { %v2045_v38 = vadd.f32 %v1909_v39, %v7018_v17 }
 0x474   :  { %v1911_v62 = vpop.f32.mrf.mxu0  ;;  %v4057_v43 = vpop.f32.mrf.mxu1 }
 0x475   :  { %v3603_v33 = vmul.f32 -1.442695, %v2045_v38  ;;  %v2052_v60 = vadd.f32 %v1911_v62, %v7019_v6  ;;  %v5902_v62 = vld [vmem:[#allocation8 + $0xa8] ss:$12 sps:$4 sm:$0xff]  }
 0x476   :  { %v4537_v29 = vpop.eup %4536  ;;  %v1913_v28 = vpop.f32.mrf.mxu0  ;;  %v5927_v6 = vld [vmem:[#allocation8 + $0x7c] ss:$12 sps:$4 sm:$0xff]  }
 0x477   :  { %v1953_v30 = vpop.f32.mrf.mxu1  ;;  %v1867_v11 = vmul.f32 %v4537_v29, %v1866_v31  ;;  %4540 = vpow2.f32 %v3603_v33  ;;  %v3604_v1 = vmul.f32 -1.442695, %v2052_v60  ;;  %v5905_v29 = vld [vmem:[#allocation8 + $0xb0] ss:$12 sps:$4 sm:$0xff]  }
 0x478   :  { %v1914_v13 = vpop.f32.mrf.mxu0  ;;  %v4539_v39 = vpop.eup %4538  ;;  %v5908_v30 = vld [vmem:[#allocation8 + $0x94] ss:$12 sps:$4 sm:$0xff]   ;;  %v7020_v60 = vld [vmem:[#allocation62_spill] sm:$0xff] }
 0x479   :  { %v4058_v20 = vpop.f32.mrf.mxu1  ;;  %v1868_v61 = vadd.f32 %v1867_v11, %v1847_v32  ;;  %v1870_v8 = vsub.f32 1.0, %v4539_v39  ;;  %v1872_v43 = vmul.f32 %v4539_v39, %v5721_v49  ;;  %v5918_v49 = vld [vmem:[%s6680_s4] ss:$0 sm:$0xff]  ;;  %v5921_v13 = vld [vmem:[#allocation8 + $0x90] ss:$12 sps:$4 sm:$0xff]  }
 0x47a   :  { %v2059_v32 = vadd.f32 %v5918_v49, %v1950_v37  ;;  %v5924_v20 = vld [vmem:[#allocation8 + $0x98] ss:$12 sps:$4 sm:$0xff]   ;;  %v5935_v39 = vld [vmem:[#allocation8 + $0x80] ss:$12 sps:$4 sm:$0xff]  }
 0x47b   :  { %4542 = vtanh.f32 %v1868_v61  ;;  %v5932_v37 = vld [vmem:[#allocation8 + $0x78] ss:$12 sps:$4 sm:$0xff]  }
 0x47c   :  { %4544 = vpow2.f32 %v3604_v1 }
 0x484   :  { %v4541_v17 = vpop.eup %4540 }
 0x485   :  { %v2049_v22 = vadd.f32 1.0, %v4541_v17  ;;  %v5938_v17 = vld [vmem:[#allocation8 + $0x64] ss:$12 sps:$4 sm:$0xff]  }
 0x487   :  { %4546 = vrcp.f32 %v2049_v22  ;;  %v5942_v22 = vld [vmem:[#allocation8 + $0x60] ss:$12 sps:$4 sm:$0xff]  }
 0x488   :  { %v4543_v41 = vpop.eup %4542 }
 0x489   :  { %v1871_v38 = vmul.f32 %v4543_v41, %v1870_v8  ;;  %v4545_v33 = vpop.eup %4544  ;;  %v5945_v8 = vld [vmem:[#allocation8 + $0x68] ss:$12 sps:$4 sm:$0xff]   ;;  %v5948_v41 = vld [vmem:[#allocation8 + $0x4c] ss:$12 sps:$4 sm:$0xff]  }
 0x48a   :  { %v2056_v28 = vadd.f32 1.0, %v4545_v33 }
 0x48b   :  { %v5898_v7 = vadd.f32 %v1872_v43, %v1871_v38  ;;  %v5952_v38 = vld [vmem:[#allocation8 + $0x48] ss:$12 sps:$4 sm:$0xff]   ;;  %v5955_v43 = vld [vmem:[#allocation8 + $0x50] ss:$12 sps:$4 sm:$0xff]  }
 0x48c   :  { %4548 = vrcp.f32 %v2056_v28  ;;  %7021 = vst [vmem:[#allocation49_spill] sm:$0xff] %v5955_v43  ;;  %v5962_v28 = vld [vmem:[#allocation8 + $0x30] ss:$12 sps:$4 sm:$0xff]  }
 0x48d   :  { %v1956_v31 = vpack.c.bf16 %v5898_v7, %v5898_v7  ;;  %7023 = vst [vmem:[#allocation54_spill] sm:$0xff] %v5962_v28 }
 0x48f   :  { %1990 = vmatmul.mubr.bf16.vlgmr.msra.gmra.mxu0 %v1956_v31  ;;  %4076 = vmatmul.mubr.bf16.vlgmr.msra.gmra.mxu1 %v1956_v31  ;;  %v5958_v31 = vld [vmem:[#allocation8 + $0x34] ss:$12 sps:$4 sm:$0xff]  }
 0x490   :  { %2069 = vmatpush1.bf16.msra.mxu0 %v5902_v62  ;;  %4080 = vmatpush3.bf16.msra.mxu1 %v5905_v29  ;;  %7022 = vst [vmem:[#allocation50_spill] sm:$0xff] %v5958_v31 }
 0x491   :  { %2070 = vmatprep.subr.bf16.mxu0 %v5908_v30  ;;  %4081 = vmatprep.subr.bf16.mxu1 %v6926_v4 }
 0x492   :  { %2100 = vmatprep.mubr.bf16.mxu0 %v6927_v12  ;;  %4095 = vmatprep.mubr.msk.bf16.mxu1 %vm4914_vm1, %v6926_v4 }
 0x494   :  { %v4547_v11 = vpop.eup %4546  ;;  %2071 = vmatpush1.bf16.msra.mxu0 %v5921_v13  ;;  %4082 = vmatpush3.bf16.msra.mxu1 %v5924_v20 }
 0x495   :  { %v2060_v61 = vmul.f32 %v4547_v11, %v2059_v32  ;;  %2072 = vmatprep.subr.bf16.mxu0 %v5927_v6  ;;  %4083 = vmatprep.subr.bf16.mxu1 %v6926_v4  ;;  %v5965_v32 = vld [vmem:[#allocation8 + $0x38] ss:$12 sps:$4 sm:$0xff]   ;;  %v5968_v11 = vld [vmem:[#allocation8 + $0x1c] ss:$12 sps:$4 sm:$0xff]  }
 0x496   :  { %7024 = vst [vmem:[#allocation55_spill] sm:$0xff] %v5965_v32  ;;  %7025 = vst [vmem:[#allocation59_spill] sm:$0xff] %v5968_v11 }
 0x497   :  { %v2061_v1 = vadd.f32 %v2060_v61, %v7020_v60 }
 0x498   :  { %2073 = vmatpush1.bf16.msra.mxu0 %v5932_v37  ;;  %4084 = vmatpush3.bf16.msra.mxu1 %v5935_v39 }
 0x499   :  { %4550 = vtanh.f32 %v2061_v1  ;;  %2074 = vmatprep.subr.bf16.mxu0 %v5938_v17  ;;  %4085 = vmatprep.subr.bf16.mxu1 %v6926_v4  ;;  %v4549_v33 = vpop.eup %4548 }
 0x49a   :  { %v2063_v61 = vsub.f32 1.0, %v4549_v33 }
 0x49c   :  { %2075 = vmatpush1.bf16.msra.mxu0 %v5942_v22  ;;  %4086 = vmatpush3.bf16.msra.mxu1 %v5945_v8 }
 0x49d   :  { %2076 = vmatprep.subr.bf16.mxu0 %v5948_v41  ;;  %4087 = vmatprep.subr.bf16.mxu1 %v6926_v4 }
 0x4a0   :  { %2077 = vmatpush1.bf16.msra.mxu0 %v5952_v38  ;;  %4088 = vmatpush3.bf16.msra.mxu1 %v5955_v43  ;;  %v5973_v43 = vld [vmem:[#allocation8 + $0x18] ss:$12 sps:$4 sm:$0xff]  }
 0x4a1   :  { %2078 = vmatprep.subr.bf16.mxu0 %v5958_v31  ;;  %4089 = vmatprep.subr.bf16.mxu1 %v6926_v4  ;;  %v2065_v31 = vmul.f32 %v4549_v33, %v5759_v24  ;;  %v5987_v24 = vld [vmem:[#allocation8] ss:$12 sps:$4 sm:$0xff]   ;;  %v5990_v33 = vld [vmem:[#allocation8 + $0x8] ss:$12 sps:$4 sm:$0xff]  }
 0x4a4   :  { %2079 = vmatpush1.bf16.msra.mxu0 %v5962_v28  ;;  %4090 = vmatpush3.bf16.msra.mxu1 %v5965_v32  ;;  %v5976_v28 = vld [vmem:[#allocation8 + $0x20] ss:$12 sps:$4 sm:$0xff]   ;;  %v5979_v32 = vld [vmem:[#allocation8 + $0x4] ss:$12 sps:$4 sm:$0xff]  }
 0x4a5   :  { %2080 = vmatprep.subr.bf16.mxu0 %v5968_v11  ;;  %4091 = vmatprep.subr.bf16.mxu1 %v6926_v4 }
 0x4a6   :  { %v4551_v60 = vpop.eup %4550 }
 0x4a7   :  { %v2064_v1 = vmul.f32 %v4551_v60, %v2063_v61 }
 0x4a8   :  { %2081 = vmatpush1.bf16.msra.mxu0 %v5973_v43  ;;  %4092 = vmatpush3.bf16.msra.mxu1 %v5976_v28 }
 0x4a9   :  { %2082 = vmatprep.subr.bf16.mxu0 %v5979_v32  ;;  %4093 = vmatprep.subr.bf16.mxu1 %v6926_v4  ;;  %v5983_v11 = vadd.f32 %v2065_v31, %v2064_v1  ;;  %v7040_v1 = vld [vmem:[#allocation21_spill] sm:$0xff] }
 0x4ab   :  { %v2067_v61 = vpack.c.bf16 %v5983_v11, %v5983_v11 }
 0x4ac   :  { %2083 = vmatpush1.bf16.msra.mxu0 %v5987_v24  ;;  %4094 = vmatpush3.bf16.msra.mxu1 %v5990_v33 }
 0x4ad   :  { %2172 = vmatprep.subr.bf16.mxu0 %v6988_v21  ;;  %4099 = vmatprep.subr.bf16.mxu1 %v6926_v4  ;;  %v7032_v21 = vld [vmem:[#allocation39_spill] sm:$0xff] }
 0x4af   :  { %2101 = vmatmul.mubr.bf16.vlgmr.msra.gmra.mxu0 %v2067_v61  ;;  %4096 = vmatmul.mubr.bf16.vlgmr.msra.gmra.mxu1 %v2067_v61 }
 0x4b0   :  { %2173 = vmatpush1.bf16.msra.mxu0 %v6989_v40  ;;  %4100 = vmatpush3.bf16.msra.mxu1 %v6990_v0  ;;  %v7033_v40 = vld [vmem:[#allocation40_spill] sm:$0xff]  ;;  %v7034_v0 = vld [vmem:[#allocation41_spill] sm:$0xff] }
 0x4b1   :  { %2174 = vmatprep.subr.bf16.mxu0 %v6991_v19  ;;  %4101 = vmatprep.subr.bf16.mxu1 %v6926_v4  ;;  %v7035_v19 = vld [vmem:[#allocation42_spill] sm:$0xff] }
 0x4b2   :  { %2204 = vmatprep.mubr.bf16.mxu0 %v6927_v12  ;;  %4115 = vmatprep.mubr.msk.bf16.mxu1 %vm4914_vm1, %v6926_v4 }
 0x4b4   :  { %2175 = vmatpush1.bf16.msra.mxu0 %v6992_v9  ;;  %4102 = vmatpush3.bf16.msra.mxu1 %v6993_v18  ;;  %v7036_v9 = vld [vmem:[#allocation43_spill] sm:$0xff]  ;;  %v7037_v18 = vld [vmem:[#allocation46_spill] sm:$0xff] }
 0x4b5   :  { %2176 = vmatprep.subr.bf16.mxu0 %v6994_v14  ;;  %4103 = vmatprep.subr.bf16.mxu1 %v6926_v4  ;;  %v7038_v14 = vld [vmem:[#allocation47_spill] sm:$0xff] }
 0x4b8   :  { %2177 = vmatpush1.bf16.msra.mxu0 %v6995_v25  ;;  %4104 = vmatpush3.bf16.msra.mxu1 %v6996_v15  ;;  %v7039_v25 = vld [vmem:[#allocation48_spill] sm:$0xff] }
 0x4b9   :  { %2178 = vmatprep.subr.bf16.mxu0 %v6997_v35  ;;  %4105 = vmatprep.subr.bf16.mxu1 %v6926_v4 }
 0x4bc   :  { %2179 = vmatpush1.bf16.msra.mxu0 %v6998_v34  ;;  %4106 = vmatpush3.bf16.msra.mxu1 %v6999_v5 }
 0x4bd   :  { %2180 = vmatprep.subr.bf16.mxu0 %v7000_v44  ;;  %4107 = vmatprep.subr.bf16.mxu1 %v6926_v4 }
 0x4c0   :  { %2181 = vmatpush1.bf16.msra.mxu0 %v5645_v10  ;;  %4108 = vmatpush3.bf16.msra.mxu1 %v7001_v45  ;;  %v7027_v10 = vld [vmem:[#allocation34_spill] sm:$0xff] }
 0x4c1   :  { %2182 = vmatprep.subr.bf16.mxu0 %v7002_v46  ;;  %4109 = vmatprep.subr.bf16.mxu1 %v6926_v4 }
 0x4c4   :  { %2183 = vmatpush1.bf16.msra.mxu0 %v7003_v47  ;;  %4110 = vmatpush3.bf16.msra.mxu1 %v5658_v16  ;;  %v7030_v16 = vld [vmem:[#allocation37_spill] sm:$0xff] }
 0x4c5   :  { %2184 = vmatprep.subr.bf16.mxu0 %v5661_v59  ;;  %4111 = vmatprep.subr.bf16.mxu1 %v6926_v4  ;;  %v7031_v59 = vld [vmem:[#allocation38_spill] sm:$0xff] }
 0x4c8   :  { %2185 = vmatpush1.bf16.msra.mxu0 %v5665_v63  ;;  %4112 = vmatpush3.bf16.msra.mxu1 %v5795_v48  ;;  %v7026_v63 = vld [vmem:[#allocation56_spill] sm:$0xff] }
 0x4c9   :  { %2186 = vmatprep.subr.bf16.mxu0 %v5669_v2  ;;  %4113 = vmatprep.subr.bf16.mxu1 %v6926_v4  ;;  %v7029_v2 = vld [vmem:[#allocation36_spill] sm:$0xff] }
 0x4cc   :  { %2187 = vmatpush1.bf16.msra.mxu0 %v5673_v23  ;;  %4114 = vmatpush3.bf16.msra.mxu1 %v5801_v50  ;;  %v7028_v23 = vld [vmem:[#allocation35_spill] sm:$0xff] }
 0x4cd   :  { %2254 = vmatprep.subr.bf16.mxu0 %v5804_v42  ;;  %4119 = vmatprep.subr.bf16.mxu1 %v6926_v4 }
 0x4cf   :  { %2205 = vmatmul.mubr.bf16.vlgmr.msra.gmra.mxu0 %v2067_v61  ;;  %4116 = vmatmul.mubr.bf16.vlgmr.msra.gmra.mxu1 %v2067_v61 }
 0x4d0   :  { %2255 = vmatpush1.bf16.msra.mxu0 %v5808_v51  ;;  %4120 = vmatpush3.bf16.msra.mxu1 %v5811_v52 }
 0x4d1   :  { %2256 = vmatprep.subr.bf16.mxu0 %v5814_v53  ;;  %4121 = vmatprep.subr.bf16.mxu1 %v6926_v4 }
 0x4d2   :  { %2286 = vmatprep.mubr.bf16.mxu0 %v6927_v12  ;;  %4135 = vmatprep.mubr.msk.bf16.mxu1 %vm4914_vm1, %v6926_v4 }
 0x4d4   :  { %2257 = vmatpush1.bf16.msra.mxu0 %v5821_v54  ;;  %4122 = vmatpush3.bf16.msra.mxu1 %v5824_v55 }
 0x4d5   :  { %2258 = vmatprep.subr.bf16.mxu0 %v5827_v56  ;;  %4123 = vmatprep.subr.bf16.mxu1 %v6926_v4 }
 0x4d8   :  { %2259 = vmatpush1.bf16.msra.mxu0 %v5831_v57  ;;  %4124 = vmatpush3.bf16.msra.mxu1 %v5834_v58 }
 0x4d9   :  { %2260 = vmatprep.subr.bf16.mxu0 %v5837_v26  ;;  %4125 = vmatprep.subr.bf16.mxu1 %v6926_v4 }
 0x4dc   :  { %2261 = vmatpush1.bf16.msra.mxu0 %v5841_v27  ;;  %4126 = vmatpush3.bf16.msra.mxu1 %v7026_v63 }
 0x4dd   :  { %2262 = vmatprep.subr.bf16.mxu0 %v7027_v10  ;;  %4127 = vmatprep.subr.bf16.mxu1 %v6926_v4 }
 0x4e0   :  { %2263 = vmatpush1.bf16.msra.mxu0 %v7028_v23  ;;  %4128 = vmatpush3.bf16.msra.mxu1 %v7029_v2 }
 0x4e1   :  { %2264 = vmatprep.subr.bf16.mxu0 %v7030_v16  ;;  %4129 = vmatprep.subr.bf16.mxu1 %v6926_v4 }
 0x4e4   :  { %2265 = vmatpush1.bf16.msra.mxu0 %v7031_v59  ;;  %4130 = vmatpush3.bf16.msra.mxu1 %v7032_v21 }
 0x4e5   :  { %2266 = vmatprep.subr.bf16.mxu0 %v7033_v40  ;;  %4131 = vmatprep.subr.bf16.mxu1 %v6926_v4 }
 0x4e8   :  { %2267 = vmatpush1.bf16.msra.mxu0 %v7034_v0  ;;  %4132 = vmatpush3.bf16.msra.mxu1 %v7035_v19 }
 0x4e9   :  { %2268 = vmatprep.subr.bf16.mxu0 %v7036_v9  ;;  %4133 = vmatprep.subr.bf16.mxu1 %v6926_v4 }
 0x4ec   :  { %2269 = vmatpush1.bf16.msra.mxu0 %v7037_v18  ;;  %4134 = vmatpush3.bf16.msra.mxu1 %v7038_v14 }
 0x4ed   :  { %2365 = vmatprep.subr.bf16.mxu0 %v7039_v25  ;;  %4139 = vmatprep.subr.bf16.mxu1 %v6926_v4 }
 0x54f   :  { %v1991_v15 = vpop.f32.mrf.mxu0  ;;  %v2032_v35 = vpop.f32.mrf.mxu1 }
 0x551   :  { %v1993_v34 = vpop.f32.mrf.mxu0  ;;  %v4077_v5 = vpop.f32.mrf.mxu1 }
 0x553   :  { %v1995_v44 = vpop.f32.mrf.mxu0  ;;  %v2035_v45 = vpop.f32.mrf.mxu1 }
 0x555   :  { %v1996_v46 = vpop.f32.mrf.mxu0  ;;  %v4078_v47 = vpop.f32.mrf.mxu1 }
 0x56f   :  { %v2102_v31 = vpop.f32.mrf.mxu0  ;;  %v2143_v60 = vpop.f32.mrf.mxu1 }
 0x570   :  { %v2103_v61 = vadd.f32 %v2102_v31, %v7040_v1 }
 0x571   :  { %v2104_v9 = vpop.f32.mrf.mxu0  ;;  %v4097_v18 = vpop.f32.mrf.mxu1 }
 0x572   :  { %v2149_v19 = vadd.f32 %v2103_v61, %v1991_v15  ;;  %v2105_v14 = vadd.f32 %v2104_v9, %v5536_v3  ;;  %v7041_v18 = vld [vmem:[#allocation60_spill] sm:$0xff] }
 0x573   :  { %v2106_v25 = vpop.f32.mrf.mxu0  ;;  %v2146_v0 = vpop.f32.mrf.mxu1 }
 0x574   :  { %v3605_v40 = vmul.f32 -1.442695, %v2149_v19  ;;  %v2156_v5 = vadd.f32 %v2105_v14, %v1993_v34  ;;  %v2144_v25 = vadd.f32 %v2143_v60, %v5547_v36 }
 0x575   :  { %v2107_v21 = vpop.f32.mrf.mxu0  ;;  %v4098_v59 = vpop.f32.mrf.mxu1 }
 0x576   :  { %4552 = vpow2.f32 %v3605_v40  ;;  %v3606_v44 = vmul.f32 -1.442695, %v2156_v5  ;;  %v6071_v21 = vld [vmem:[%s6684_s8] ss:$0 sm:$0xff] }
 0x577   :  { %v2163_v59 = vadd.f32 %v6071_v21, %v2032_v35 }
 0x578   :  { %4554 = vpow2.f32 %v3606_v44 }
 0x583   :  { %v4553_v45 = vpop.eup %4552 }
 0x584   :  { %v2153_v46 = vadd.f32 1.0, %v4553_v45 }
 0x585   :  { %v4555_v47 = vpop.eup %4554 }
 0x586   :  { %4556 = vrcp.f32 %v2153_v46  ;;  %v2160_v16 = vadd.f32 1.0, %v4555_v47  ;;  %v7042_v46 = vld [vmem:[#allocation61_spill] sm:$0xff] }
 0x588   :  { %4558 = vrcp.f32 %v2160_v16 }
 0x58f   :  { %v2206_v31 = vpop.f32.mrf.mxu0  ;;  %v2247_v1 = vpop.f32.mrf.mxu1 }
 0x590   :  { %v2342_v15 = vadd.f32 %v2206_v31, %v7041_v18 }
 0x591   :  { %v2208_v61 = vpop.f32.mrf.mxu0  ;;  %v4117_v9 = vpop.f32.mrf.mxu1 }
 0x592   :  { %v3607_v40 = vmul.f32 -1.442695, %v2342_v15  ;;  %v2349_v47 = vadd.f32 %v2208_v61, %v7042_v46  ;;  %v7046_v46 = vld [vmem:[#allocation54_spill] sm:$0xff] }
 0x593   :  { %v4557_v0 = vpop.eup %4556  ;;  %v2210_v19 = vpop.f32.mrf.mxu0 }
 0x594   :  { %v2250_v14 = vpop.f32.mrf.mxu1  ;;  %v2164_v34 = vmul.f32 %v4557_v0, %v2163_v59  ;;  %4560 = vpow2.f32 %v3607_v40  ;;  %v3608_v31 = vmul.f32 -1.442695, %v2349_v47  ;;  %v7047_v47 = vld [vmem:[#allocation55_spill] sm:$0xff] }
 0x595   :  { %v2211_v5 = vpop.f32.mrf.mxu0  ;;  %v4559_v18 = vpop.eup %4558 }
 0x596   :  { %v4118_v44 = vpop.f32.mrf.mxu1  ;;  %v2165_v45 = vadd.f32 %v2164_v34, %v2144_v25  ;;  %v2167_v15 = vsub.f32 1.0, %v4559_v18  ;;  %v2169_v14 = vmul.f32 %v4559_v18, %v5898_v7  ;;  %v2356_v7 = vadd.f32 %v5918_v49, %v2247_v1  ;;  %v7043_v34 = vld [vmem:[#allocation65_spill] sm:$0xff] }
 0x597   :  { %v7044_v1 = vld [vmem:[#allocation49_spill] sm:$0xff]  ;;  %v7045_v44 = vld [vmem:[#allocation50_spill] sm:$0xff] }
 0x598   :  { %4562 = vtanh.f32 %v2165_v45 }
 0x599   :  { %4564 = vpow2.f32 %v3608_v31  ;;  %v7048_v31 = vld [vmem:[#allocation59_spill] sm:$0xff] }
 0x5a1   :  { %v4561_v9 = vpop.eup %4560 }
 0x5a2   :  { %v2346_v35 = vadd.f32 1.0, %v4561_v9 }
 0x5a4   :  { %4566 = vrcp.f32 %v2346_v35 }
 0x5a5   :  { %v4563_v16 = vpop.eup %4562 }
 0x5a6   :  { %v2168_v19 = vmul.f32 %v4563_v16, %v2167_v15  ;;  %v4565_v40 = vpop.eup %4564 }
 0x5a7   :  { %v2353_v61 = vadd.f32 1.0, %v4565_v40  ;;  %v6135_v40 = vld [vmem:[#allocation5 + $0x94] ss:$12 sps:$4 sm:$0xff]  }
 0x5a8   :  { %v6077_v60 = vadd.f32 %v2169_v14, %v2168_v19  ;;  %v6123_v14 = vld [vmem:[#allocation5 + $0xac] ss:$12 sps:$4 sm:$0xff]  }
 0x5a9   :  { %4568 = vrcp.f32 %v2353_v61  ;;  %v6142_v61 = vld [vmem:[#allocation5 + $0x90] ss:$12 sps:$4 sm:$0xff]  }
 0x5aa   :  { %v2253_v59 = vpack.c.bf16 %v6077_v60, %v6077_v60 }
 0x5ac   :  { %2287 = vmatmul.mubr.bf16.vlgmr.msra.gmra.mxu0 %v2253_v59  ;;  %4136 = vmatmul.mubr.bf16.vlgmr.msra.gmra.mxu1 %v2253_v59  ;;  %v6132_v59 = vld [vmem:[#allocation5 + $0xb0] ss:$12 sps:$4 sm:$0xff]  }
 0x5ad   :  { %2366 = vmatpush1.bf16.msra.mxu0 %v5902_v62  ;;  %4140 = vmatpush3.bf16.msra.mxu1 %v5905_v29 }
 0x5ae   :  { %2367 = vmatprep.subr.bf16.mxu0 %v5908_v30  ;;  %4141 = vmatprep.subr.bf16.mxu1 %v6926_v4 }
 0x5af   :  { %2397 = vmatprep.mubr.bf16.mxu0 %v6927_v12  ;;  %4155 = vmatprep.mubr.msk.bf16.mxu1 %vm4914_vm1, %v6926_v4 }
 0x5b1   :  { %v4567_v0 = vpop.eup %4566  ;;  %2368 = vmatpush1.bf16.msra.mxu0 %v5921_v13  ;;  %4142 = vmatpush3.bf16.msra.mxu1 %v5924_v20 }
 0x5b2   :  { %v2357_v25 = vmul.f32 %v4567_v0, %v2356_v7  ;;  %2369 = vmatprep.subr.bf16.mxu0 %v5927_v6  ;;  %4143 = vmatprep.subr.bf16.mxu1 %v6926_v4  ;;  %v6145_v7 = vld [vmem:[#allocation5 + $0x98] ss:$12 sps:$4 sm:$0xff]   ;;  %v6148_v0 = vld [vmem:[#allocation5 + $0x7c] ss:$12 sps:$4 sm:$0xff]  }
 0x5b4   :  { %v2358_v5 = vadd.f32 %v2357_v25, %v7043_v34  ;;  %v6152_v25 = vld [vmem:[#allocation5 + $0x78] ss:$12 sps:$4 sm:$0xff]   ;;  %v6155_v34 = vld [vmem:[#allocation5 + $0x80] ss:$12 sps:$4 sm:$0xff]  }
 0x5b5   :  { %2370 = vmatpush1.bf16.msra.mxu0 %v5932_v37  ;;  %4144 = vmatpush3.bf16.msra.mxu1 %v5935_v39 }
 0x5b6   :  { %4570 = vtanh.f32 %v2358_v5  ;;  %2371 = vmatprep.subr.bf16.mxu0 %v5938_v17  ;;  %4145 = vmatprep.subr.bf16.mxu1 %v6926_v4  ;;  %v4569_v45 = vpop.eup %4568  ;;  %v6158_v5 = vld [vmem:[#allocation5 + $0x64] ss:$12 sps:$4 sm:$0xff]  }
 0x5b7   :  { %v2360_v18 = vsub.f32 1.0, %v4569_v45  ;;  %v2362_v15 = vmul.f32 %v4569_v45, %v5983_v11  ;;  %v6129_v11 = vld [vmem:[#allocation5 + $0xa8] ss:$12 sps:$4 sm:$0xff]   ;;  %7049 = vst [vmem:[#allocation44_spill] sm:$0xff] %v6158_v5  ;;  %v6162_v45 = vld [vmem:[#allocation5 + $0x60] ss:$12 sps:$4 sm:$0xff]  }
 0x5b8   :  { %7050 = vst [vmem:[#allocation45_spill] sm:$0xff] %v6162_v45 }
 0x5b9   :  { %2372 = vmatpush1.bf16.msra.mxu0 %v5942_v22  ;;  %4146 = vmatpush3.bf16.msra.mxu1 %v5945_v8 }
 0x5ba   :  { %2373 = vmatprep.subr.bf16.mxu0 %v5948_v41  ;;  %4147 = vmatprep.subr.bf16.mxu1 %v6926_v4 }
 0x5bd   :  { %2374 = vmatpush1.bf16.msra.mxu0 %v5952_v38  ;;  %4148 = vmatpush3.bf16.msra.mxu1 %v7044_v1 }
 0x5be   :  { %2375 = vmatprep.subr.bf16.mxu0 %v7045_v44  ;;  %4149 = vmatprep.subr.bf16.mxu1 %v6926_v4 }
 0x5c1   :  { %2376 = vmatpush1.bf16.msra.mxu0 %v7046_v46  ;;  %4150 = vmatpush3.bf16.msra.mxu1 %v7047_v47 }
 0x5c2   :  { %2377 = vmatprep.subr.bf16.mxu0 %v7048_v31  ;;  %4151 = vmatprep.subr.bf16.mxu1 %v6926_v4 }
 0x5c3   :  { %v4571_v9 = vpop.eup %4570 }
 0x5c4   :  { %v2361_v35 = vmul.f32 %v4571_v9, %v2360_v18  ;;  %v6165_v18 = vld [vmem:[#allocation5 + $0x68] ss:$12 sps:$4 sm:$0xff]   ;;  %v6168_v9 = vld [vmem:[#allocation5 + $0x4c] ss:$12 sps:$4 sm:$0xff]  }
 0x5c5   :  { %2378 = vmatpush1.bf16.msra.mxu0 %v5973_v43  ;;  %4152 = vmatpush3.bf16.msra.mxu1 %v5976_v28  ;;  %7051 = vst [vmem:[#allocation20_spill] sm:$0xff] %v6165_v18  ;;  %7052 = vst [vmem:[#allocation22_spill] sm:$0xff] %v6168_v9 }
 0x5c6   :  { %2379 = vmatprep.subr.bf16.mxu0 %v5979_v32  ;;  %4153 = vmatprep.subr.bf16.mxu1 %v6926_v4  ;;  %v6115_v16 = vadd.f32 %v2362_v15, %v2361_v35  ;;  %v6172_v35 = vld [vmem:[#allocation5 + $0x48] ss:$12 sps:$4 sm:$0xff]   ;;  %v6175_v15 = vld [vmem:[#allocation5 + $0x50] ss:$12 sps:$4 sm:$0xff]  }
 0x5c7   :  { %7053 = vst [vmem:[#allocation24_spill] sm:$0xff] %v6175_v15 }
 0x5c8   :  { %v6119_v19 = vpack.c.bf16 %v6115_v16, %v6115_v16 }
 0x5c9   :  { %2380 = vmatpush1.bf16.msra.mxu0 %v5987_v24  ;;  %4154 = vmatpush3.bf16.msra.mxu1 %v5990_v33 }
 0x5ca   :  { %2469 = vmatprep.subr.bf16.mxu0 %v6123_v14  ;;  %4159 = vmatprep.subr.bf16.mxu1 %v6926_v4 }
 0x5cc   :  { %2398 = vmatmul.mubr.bf16.vlgmr.msra.gmra.mxu0 %v6119_v19  ;;  %4156 = vmatmul.mubr.bf16.vlgmr.msra.gmra.mxu1 %v6119_v19 }
 0x5cd   :  { %2470 = vmatpush1.bf16.msra.mxu0 %v6129_v11  ;;  %4160 = vmatpush3.bf16.msra.mxu1 %v6132_v59 }
 0x5ce   :  { %2471 = vmatprep.subr.bf16.mxu0 %v6135_v40  ;;  %4161 = vmatprep.subr.bf16.mxu1 %v6926_v4 }
 0x5cf   :  { %2501 = vmatprep.mubr.bf16.mxu0 %v6927_v12  ;;  %4175 = vmatprep.mubr.msk.bf16.mxu1 %vm4914_vm1, %v6926_v4 }
 0x5d1   :  { %2472 = vmatpush1.bf16.msra.mxu0 %v6142_v61  ;;  %4162 = vmatpush3.bf16.msra.mxu1 %v6145_v7 }
 0x5d2   :  { %2473 = vmatprep.subr.bf16.mxu0 %v6148_v0  ;;  %4163 = vmatprep.subr.bf16.mxu1 %v6926_v4 }
 0x5d5   :  { %2474 = vmatpush1.bf16.msra.mxu0 %v6152_v25  ;;  %4164 = vmatpush3.bf16.msra.mxu1 %v6155_v34 }
 0x5d6   :  { %2475 = vmatprep.subr.bf16.mxu0 %v6158_v5  ;;  %4165 = vmatprep.subr.bf16.mxu1 %v6926_v4  ;;  %v6178_v5 = vld [vmem:[#allocation5 + $0x34] ss:$12 sps:$4 sm:$0xff]  }
 0x5d7   :  { %7054 = vst [vmem:[#allocation23_spill] sm:$0xff] %v6178_v5 }
 0x5d9   :  { %2476 = vmatpush1.bf16.msra.mxu0 %v6162_v45  ;;  %4166 = vmatpush3.bf16.msra.mxu1 %v6165_v18  ;;  %v6182_v18 = vld [vmem:[#allocation5 + $0x30] ss:$12 sps:$4 sm:$0xff]  }
 0x5da   :  { %2477 = vmatprep.subr.bf16.mxu0 %v6168_v9  ;;  %4167 = vmatprep.subr.bf16.mxu1 %v6926_v4  ;;  %7055 = vst [vmem:[#allocation25_spill] sm:$0xff] %v6182_v18  ;;  %v6185_v9 = vld [vmem:[#allocation5 + $0x38] ss:$12 sps:$4 sm:$0xff]   ;;  %v6188_v45 = vld [vmem:[#allocation5 + $0x1c] ss:$12 sps:$4 sm:$0xff]  }
 0x5db   :  { %7056 = vst [vmem:[#allocation26_spill] sm:$0xff] %v6188_v45 }
 0x5dd   :  { %2478 = vmatpush1.bf16.msra.mxu0 %v6172_v35  ;;  %4168 = vmatpush3.bf16.msra.mxu1 %v6175_v15  ;;  %v6192_v15 = vld [vmem:[#allocation5 + $0x18] ss:$12 sps:$4 sm:$0xff]  }
 0x5de   :  { %2479 = vmatprep.subr.bf16.mxu0 %v6178_v5  ;;  %4169 = vmatprep.subr.bf16.mxu1 %v6926_v4  ;;  %7057 = vst [vmem:[#allocation27_spill] sm:$0xff] %v6192_v15  ;;  %v6196_v5 = vld [vmem:[#allocation5 + $0x4] ss:$12 sps:$4 sm:$0xff]  }
 0x5df   :  { %7058 = vst [vmem:[#allocation51_spill] sm:$0xff] %v6196_v5 }
 0x5e1   :  { %2480 = vmatpush1.bf16.msra.mxu0 %v6182_v18  ;;  %4170 = vmatpush3.bf16.msra.mxu1 %v6185_v9  ;;  %v6200_v18 = vld [vmem:[#allocation5] ss:$12 sps:$4 sm:$0xff]  }
 0x5e2   :  { %2481 = vmatprep.subr.bf16.mxu0 %v6188_v45  ;;  %4171 = vmatprep.subr.bf16.mxu1 %v6926_v4  ;;  %7059 = vst [vmem:[#allocation52_spill] sm:$0xff] %v6200_v18 }
 0x5e5   :  { %2482 = vmatpush1.bf16.msra.mxu0 %v6192_v15  ;;  %4172 = vmatpush3.bf16.msra.mxu1 %v5795_v48  ;;  %v7060_v48 = vld [vmem:[#allocation37_spill] sm:$0xff] }
 0x5e6   :  { %2483 = vmatprep.subr.bf16.mxu0 %v6196_v5  ;;  %4173 = vmatprep.subr.bf16.mxu1 %v6926_v4 }
 0x5e9   :  { %2484 = vmatpush1.bf16.msra.mxu0 %v6200_v18  ;;  %4174 = vmatpush3.bf16.msra.mxu1 %v5801_v50  ;;  %v7061_v50 = vld [vmem:[#allocation38_spill] sm:$0xff] }
 0x5ea   :  { %2551 = vmatprep.subr.bf16.mxu0 %v5804_v42  ;;  %4179 = vmatprep.subr.bf16.mxu1 %v6926_v4  ;;  %v7062_v42 = vld [vmem:[#allocation39_spill] sm:$0xff] }
 0x5ec   :  { %2502 = vmatmul.mubr.bf16.vlgmr.msra.gmra.mxu0 %v6119_v19  ;;  %4176 = vmatmul.mubr.bf16.vlgmr.msra.gmra.mxu1 %v6119_v19 }
 0x5ed   :  { %2552 = vmatpush1.bf16.msra.mxu0 %v5808_v51  ;;  %4180 = vmatpush3.bf16.msra.mxu1 %v5811_v52  ;;  %v7063_v51 = vld [vmem:[#allocation40_spill] sm:$0xff]  ;;  %v7064_v52 = vld [vmem:[#allocation41_spill] sm:$0xff] }
 0x5ee   :  { %2553 = vmatprep.subr.bf16.mxu0 %v5814_v53  ;;  %4181 = vmatprep.subr.bf16.mxu1 %v6926_v4  ;;  %v7065_v53 = vld [vmem:[#allocation42_spill] sm:$0xff] }
 0x5ef   :  { %2583 = vmatprep.mubr.bf16.mxu0 %v6927_v12  ;;  %4195 = vmatprep.mubr.msk.bf16.mxu1 %vm4914_vm1, %v6926_v4 }
 0x5f1   :  { %2554 = vmatpush1.bf16.msra.mxu0 %v5821_v54  ;;  %4182 = vmatpush3.bf16.msra.mxu1 %v5824_v55  ;;  %v7066_v54 = vld [vmem:[#allocation43_spill] sm:$0xff]  ;;  %v7067_v55 = vld [vmem:[#allocation46_spill] sm:$0xff] }
 0x5f2   :  { %2555 = vmatprep.subr.bf16.mxu0 %v5827_v56  ;;  %4183 = vmatprep.subr.bf16.mxu1 %v6926_v4  ;;  %v7068_v56 = vld [vmem:[#allocation47_spill] sm:$0xff] }
 0x5f5   :  { %2556 = vmatpush1.bf16.msra.mxu0 %v5831_v57  ;;  %4184 = vmatpush3.bf16.msra.mxu1 %v5834_v58  ;;  %v7069_v57 = vld [vmem:[#allocation48_spill] sm:$0xff] }
 0x5f6   :  { %2557 = vmatprep.subr.bf16.mxu0 %v5837_v26  ;;  %4185 = vmatprep.subr.bf16.mxu1 %v6926_v4 }
 0x5f9   :  { %2558 = vmatpush1.bf16.msra.mxu0 %v5841_v27  ;;  %4186 = vmatpush3.bf16.msra.mxu1 %v7026_v63 }
 0x5fa   :  { %2559 = vmatprep.subr.bf16.mxu0 %v7027_v10  ;;  %4187 = vmatprep.subr.bf16.mxu1 %v6926_v4 }
 0x5fd   :  { %2560 = vmatpush1.bf16.msra.mxu0 %v7028_v23  ;;  %4188 = vmatpush3.bf16.msra.mxu1 %v7029_v2 }
 0x5fe   :  { %2561 = vmatprep.subr.bf16.mxu0 %v7060_v48  ;;  %4189 = vmatprep.subr.bf16.mxu1 %v6926_v4 }
 0x601   :  { %2562 = vmatpush1.bf16.msra.mxu0 %v7061_v50  ;;  %4190 = vmatpush3.bf16.msra.mxu1 %v7062_v42  ;;  %v7070_v42 = vld [vmem:[#allocation21_spill] sm:$0xff] }
 0x602   :  { %2563 = vmatprep.subr.bf16.mxu0 %v7063_v51  ;;  %4191 = vmatprep.subr.bf16.mxu1 %v6926_v4 }
 0x605   :  { %2564 = vmatpush1.bf16.msra.mxu0 %v7064_v52  ;;  %4192 = vmatpush3.bf16.msra.mxu1 %v7065_v53 }
 0x606   :  { %2565 = vmatprep.subr.bf16.mxu0 %v7066_v54  ;;  %4193 = vmatprep.subr.bf16.mxu1 %v6926_v4 }
 0x609   :  { %2566 = vmatpush1.bf16.msra.mxu0 %v7067_v55  ;;  %4194 = vmatpush3.bf16.msra.mxu1 %v7068_v56 }
 0x60a   :  { %2662 = vmatprep.subr.bf16.mxu0 %v7069_v57  ;;  %4199 = vmatprep.subr.bf16.mxu1 %v6926_v4 }
 0x66c   :  { %v2288_v58 = vpop.f32.mrf.mxu0  ;;  %v2329_v26 = vpop.f32.mrf.mxu1 }
 0x66e   :  { %v2290_v27 = vpop.f32.mrf.mxu0  ;;  %v4137_v63 = vpop.f32.mrf.mxu1 }
 0x670   :  { %v2292_v10 = vpop.f32.mrf.mxu0  ;;  %v2332_v23 = vpop.f32.mrf.mxu1 }
 0x672   :  { %v2293_v2 = vpop.f32.mrf.mxu0  ;;  %v4138_v19 = vpop.f32.mrf.mxu1 }
 0x68c   :  { %v2399_v48 = vpop.f32.mrf.mxu0  ;;  %v2440_v50 = vpop.f32.mrf.mxu1 }
 0x68d   :  { %v2400_v51 = vadd.f32 %v2399_v48, %v7070_v42 }
 0x68e   :  { %v2401_v52 = vpop.f32.mrf.mxu0  ;;  %v4157_v53 = vpop.f32.mrf.mxu1 }
 0x68f   :  { %v2446_v54 = vadd.f32 %v2400_v51, %v2288_v58  ;;  %v2402_v55 = vadd.f32 %v2401_v52, %v5536_v3  ;;  %v7071_v53 = vld [vmem:[#allocation63_spill] sm:$0xff] }
 0x690   :  { %v2403_v56 = vpop.f32.mrf.mxu0  ;;  %v2443_v57 = vpop.f32.mrf.mxu1 }
 0x691   :  { %v3609_v18 = vmul.f32 -1.442695, %v2446_v54  ;;  %v2453_v63 = vadd.f32 %v2402_v55, %v2290_v27  ;;  %v2460_v56 = vadd.f32 %v6071_v21, %v2329_v26  ;;  %v2441_v27 = vadd.f32 %v2440_v50, %v5547_v36 }
 0x692   :  { %v2404_v5 = vpop.f32.mrf.mxu0  ;;  %v4158_v15 = vpop.f32.mrf.mxu1 }
 0x693   :  { %4572 = vpow2.f32 %v3609_v18  ;;  %v3610_v10 = vmul.f32 -1.442695, %v2453_v63 }
 0x695   :  { %4574 = vpow2.f32 %v3610_v10 }
 0x6a0   :  { %v4573_v23 = vpop.eup %4572 }
 0x6a1   :  { %v2450_v2 = vadd.f32 1.0, %v4573_v23  ;;  %v7072_v23 = vld [vmem:[#allocation64_spill] sm:$0xff] }
 0x6a2   :  { %v4575_v19 = vpop.eup %4574 }
 0x6a3   :  { %4576 = vrcp.f32 %v2450_v2  ;;  %v2457_v45 = vadd.f32 1.0, %v4575_v19 }
 0x6a5   :  { %4578 = vrcp.f32 %v2457_v45 }
 0x6ac   :  { %v2503_v48 = vpop.f32.mrf.mxu0  ;;  %v2544_v42 = vpop.f32.mrf.mxu1 }
 0x6ad   :  { %v2639_v58 = vadd.f32 %v2503_v48, %v7071_v53 }
 0x6ae   :  { %v2505_v51 = vpop.f32.mrf.mxu0  ;;  %v4177_v52 = vpop.f32.mrf.mxu1 }
 0x6af   :  { %v3611_v54 = vmul.f32 -1.442695, %v2639_v58  ;;  %v2646_v2 = vadd.f32 %v2505_v51, %v7072_v23  ;;  %v6366_v23 = vld [vmem:[#allocation10 + $0x64] ss:$12 sps:$4 sm:$0xff]  }
 0x6b0   :  { %v4577_v5 = vpop.eup %4576  ;;  %v2507_v18 = vpop.f32.mrf.mxu0 }
 0x6b1   :  { %v2547_v15 = vpop.f32.mrf.mxu1  ;;  %v2461_v55 = vmul.f32 %v4577_v5, %v2460_v56  ;;  %4580 = vpow2.f32 %v3611_v54  ;;  %v3612_v19 = vmul.f32 -1.442695, %v2646_v2  ;;  %v6370_v2 = vld [vmem:[#allocation10 + $0x60] ss:$12 sps:$4 sm:$0xff]  }
 0x6b2   :  { %v2508_v57 = vpop.f32.mrf.mxu0  ;;  %v4579_v48 = vpop.eup %4578  ;;  %v6343_v15 = vld [vmem:[#allocation10 + $0x94] ss:$12 sps:$4 sm:$0xff]  }
 0x6b3   :  { %v4178_v63 = vpop.f32.mrf.mxu1  ;;  %v2462_v10 = vadd.f32 %v2461_v55, %v2441_v27  ;;  %v2464_v58 = vsub.f32 1.0, %v4579_v48  ;;  %v2466_v18 = vmul.f32 %v4579_v48, %v6077_v60  ;;  %v2653_v60 = vadd.f32 %v5918_v49, %v2544_v42  ;;  %v6340_v42 = vld [vmem:[#allocation10 + $0xb0] ss:$12 sps:$4 sm:$0xff]   ;;  %v6353_v55 = vld [vmem:[#allocation10 + $0x98] ss:$12 sps:$4 sm:$0xff]  }
 0x6b4   :  { %v6350_v27 = vld [vmem:[#allocation10 + $0x90] ss:$12 sps:$4 sm:$0xff]   ;;  %v6360_v63 = vld [vmem:[#allocation10 + $0x78] ss:$12 sps:$4 sm:$0xff]  }
 0x6b5   :  { %4582 = vtanh.f32 %v2462_v10  ;;  %v6356_v57 = vld [vmem:[#allocation10 + $0x7c] ss:$12 sps:$4 sm:$0xff]   ;;  %v6363_v10 = vld [vmem:[#allocation10 + $0x80] ss:$12 sps:$4 sm:$0xff]  }
 0x6b6   :  { %4584 = vpow2.f32 %v3612_v19  ;;  %v6373_v19 = vld [vmem:[#allocation10 + $0x68] ss:$12 sps:$4 sm:$0xff]   ;;  %v6376_v48 = vld [vmem:[#allocation10 + $0x4c] ss:$12 sps:$4 sm:$0xff]  }
 0x6b7   :  { %7085 = vst [vmem:[#allocation53_spill] sm:$0xff] %v6373_v19  ;;  %7086 = vst [vmem:[#allocation28_spill] sm:$0xff] %v6376_v48 }
 0x6be   :  { %v4581_v53 = vpop.eup %4580 }
 0x6bf   :  { %v2643_v26 = vadd.f32 1.0, %v4581_v53  ;;  %v6380_v53 = vld [vmem:[#allocation10 + $0x48] ss:$12 sps:$4 sm:$0xff]  }
 0x6c0   :  { %7087 = vst [vmem:[#allocation29_spill] sm:$0xff] %v6380_v53 }
 0x6c1   :  { %4586 = vrcp.f32 %v2643_v26  ;;  %v6383_v26 = vld [vmem:[#allocation10 + $0x50] ss:$12 sps:$4 sm:$0xff]  }
 0x6c2   :  { %v4583_v45 = vpop.eup %4582  ;;  %7088 = vst [vmem:[#allocation30_spill] sm:$0xff] %v6383_v26 }
 0x6c3   :  { %v2465_v52 = vmul.f32 %v4583_v45, %v2464_v58  ;;  %v4585_v54 = vpop.eup %4584  ;;  %v6386_v58 = vld [vmem:[#allocation10 + $0x34] ss:$12 sps:$4 sm:$0xff]   ;;  %v6390_v45 = vld [vmem:[#allocation10 + $0x30] ss:$12 sps:$4 sm:$0xff]  }
 0x6c4   :  { %v2650_v51 = vadd.f32 1.0, %v4585_v54  ;;  %7089 = vst [vmem:[#allocation31_spill] sm:$0xff] %v6386_v58  ;;  %7090 = vst [vmem:[#allocation32_spill] sm:$0xff] %v6390_v45  ;;  %v6403_v54 = vld [vmem:[#allocation10 + $0x20] ss:$12 sps:$4 sm:$0xff]  }
 0x6c5   :  { %v6250_v50 = vadd.f32 %v2466_v18, %v2465_v52  ;;  %v6393_v52 = vld [vmem:[#allocation10 + $0x38] ss:$12 sps:$4 sm:$0xff]   ;;  %v6396_v18 = vld [vmem:[#allocation10 + $0x1c] ss:$12 sps:$4 sm:$0xff]   ;;  %7094 = vst [vmem:[#allocation62_spill] sm:$0xff] %v6403_v54 }
 0x6c6   :  { %4588 = vrcp.f32 %v2650_v51  ;;  %7091 = vst [vmem:[#allocation33_spill] sm:$0xff] %v6393_v52  ;;  %7092 = vst [vmem:[#allocation57_spill] sm:$0xff] %v6396_v18  ;;  %v6406_v51 = vld [vmem:[#allocation10 + $0x4] ss:$12 sps:$4 sm:$0xff]  }
 0x6c7   :  { %v2550_v56 = vpack.c.bf16 %v6250_v50, %v6250_v50  ;;  %7095 = vst [vmem:[#allocation56_spill] sm:$0xff] %v6406_v51 }
 0x6c9   :  { %2584 = vmatmul.mubr.bf16.vlgmr.msra.gmra.mxu0 %v2550_v56  ;;  %4196 = vmatmul.mubr.bf16.vlgmr.msra.gmra.mxu1 %v2550_v56  ;;  %v6400_v56 = vld [vmem:[#allocation10 + $0x18] ss:$12 sps:$4 sm:$0xff]  }
 0x6ca   :  { %2663 = vmatpush1.bf16.msra.mxu0 %v5902_v62  ;;  %4200 = vmatpush3.bf16.msra.mxu1 %v5905_v29  ;;  %v7073_v29 = vld [vmem:[#allocation68_spill] sm:$0xff]  ;;  %7093 = vst [vmem:[#allocation58_spill] sm:$0xff] %v6400_v56 }
 0x6cb   :  { %2664 = vmatprep.subr.bf16.mxu0 %v5908_v30  ;;  %4201 = vmatprep.subr.bf16.mxu1 %v6926_v4 }
 0x6cc   :  { %2694 = vmatprep.mubr.bf16.mxu0 %v6927_v12  ;;  %4215 = vmatprep.mubr.msk.bf16.mxu1 %vm4914_vm1, %v6926_v4 }
 0x6ce   :  { %v4587_v5 = vpop.eup %4586  ;;  %2665 = vmatpush1.bf16.msra.mxu0 %v5921_v13  ;;  %4202 = vmatpush3.bf16.msra.mxu1 %v5924_v20 }
 0x6cf   :  { %v2654_v62 = vmul.f32 %v4587_v5, %v2653_v60  ;;  %2666 = vmatprep.subr.bf16.mxu0 %v5927_v6  ;;  %4203 = vmatprep.subr.bf16.mxu1 %v6926_v4  ;;  %v6410_v60 = vld [vmem:[#allocation10] ss:$12 sps:$4 sm:$0xff]   ;;  %v6413_v5 = vld [vmem:[#allocation10 + $0x8] ss:$12 sps:$4 sm:$0xff]  }
 0x6d0   :  { %7096 = vst [vmem:[#allocation34_spill] sm:$0xff] %v6410_v60  ;;  %7097 = vst [vmem:[#allocation35_spill] sm:$0xff] %v6413_v5 }
 0x6d1   :  { %v2655_v30 = vadd.f32 %v2654_v62, %v7073_v29  ;;  %v6416_v62 = vld [vmem:[#allocation8 + $0xac] ss:$12 sps:$4 sm:$0xff]  }
 0x6d2   :  { %2667 = vmatpush1.bf16.msra.mxu0 %v5932_v37  ;;  %4204 = vmatpush3.bf16.msra.mxu1 %v5935_v39  ;;  %7098 = vst [vmem:[#allocation36_spill] sm:$0xff] %v6416_v62 }
 0x6d3   :  { %4590 = vtanh.f32 %v2655_v30  ;;  %2668 = vmatprep.subr.bf16.mxu0 %v5938_v17  ;;  %4205 = vmatprep.subr.bf16.mxu1 %v6926_v4  ;;  %v4589_v49 = vpop.eup %4588 }
 0x6d4   :  { %v2657_v13 = vsub.f32 1.0, %v4589_v49  ;;  %v2659_v37 = vmul.f32 %v4589_v49, %v6115_v16  ;;  %v6337_v16 = vld [vmem:[#allocation10 + $0xa8] ss:$12 sps:$4 sm:$0xff]  }
 0x6d6   :  { %2669 = vmatpush1.bf16.msra.mxu0 %v5942_v22  ;;  %4206 = vmatpush3.bf16.msra.mxu1 %v5945_v8  ;;  %v7074_v22 = vld [vmem:[#allocation44_spill] sm:$0xff]  ;;  %v7075_v8 = vld [vmem:[#allocation45_spill] sm:$0xff] }
 0x6d7   :  { %2670 = vmatprep.subr.bf16.mxu0 %v5948_v41  ;;  %4207 = vmatprep.subr.bf16.mxu1 %v6926_v4  ;;  %v7076_v41 = vld [vmem:[#allocation20_spill] sm:$0xff] }
 0x6da   :  { %2671 = vmatpush1.bf16.msra.mxu0 %v5952_v38  ;;  %4208 = vmatpush3.bf16.msra.mxu1 %v7044_v1  ;;  %v7077_v38 = vld [vmem:[#allocation22_spill] sm:$0xff]  ;;  %v6324_v1 = vld [vmem:[#allocation5 + $0x20] ss:$12 sps:$4 sm:$0xff]  }
 0x6db   :  { %2672 = vmatprep.subr.bf16.mxu0 %v7045_v44  ;;  %4209 = vmatprep.subr.bf16.mxu1 %v6926_v4  ;;  %v7083_v44 = vld [vmem:[#allocation51_spill] sm:$0xff] }
 0x6de   :  { %2673 = vmatpush1.bf16.msra.mxu0 %v7046_v46  ;;  %4210 = vmatpush3.bf16.msra.mxu1 %v7047_v47  ;;  %v7084_v46 = vld [vmem:[#allocation52_spill] sm:$0xff] }
 0x6df   :  { %2674 = vmatprep.subr.bf16.mxu0 %v7048_v31  ;;  %4211 = vmatprep.subr.bf16.mxu1 %v6926_v4  ;;  %v6330_v47 = vld [vmem:[#allocation5 + $0x8] ss:$12 sps:$4 sm:$0xff]   ;;  %v6333_v31 = vld [vmem:[#allocation10 + $0xac] ss:$12 sps:$4 sm:$0xff]  }
 0x6e0   :  { %v4591_v20 = vpop.eup %4590 }
 0x6e1   :  { %v2658_v6 = vmul.f32 %v4591_v20, %v2657_v13 }
 0x6e2   :  { %2675 = vmatpush1.bf16.msra.mxu0 %v5973_v43  ;;  %4212 = vmatpush3.bf16.msra.mxu1 %v5976_v28  ;;  %v7078_v43 = vld [vmem:[#allocation24_spill] sm:$0xff]  ;;  %v7079_v28 = vld [vmem:[#allocation23_spill] sm:$0xff] }
 0x6e3   :  { %2676 = vmatprep.subr.bf16.mxu0 %v5979_v32  ;;  %4213 = vmatprep.subr.bf16.mxu1 %v6926_v4  ;;  %v6288_v39 = vadd.f32 %v2659_v37, %v2658_v6  ;;  %v7080_v32 = vld [vmem:[#allocation25_spill] sm:$0xff] }
 0x6e5   :  { %v2661_v17 = vpack.c.bf16 %v6288_v39, %v6288_v39 }
 0x6e6   :  { %2677 = vmatpush1.bf16.msra.mxu0 %v5987_v24  ;;  %4214 = vmatpush3.bf16.msra.mxu1 %v5990_v33  ;;  %v7081_v24 = vld [vmem:[#allocation26_spill] sm:$0xff]  ;;  %v7082_v33 = vld [vmem:[#allocation27_spill] sm:$0xff] }
 0x6e7   :  { %2766 = vmatprep.subr.bf16.mxu0 %v6123_v14  ;;  %4219 = vmatprep.subr.bf16.mxu1 %v6926_v4 }
 0x6e9   :  { %2695 = vmatmul.mubr.bf16.vlgmr.msra.gmra.mxu0 %v2661_v17  ;;  %4216 = vmatmul.mubr.bf16.vlgmr.msra.gmra.mxu1 %v2661_v17 }
 0x6ea   :  { %2767 = vmatpush1.bf16.msra.mxu0 %v6129_v11  ;;  %4220 = vmatpush3.bf16.msra.mxu1 %v6132_v59 }
 0x6eb   :  { %2768 = vmatprep.subr.bf16.mxu0 %v6135_v40  ;;  %4221 = vmatprep.subr.bf16.mxu1 %v6926_v4 }
 0x6ec   :  { %2798 = vmatprep.mubr.bf16.mxu0 %v6927_v12  ;;  %4235 = vmatprep.mubr.msk.bf16.mxu1 %vm4914_vm1, %v6926_v4 }
 0x6ee   :  { %2769 = vmatpush1.bf16.msra.mxu0 %v6142_v61  ;;  %4222 = vmatpush3.bf16.msra.mxu1 %v6145_v7 }
 0x6ef   :  { %2770 = vmatprep.subr.bf16.mxu0 %v6148_v0  ;;  %4223 = vmatprep.subr.bf16.mxu1 %v6926_v4 }
 0x6f2   :  { %2771 = vmatpush1.bf16.msra.mxu0 %v6152_v25  ;;  %4224 = vmatpush3.bf16.msra.mxu1 %v6155_v34 }
 0x6f3   :  { %2772 = vmatprep.subr.bf16.mxu0 %v7074_v22  ;;  %4225 = vmatprep.subr.bf16.mxu1 %v6926_v4 }
 0x6f6   :  { %2773 = vmatpush1.bf16.msra.mxu0 %v7075_v8  ;;  %4226 = vmatpush3.bf16.msra.mxu1 %v7076_v41 }
 0x6f7   :  { %2774 = vmatprep.subr.bf16.mxu0 %v7077_v38  ;;  %4227 = vmatprep.subr.bf16.mxu1 %v6926_v4 }
 0x6fa   :  { %2775 = vmatpush1.bf16.msra.mxu0 %v6172_v35  ;;  %4228 = vmatpush3.bf16.msra.mxu1 %v7078_v43 }
 0x6fb   :  { %2776 = vmatprep.subr.bf16.mxu0 %v7079_v28  ;;  %4229 = vmatprep.subr.bf16.mxu1 %v6926_v4 }
 0x6fe   :  { %2777 = vmatpush1.bf16.msra.mxu0 %v7080_v32  ;;  %4230 = vmatpush3.bf16.msra.mxu1 %v6185_v9 }
 0x6ff   :  { %2778 = vmatprep.subr.bf16.mxu0 %v7081_v24  ;;  %4231 = vmatprep.subr.bf16.mxu1 %v6926_v4 }
 0x702   :  { %2779 = vmatpush1.bf16.msra.mxu0 %v7082_v33  ;;  %4232 = vmatpush3.bf16.msra.mxu1 %v6324_v1 }
 0x703   :  { %2780 = vmatprep.subr.bf16.mxu0 %v7083_v44  ;;  %4233 = vmatprep.subr.bf16.mxu1 %v6926_v4 }
 0x706   :  { %2781 = vmatpush1.bf16.msra.mxu0 %v7084_v46  ;;  %4234 = vmatpush3.bf16.msra.mxu1 %v6330_v47 }
 0x707   :  { %2848 = vmatprep.subr.bf16.mxu0 %v6333_v31  ;;  %4239 = vmatprep.subr.bf16.mxu1 %v6926_v4 }
 0x709   :  { %2799 = vmatmul.mubr.bf16.vlgmr.msra.gmra.mxu0 %v2661_v17  ;;  %4236 = vmatmul.mubr.bf16.vlgmr.msra.gmra.mxu1 %v2661_v17 }
 0x70a   :  { %2849 = vmatpush1.bf16.msra.mxu0 %v6337_v16  ;;  %4240 = vmatpush3.bf16.msra.mxu1 %v6340_v42 }
 0x70b   :  { %2850 = vmatprep.subr.bf16.mxu0 %v6343_v15  ;;  %4241 = vmatprep.subr.bf16.mxu1 %v6926_v4 }
 0x70c   :  { %2880 = vmatprep.mubr.bf16.mxu0 %v6927_v12  ;;  %4255 = vmatprep.mubr.msk.bf16.mxu1 %vm4914_vm1, %v6926_v4 }
 0x70e   :  { %2851 = vmatpush1.bf16.msra.mxu0 %v6350_v27  ;;  %4242 = vmatpush3.bf16.msra.mxu1 %v6353_v55 }
 0x70f   :  { %2852 = vmatprep.subr.bf16.mxu0 %v6356_v57  ;;  %4243 = vmatprep.subr.bf16.mxu1 %v6926_v4 }
 0x712   :  { %2853 = vmatpush1.bf16.msra.mxu0 %v6360_v63  ;;  %4244 = vmatpush3.bf16.msra.mxu1 %v6363_v10 }
 0x713   :  { %2854 = vmatprep.subr.bf16.mxu0 %v6366_v23  ;;  %4245 = vmatprep.subr.bf16.mxu1 %v6926_v4 }
 0x716   :  { %2855 = vmatpush1.bf16.msra.mxu0 %v6370_v2  ;;  %4246 = vmatpush3.bf16.msra.mxu1 %v6373_v19 }
 0x717   :  { %2856 = vmatprep.subr.bf16.mxu0 %v6376_v48  ;;  %4247 = vmatprep.subr.bf16.mxu1 %v6926_v4 }
 0x71a   :  { %2857 = vmatpush1.bf16.msra.mxu0 %v6380_v53  ;;  %4248 = vmatpush3.bf16.msra.mxu1 %v6383_v26 }
 0x71b   :  { %2858 = vmatprep.subr.bf16.mxu0 %v6386_v58  ;;  %4249 = vmatprep.subr.bf16.mxu1 %v6926_v4 }
 0x71e   :  { %2859 = vmatpush1.bf16.msra.mxu0 %v6390_v45  ;;  %4250 = vmatpush3.bf16.msra.mxu1 %v6393_v52 }
 0x71f   :  { %2860 = vmatprep.subr.bf16.mxu0 %v6396_v18  ;;  %4251 = vmatprep.subr.bf16.mxu1 %v6926_v4 }
 0x722   :  { %2861 = vmatpush1.bf16.msra.mxu0 %v6400_v56  ;;  %4252 = vmatpush3.bf16.msra.mxu1 %v6403_v54  ;;  %v7099_v54 = vld [vmem:[#allocation21_spill] sm:$0xff] }
 0x723   :  { %2862 = vmatprep.subr.bf16.mxu0 %v6406_v51  ;;  %4253 = vmatprep.subr.bf16.mxu1 %v6926_v4 }
 0x726   :  { %2863 = vmatpush1.bf16.msra.mxu0 %v6410_v60  ;;  %4254 = vmatpush3.bf16.msra.mxu1 %v6413_v5 }
 0x727   :  { %2959 = vmatprep.subr.bf16.mxu0 %v6416_v62  ;;  %4259 = vmatprep.subr.bf16.mxu1 %v6926_v4 }
 0x789   :  { %v2585_v29 = vpop.f32.mrf.mxu0  ;;  %v2626_v30 = vpop.f32.mrf.mxu1 }
 0x78b   :  { %v2587_v49 = vpop.f32.mrf.mxu0  ;;  %v4197_v13 = vpop.f32.mrf.mxu1 }
 0x78d   :  { %v2589_v20 = vpop.f32.mrf.mxu0  ;;  %v2629_v6 = vpop.f32.mrf.mxu1 }
 0x78f   :  { %v2590_v37 = vpop.f32.mrf.mxu0  ;;  %v4198_v17 = vpop.f32.mrf.mxu1 }
 0x7a9   :  { %v2696_v51 = vpop.f32.mrf.mxu0  ;;  %v2737_v60 = vpop.f32.mrf.mxu1 }
 0x7aa   :  { %v2697_v56 = vadd.f32 %v2696_v51, %v7099_v54 }
 0x7ab   :  { %v2698_v18 = vpop.f32.mrf.mxu0  ;;  %v4217_v5 = vpop.f32.mrf.mxu1 }
 0x7ac   :  { %v2743_v52 = vadd.f32 %v2697_v56, %v2585_v29  ;;  %v2699_v45 = vadd.f32 %v2698_v18, %v5536_v3  ;;  %v7100_v5 = vld [vmem:[#allocation66_spill] sm:$0xff] }
 0x7ad   :  { %v2700_v62 = vpop.f32.mrf.mxu0  ;;  %v2740_v58 = vpop.f32.mrf.mxu1 }
 0x7ae   :  { %v3613_v26 = vmul.f32 -1.442695, %v2743_v52  ;;  %v2750_v13 = vadd.f32 %v2699_v45, %v2587_v49  ;;  %v2757_v58 = vadd.f32 %v6071_v21, %v2626_v30  ;;  %v2738_v45 = vadd.f32 %v2737_v60, %v5547_v36 }
 0x7af   :  { %v2701_v53 = vpop.f32.mrf.mxu0  ;;  %v4218_v48 = vpop.f32.mrf.mxu1 }
 0x7b0   :  { %4592 = vpow2.f32 %v3613_v26  ;;  %v3614_v20 = vmul.f32 -1.442695, %v2750_v13 }
 0x7b2   :  { %4594 = vpow2.f32 %v3614_v20 }
 0x7bd   :  { %v4593_v6 = vpop.eup %4592 }
 0x7be   :  { %v2747_v37 = vadd.f32 1.0, %v4593_v6  ;;  %v7101_v6 = vld [vmem:[#allocation67_spill] sm:$0xff] }
 0x7bf   :  { %v4595_v17 = vpop.eup %4594 }
 0x7c0   :  { %4596 = vrcp.f32 %v2747_v37  ;;  %v2754_v19 = vadd.f32 1.0, %v4595_v17 }
 0x7c2   :  { %4598 = vrcp.f32 %v2754_v19 }
 0x7c9   :  { %v2800_v51 = vpop.f32.mrf.mxu0  ;;  %v2841_v54 = vpop.f32.mrf.mxu1 }
 0x7ca   :  { %v2936_v56 = vadd.f32 %v2800_v51, %v7100_v5 }
 0x7cb   :  { %v2802_v29 = vpop.f32.mrf.mxu0  ;;  %v4237_v18 = vpop.f32.mrf.mxu1 }
 0x7cc   :  { %v3615_v52 = vmul.f32 -1.442695, %v2936_v56  ;;  %v2943_v37 = vadd.f32 %v2802_v29, %v7101_v6  ;;  %v6431_v29 = vld [vmem:[#allocation8 + $0xa8] ss:$12 sps:$4 sm:$0xff]  }
 0x7cd   :  { %v4597_v53 = vpop.eup %4596  ;;  %v2804_v48 = vpop.f32.mrf.mxu0  ;;  %v6456_v6 = vld [vmem:[#allocation8 + $0x7c] ss:$12 sps:$4 sm:$0xff]  }
 0x7ce   :  { %v2844_v26 = vpop.f32.mrf.mxu1  ;;  %v2758_v62 = vmul.f32 %v4597_v53, %v2757_v58  ;;  %4600 = vpow2.f32 %v3615_v52  ;;  %v3616_v17 = vmul.f32 -1.442695, %v2943_v37  ;;  %v6434_v53 = vld [vmem:[#allocation8 + $0xb0] ss:$12 sps:$4 sm:$0xff]   ;;  %v7102_v37 = vld [vmem:[#allocation71_spill] sm:$0xff] }
 0x7cf   :  { %v2805_v49 = vpop.f32.mrf.mxu0  ;;  %v4599_v51 = vpop.eup %4598  ;;  %v6437_v26 = vld [vmem:[#allocation8 + $0x94] ss:$12 sps:$4 sm:$0xff]  }
 0x7d0   :  { %v4238_v13 = vpop.f32.mrf.mxu1  ;;  %v2759_v20 = vadd.f32 %v2758_v62, %v2738_v45  ;;  %v2761_v30 = vsub.f32 1.0, %v4599_v51  ;;  %v2763_v18 = vmul.f32 %v4599_v51, %v6250_v50  ;;  %v6447_v50 = vld [vmem:[%s6680_s4] ss:$0 sm:$0xff]  ;;  %v6450_v49 = vld [vmem:[#allocation8 + $0x90] ss:$12 sps:$4 sm:$0xff]  }
 0x7d1   :  { %v2950_v45 = vadd.f32 %v6447_v50, %v2841_v54  ;;  %v6453_v13 = vld [vmem:[#allocation8 + $0x98] ss:$12 sps:$4 sm:$0xff]   ;;  %v6464_v51 = vld [vmem:[#allocation8 + $0x80] ss:$12 sps:$4 sm:$0xff]  }
 0x7d2   :  { %4602 = vtanh.f32 %v2759_v20  ;;  %v6461_v54 = vld [vmem:[#allocation8 + $0x78] ss:$12 sps:$4 sm:$0xff]  }
 0x7d3   :  { %4604 = vpow2.f32 %v3616_v17 }
 0x7db   :  { %v4601_v5 = vpop.eup %4600 }
 0x7dc   :  { %v2940_v21 = vadd.f32 1.0, %v4601_v5  ;;  %v6467_v5 = vld [vmem:[#allocation8 + $0x64] ss:$12 sps:$4 sm:$0xff]  }
 0x7de   :  { %4606 = vrcp.f32 %v2940_v21  ;;  %v6471_v21 = vld [vmem:[#allocation8 + $0x60] ss:$12 sps:$4 sm:$0xff]  }
 0x7df   :  { %v4603_v19 = vpop.eup %4602 }
 0x7e0   :  { %v2762_v56 = vmul.f32 %v4603_v19, %v2761_v30  ;;  %v4605_v52 = vpop.eup %4604  ;;  %v6474_v30 = vld [vmem:[#allocation8 + $0x68] ss:$12 sps:$4 sm:$0xff]   ;;  %v6477_v19 = vld [vmem:[#allocation8 + $0x4c] ss:$12 sps:$4 sm:$0xff]  }
 0x7e1   :  { %v2947_v48 = vadd.f32 1.0, %v4605_v52 }
 0x7e2   :  { %v6427_v60 = vadd.f32 %v2763_v18, %v2762_v56  ;;  %v6481_v56 = vld [vmem:[#allocation8 + $0x48] ss:$12 sps:$4 sm:$0xff]   ;;  %v6484_v18 = vld [vmem:[#allocation8 + $0x50] ss:$12 sps:$4 sm:$0xff]  }
 0x7e3   :  { %4608 = vrcp.f32 %v2947_v48  ;;  %7103 = vst [vmem:[#allocation60_spill] sm:$0xff] %v6484_v18  ;;  %v6491_v48 = vld [vmem:[#allocation8 + $0x30] ss:$12 sps:$4 sm:$0xff]  }
 0x7e4   :  { %v2847_v58 = vpack.c.bf16 %v6427_v60, %v6427_v60  ;;  %7105 = vst [vmem:[#allocation65_spill] sm:$0xff] %v6491_v48 }
 0x7e6   :  { %2881 = vmatmul.mubr.bf16.vlgmr.msra.gmra.mxu0 %v2847_v58  ;;  %4256 = vmatmul.mubr.bf16.vlgmr.msra.gmra.mxu1 %v2847_v58  ;;  %v6487_v58 = vld [vmem:[#allocation8 + $0x34] ss:$12 sps:$4 sm:$0xff]  }
 0x7e7   :  { %2960 = vmatpush1.bf16.msra.mxu0 %v6431_v29  ;;  %4260 = vmatpush3.bf16.msra.mxu1 %v6434_v53  ;;  %7104 = vst [vmem:[#allocation61_spill] sm:$0xff] %v6487_v58 }
 0x7e8   :  { %2961 = vmatprep.subr.bf16.mxu0 %v6437_v26  ;;  %4261 = vmatprep.subr.bf16.mxu1 %v6926_v4 }
 0x7e9   :  { %2991 = vmatprep.mubr.bf16.mxu0 %v6927_v12  ;;  %4275 = vmatprep.mubr.msk.bf16.mxu1 %vm4914_vm1, %v6926_v4 }
 0x7eb   :  { %v4607_v62 = vpop.eup %4606  ;;  %2962 = vmatpush1.bf16.msra.mxu0 %v6450_v49  ;;  %4262 = vmatpush3.bf16.msra.mxu1 %v6453_v13 }
 0x7ec   :  { %v2951_v20 = vmul.f32 %v4607_v62, %v2950_v45  ;;  %2963 = vmatprep.subr.bf16.mxu0 %v6456_v6  ;;  %4263 = vmatprep.subr.bf16.mxu1 %v6926_v4  ;;  %v6494_v45 = vld [vmem:[#allocation8 + $0x38] ss:$12 sps:$4 sm:$0xff]   ;;  %v6497_v62 = vld [vmem:[#allocation8 + $0x1c] ss:$12 sps:$4 sm:$0xff]  }
 0x7ed   :  { %7106 = vst [vmem:[#allocation49_spill] sm:$0xff] %v6494_v45  ;;  %7107 = vst [vmem:[#allocation50_spill] sm:$0xff] %v6497_v62 }
 0x7ee   :  { %v2952_v17 = vadd.f32 %v2951_v20, %v7102_v37 }
 0x7ef   :  { %2964 = vmatpush1.bf16.msra.mxu0 %v6461_v54  ;;  %4264 = vmatpush3.bf16.msra.mxu1 %v6464_v51 }
 0x7f0   :  { %4610 = vtanh.f32 %v2952_v17  ;;  %2965 = vmatprep.subr.bf16.mxu0 %v6467_v5  ;;  %4265 = vmatprep.subr.bf16.mxu1 %v6926_v4  ;;  %v4609_v52 = vpop.eup %4608 }
 0x7f1   :  { %v2954_v20 = vsub.f32 1.0, %v4609_v52 }
 0x7f3   :  { %2966 = vmatpush1.bf16.msra.mxu0 %v6471_v21  ;;  %4266 = vmatpush3.bf16.msra.mxu1 %v6474_v30 }
 0x7f4   :  { %2967 = vmatprep.subr.bf16.mxu0 %v6477_v19  ;;  %4267 = vmatprep.subr.bf16.mxu1 %v6926_v4 }
 0x7f7   :  { %2968 = vmatpush1.bf16.msra.mxu0 %v6481_v56  ;;  %4268 = vmatpush3.bf16.msra.mxu1 %v6484_v18  ;;  %v6502_v18 = vld [vmem:[#allocation8 + $0x18] ss:$12 sps:$4 sm:$0xff]  }
 0x7f8   :  { %2969 = vmatprep.subr.bf16.mxu0 %v6487_v58  ;;  %4269 = vmatprep.subr.bf16.mxu1 %v6926_v4  ;;  %v2956_v58 = vmul.f32 %v4609_v52, %v6288_v39  ;;  %v6516_v39 = vld [vmem:[#allocation8] ss:$12 sps:$4 sm:$0xff]   ;;  %v6519_v52 = vld [vmem:[#allocation8 + $0x8] ss:$12 sps:$4 sm:$0xff]  }
 0x7fb   :  { %2970 = vmatpush1.bf16.msra.mxu0 %v6491_v48  ;;  %4270 = vmatpush3.bf16.msra.mxu1 %v6494_v45  ;;  %v6505_v48 = vld [vmem:[#allocation8 + $0x20] ss:$12 sps:$4 sm:$0xff]   ;;  %v6508_v45 = vld [vmem:[#allocation8 + $0x4] ss:$12 sps:$4 sm:$0xff]  }
 0x7fc   :  { %2971 = vmatprep.subr.bf16.mxu0 %v6497_v62  ;;  %4271 = vmatprep.subr.bf16.mxu1 %v6926_v4 }
 0x7fd   :  { %v4611_v37 = vpop.eup %4610 }
 0x7fe   :  { %v2955_v17 = vmul.f32 %v4611_v37, %v2954_v20 }
 0x7ff   :  { %2972 = vmatpush1.bf16.msra.mxu0 %v6502_v18  ;;  %4272 = vmatpush3.bf16.msra.mxu1 %v6505_v48 }
 0x800   :  { %2973 = vmatprep.subr.bf16.mxu0 %v6508_v45  ;;  %4273 = vmatprep.subr.bf16.mxu1 %v6926_v4  ;;  %v6512_v62 = vadd.f32 %v2956_v58, %v2955_v17 }
 0x802   :  { %v2958_v20 = vpack.c.bf16 %v6512_v62, %v6512_v62 }
 0x803   :  { %2974 = vmatpush1.bf16.msra.mxu0 %v6516_v39  ;;  %4274 = vmatpush3.bf16.msra.mxu1 %v6519_v52 }
 0x804   :  { %3063 = vmatprep.subr.bf16.mxu0 %v6123_v14  ;;  %4279 = vmatprep.subr.bf16.mxu1 %v6926_v4  ;;  %v7108_v14 = vld [vmem:[#allocation53_spill] sm:$0xff] }
 0x806   :  { %2992 = vmatmul.mubr.bf16.vlgmr.msra.gmra.mxu0 %v2958_v20  ;;  %4276 = vmatmul.mubr.bf16.vlgmr.msra.gmra.mxu1 %v2958_v20 }
 0x807   :  { %3064 = vmatpush1.bf16.msra.mxu0 %v6129_v11  ;;  %4280 = vmatpush3.bf16.msra.mxu1 %v6132_v59  ;;  %v7109_v11 = vld [vmem:[#allocation28_spill] sm:$0xff]  ;;  %v7110_v59 = vld [vmem:[#allocation29_spill] sm:$0xff] }
 0x808   :  { %3065 = vmatprep.subr.bf16.mxu0 %v6135_v40  ;;  %4281 = vmatprep.subr.bf16.mxu1 %v6926_v4  ;;  %v7111_v40 = vld [vmem:[#allocation30_spill] sm:$0xff] }
 0x809   :  { %3095 = vmatprep.mubr.bf16.mxu0 %v6927_v12  ;;  %4295 = vmatprep.mubr.msk.bf16.mxu1 %vm4914_vm1, %v6926_v4 }
 0x80b   :  { %3066 = vmatpush1.bf16.msra.mxu0 %v6142_v61  ;;  %4282 = vmatpush3.bf16.msra.mxu1 %v6145_v7  ;;  %v7112_v61 = vld [vmem:[#allocation31_spill] sm:$0xff]  ;;  %v7113_v7 = vld [vmem:[#allocation32_spill] sm:$0xff] }
 0x80c   :  { %3067 = vmatprep.subr.bf16.mxu0 %v6148_v0  ;;  %4283 = vmatprep.subr.bf16.mxu1 %v6926_v4  ;;  %v7114_v0 = vld [vmem:[#allocation33_spill] sm:$0xff] }
 0x80f   :  { %3068 = vmatpush1.bf16.msra.mxu0 %v6152_v25  ;;  %4284 = vmatpush3.bf16.msra.mxu1 %v6155_v34  ;;  %v7115_v25 = vld [vmem:[#allocation57_spill] sm:$0xff]  ;;  %v7116_v34 = vld [vmem:[#allocation58_spill] sm:$0xff] }
 0x810   :  { %3069 = vmatprep.subr.bf16.mxu0 %v7074_v22  ;;  %4285 = vmatprep.subr.bf16.mxu1 %v6926_v4  ;;  %v7119_v22 = vld [vmem:[#allocation34_spill] sm:$0xff] }
 0x813   :  { %3070 = vmatpush1.bf16.msra.mxu0 %v7075_v8  ;;  %4286 = vmatpush3.bf16.msra.mxu1 %v7076_v41  ;;  %v7120_v8 = vld [vmem:[#allocation35_spill] sm:$0xff]  ;;  %v7121_v41 = vld [vmem:[#allocation36_spill] sm:$0xff] }
 0x814   :  { %3071 = vmatprep.subr.bf16.mxu0 %v7077_v38  ;;  %4287 = vmatprep.subr.bf16.mxu1 %v6926_v4 }
 0x817   :  { %3072 = vmatpush1.bf16.msra.mxu0 %v6172_v35  ;;  %4288 = vmatpush3.bf16.msra.mxu1 %v7078_v43  ;;  %v7118_v35 = vld [vmem:[#allocation56_spill] sm:$0xff] }
 0x818   :  { %3073 = vmatprep.subr.bf16.mxu0 %v7079_v28  ;;  %4289 = vmatprep.subr.bf16.mxu1 %v6926_v4 }
 0x81b   :  { %3074 = vmatpush1.bf16.msra.mxu0 %v7080_v32  ;;  %4290 = vmatpush3.bf16.msra.mxu1 %v6185_v9  ;;  %v7117_v9 = vld [vmem:[#allocation62_spill] sm:$0xff] }
 0x81c   :  { %3075 = vmatprep.subr.bf16.mxu0 %v7081_v24  ;;  %4291 = vmatprep.subr.bf16.mxu1 %v6926_v4 }
 0x81f   :  { %3076 = vmatpush1.bf16.msra.mxu0 %v7082_v33  ;;  %4292 = vmatpush3.bf16.msra.mxu1 %v6324_v1 }
 0x820   :  { %3077 = vmatprep.subr.bf16.mxu0 %v7083_v44  ;;  %4293 = vmatprep.subr.bf16.mxu1 %v6926_v4 }
 0x823   :  { %3078 = vmatpush1.bf16.msra.mxu0 %v7084_v46  ;;  %4294 = vmatpush3.bf16.msra.mxu1 %v6330_v47 }
 0x824   :  { %3145 = vmatprep.subr.bf16.mxu0 %v6333_v31  ;;  %4299 = vmatprep.subr.bf16.mxu1 %v6926_v4  ;;  %v7122_v31 = vld [vmem:[#allocation21_spill] sm:$0xff] }
 0x826   :  { %3096 = vmatmul.mubr.bf16.vlgmr.msra.gmra.mxu0 %v2958_v20  ;;  %4296 = vmatmul.mubr.bf16.vlgmr.msra.gmra.mxu1 %v2958_v20 }
 0x827   :  { %3146 = vmatpush1.bf16.msra.mxu0 %v6337_v16  ;;  %4300 = vmatpush3.bf16.msra.mxu1 %v6340_v42 }
 0x828   :  { %3147 = vmatprep.subr.bf16.mxu0 %v6343_v15  ;;  %4301 = vmatprep.subr.bf16.mxu1 %v6926_v4 }
 0x829   :  { %3177 = vmatprep.mubr.bf16.mxu0 %v6927_v12  ;;  %4315 = vmatprep.mubr.msk.bf16.mxu1 %vm4914_vm1, %v6926_v4 }
 0x82b   :  { %3148 = vmatpush1.bf16.msra.mxu0 %v6350_v27  ;;  %4302 = vmatpush3.bf16.msra.mxu1 %v6353_v55 }
 0x82c   :  { %3149 = vmatprep.subr.bf16.mxu0 %v6356_v57  ;;  %4303 = vmatprep.subr.bf16.mxu1 %v6926_v4 }
 0x82f   :  { %3150 = vmatpush1.bf16.msra.mxu0 %v6360_v63  ;;  %4304 = vmatpush3.bf16.msra.mxu1 %v6363_v10 }
 0x830   :  { %3151 = vmatprep.subr.bf16.mxu0 %v6366_v23  ;;  %4305 = vmatprep.subr.bf16.mxu1 %v6926_v4 }
 0x833   :  { %3152 = vmatpush1.bf16.msra.mxu0 %v6370_v2  ;;  %4306 = vmatpush3.bf16.msra.mxu1 %v7108_v14 }
 0x834   :  { %3153 = vmatprep.subr.bf16.mxu0 %v7109_v11  ;;  %4307 = vmatprep.subr.bf16.mxu1 %v6926_v4 }
 0x837   :  { %3154 = vmatpush1.bf16.msra.mxu0 %v7110_v59  ;;  %4308 = vmatpush3.bf16.msra.mxu1 %v7111_v40 }
 0x838   :  { %3155 = vmatprep.subr.bf16.mxu0 %v7112_v61  ;;  %4309 = vmatprep.subr.bf16.mxu1 %v6926_v4  ;;  %v7123_v61 = vld [vmem:[#allocation69_spill] sm:$0xff] }
 0x83b   :  { %3156 = vmatpush1.bf16.msra.mxu0 %v7113_v7  ;;  %4310 = vmatpush3.bf16.msra.mxu1 %v7114_v0 }
 0x83c   :  { %3157 = vmatprep.subr.bf16.mxu0 %v7115_v25  ;;  %4311 = vmatprep.subr.bf16.mxu1 %v6926_v4 }
 0x83f   :  { %3158 = vmatpush1.bf16.msra.mxu0 %v7116_v34  ;;  %4312 = vmatpush3.bf16.msra.mxu1 %v7117_v9  ;;  %v6600_v34 = vld [vmem:[%s6684_s8] ss:$0 sm:$0xff] }
 0x840   :  { %3159 = vmatprep.subr.bf16.mxu0 %v7118_v35  ;;  %4313 = vmatprep.subr.bf16.mxu1 %v6926_v4 }
 0x843   :  { %3160 = vmatpush1.bf16.msra.mxu0 %v7119_v22  ;;  %4314 = vmatpush3.bf16.msra.mxu1 %v7120_v8 }
 0x844   :  { %3256 = vmatprep.subr.bf16.mxu0 %v7121_v41  ;;  %4319 = vmatprep.subr.bf16.mxu1 %v6926_v4 }
 0x8a6   :  { %v2882_v38 = vpop.f32.mrf.mxu0  ;;  %v2923_v43 = vpop.f32.mrf.mxu1 }
 0x8a7   :  { %v3054_v9 = vadd.f32 %v6600_v34, %v2923_v43 }
 0x8a8   :  { %v2884_v28 = vpop.f32.mrf.mxu0  ;;  %v4257_v32 = vpop.f32.mrf.mxu1 }
 0x8aa   :  { %v2886_v24 = vpop.f32.mrf.mxu0  ;;  %v2926_v33 = vpop.f32.mrf.mxu1 }
 0x8ac   :  { %v2887_v1 = vpop.f32.mrf.mxu0  ;;  %v4258_v44 = vpop.f32.mrf.mxu1 }
 0x8ad   :  { %v7124_v1 = vld [vmem:[#allocation70_spill] sm:$0xff] }
 0x8c6   :  { %v2993_v46 = vpop.f32.mrf.mxu0  ;;  %v3034_v47 = vpop.f32.mrf.mxu1 }
 0x8c7   :  { %v2994_v16 = vadd.f32 %v2993_v46, %v7122_v31 }
 0x8c8   :  { %v2995_v42 = vpop.f32.mrf.mxu0  ;;  %v4277_v15 = vpop.f32.mrf.mxu1 }
 0x8c9   :  { %v3040_v27 = vadd.f32 %v2994_v16, %v2882_v38  ;;  %v2996_v55 = vadd.f32 %v2995_v42, %v5536_v3  ;;  %v3035_v38 = vadd.f32 %v3034_v47, %v5547_v36 }
 0x8ca   :  { %v2997_v57 = vpop.f32.mrf.mxu0  ;;  %v3037_v63 = vpop.f32.mrf.mxu1 }
 0x8cb   :  { %v3617_v10 = vmul.f32 -1.442695, %v3040_v27  ;;  %v3047_v58 = vadd.f32 %v2996_v55, %v2884_v28 }
 0x8cc   :  { %v2998_v23 = vpop.f32.mrf.mxu0  ;;  %v4278_v2 = vpop.f32.mrf.mxu1 }
 0x8cd   :  { %4612 = vpow2.f32 %v3617_v10  ;;  %v3618_v37 = vmul.f32 -1.442695, %v3047_v58  ;;  %v3378_v58 = vld [vmem:[#allocation11 + $0x48] sm:$0xff] }
 0x8cf   :  { %4614 = vpow2.f32 %v3618_v37  ;;  %v3377_v37 = vld [vmem:[#allocation11 + $0x40] sm:$0xff] }
 0x8da   :  { %v4613_v17 = vpop.eup %4612 }
 0x8db   :  { %v3044_v20 = vadd.f32 1.0, %v4613_v17  ;;  %v3376_v17 = vld [vmem:[#allocation11 + $0x38] sm:$0xff] }
 0x8dc   :  { %v4615_v14 = vpop.eup %4614 }
 0x8dd   :  { %4616 = vrcp.f32 %v3044_v20  ;;  %v3051_v11 = vadd.f32 1.0, %v4615_v14  ;;  %v3375_v20 = vld [vmem:[#allocation11 + $0x30] sm:$0xff]  ;;  %v3374_v14 = vld [vmem:[#allocation11 + $0x28] sm:$0xff] }
 0x8df   :  { %4618 = vrcp.f32 %v3051_v11  ;;  %v3373_v11 = vld [vmem:[#allocation11 + $0x20] sm:$0xff] }
 0x8e6   :  { %v3097_v59 = vpop.f32.mrf.mxu0  ;;  %v3138_v40 = vpop.f32.mrf.mxu1 }
 0x8e7   :  { %v3233_v7 = vadd.f32 %v3097_v59, %v7123_v61  ;;  %v3372_v59 = vld [vmem:[#allocation11 + $0x18] sm:$0xff]  ;;  %v3370_v61 = vld [vmem:[#allocation11 + $0x8] sm:$0xff] }
 0x8e8   :  { %v3099_v0 = vpop.f32.mrf.mxu0  ;;  %v4297_v25 = vpop.f32.mrf.mxu1 }
 0x8e9   :  { %v3619_v35 = vmul.f32 -1.442695, %v3233_v7  ;;  %v3240_v44 = vadd.f32 %v3099_v0, %v7124_v1  ;;  %v3369_v7 = vld [vmem:[#allocation11] sm:$0xff] }
 0x8ea   :  { %v4617_v22 = vpop.eup %4616  ;;  %v3101_v8 = vpop.f32.mrf.mxu0 }
 0x8eb   :  { %v3141_v41 = vpop.f32.mrf.mxu1  ;;  %v3055_v28 = vmul.f32 %v4617_v22, %v3054_v9  ;;  %4620 = vpow2.f32 %v3619_v35  ;;  %v3620_v46 = vmul.f32 -1.442695, %v3240_v44 }
 0x8ec   :  { %v3102_v32 = vpop.f32.mrf.mxu0  ;;  %v4619_v16 = vpop.eup %4618 }
 0x8ed   :  { %v4298_v24 = vpop.f32.mrf.mxu1  ;;  %v3056_v33 = vadd.f32 %v3055_v28, %v3035_v38  ;;  %v3058_v15 = vsub.f32 1.0, %v4619_v16  ;;  %v3060_v57 = vmul.f32 %v4619_v16, %v6427_v60  ;;  %v3247_v60 = vadd.f32 %v6447_v50, %v3138_v40  ;;  %v7127_v50 = vld [vmem:[#allocation61_spill] sm:$0xff] }
 0x8ee   :  { %v3371_v40 = vld [vmem:[#allocation11 + $0x10] sm:$0xff] }
 0x8ef   :  { %4622 = vtanh.f32 %v3056_v33 }
 0x8f0   :  { %4624 = vpow2.f32 %v3620_v46 }
 0x8f8   :  { %v4621_v42 = vpop.eup %4620 }
 0x8f9   :  { %v3237_v43 = vadd.f32 1.0, %v4621_v42 }
 0x8fb   :  { %4626 = vrcp.f32 %v3237_v43 }
 0x8fc   :  { %v4623_v27 = vpop.eup %4622 }
 0x8fd   :  { %v3059_v55 = vmul.f32 %v4623_v27, %v3058_v15  ;;  %v4625_v10 = vpop.eup %4624 }
 0x8fe   :  { %v3244_v23 = vadd.f32 1.0, %v4625_v10 }
 0x8ff   :  { %v6606_v47 = vadd.f32 %v3060_v57, %v3059_v55 }
 0x900   :  { %4628 = vrcp.f32 %v3244_v23 }
 0x901   :  { %v3144_v63 = vpack.c.bf16 %v6606_v47, %v6606_v47 }
 0x903   :  { %3178 = vmatmul.mubr.bf16.vlgmr.msra.gmra.mxu0 %v3144_v63  ;;  %4316 = vmatmul.mubr.bf16.vlgmr.msra.gmra.mxu1 %v3144_v63 }
 0x904   :  { %3257 = vmatpush1.bf16.msra.mxu0 %v6431_v29  ;;  %4320 = vmatpush3.bf16.msra.mxu1 %v6434_v53  ;;  %v7125_v53 = vld [vmem:[#allocation72_spill] sm:$0xff] }
 0x905   :  { %3258 = vmatprep.subr.bf16.mxu0 %v6437_v26  ;;  %4321 = vmatprep.subr.bf16.mxu1 %v6926_v4 }
 0x906   :  { %3288 = vmatprep.mubr.bf16.mxu0 %v6927_v12  ;;  %4335 = vmatprep.mubr.msk.bf16.mxu1 %vm4914_vm1, %v6926_v4  ;;  %v7126_v12 = vld [vmem:[#allocation60_spill] sm:$0xff] }
 0x908   :  { %v4627_v2 = vpop.eup %4626  ;;  %3259 = vmatpush1.bf16.msra.mxu0 %v6450_v49  ;;  %4322 = vmatpush3.bf16.msra.mxu1 %v6453_v13  ;;  %v7128_v13 = vld [vmem:[#allocation65_spill] sm:$0xff] }
 0x909   :  { %v3248_v29 = vmul.f32 %v4627_v2, %v3247_v60  ;;  %3260 = vmatprep.subr.bf16.mxu0 %v6456_v6  ;;  %4323 = vmatprep.subr.bf16.mxu1 %v6926_v4  ;;  %v7129_v6 = vld [vmem:[#allocation49_spill] sm:$0xff] }
 0x90b   :  { %v3249_v26 = vadd.f32 %v3248_v29, %v7125_v53 }
 0x90c   :  { %3261 = vmatpush1.bf16.msra.mxu0 %v6461_v54  ;;  %4324 = vmatpush3.bf16.msra.mxu1 %v6464_v51  ;;  %v7130_v54 = vld [vmem:[#allocation50_spill] sm:$0xff] }
 0x90d   :  { %4630 = vtanh.f32 %v3249_v26  ;;  %3262 = vmatprep.subr.bf16.mxu0 %v6467_v5  ;;  %4325 = vmatprep.subr.bf16.mxu1 %v6926_v4  ;;  %v4629_v49 = vpop.eup %4628 }
 0x90e   :  { %v3251_v51 = vsub.f32 1.0, %v4629_v49 }
 0x910   :  { %3263 = vmatpush1.bf16.msra.mxu0 %v6471_v21  ;;  %4326 = vmatpush3.bf16.msra.mxu1 %v6474_v30  ;;  %v3253_v30 = vmul.f32 %v4629_v49, %v6512_v62  ;;  %v3383_v62 = vld [vmem:[#allocation11 + $0x70] sm:$0xff] }
 0x911   :  { %3264 = vmatprep.subr.bf16.mxu0 %v6477_v19  ;;  %4327 = vmatprep.subr.bf16.mxu1 %v6926_v4 }
 0x914   :  { %3265 = vmatpush1.bf16.msra.mxu0 %v6481_v56  ;;  %4328 = vmatpush3.bf16.msra.mxu1 %v7126_v12 }
 0x915   :  { %3266 = vmatprep.subr.bf16.mxu0 %v7127_v50  ;;  %4329 = vmatprep.subr.bf16.mxu1 %v6926_v4 }
 0x918   :  { %3267 = vmatpush1.bf16.msra.mxu0 %v7128_v13  ;;  %4330 = vmatpush3.bf16.msra.mxu1 %v7129_v6  ;;  %v7131_v13 = vld [vmem:[#allocation73_spill] sm:$0xff] }
 0x919   :  { %3268 = vmatprep.subr.bf16.mxu0 %v7130_v54  ;;  %4331 = vmatprep.subr.bf16.mxu1 %v6926_v4  ;;  %v3360_v6 = vmul.f32 0.125, %v7131_v13 }
 0x91a   :  { %v4631_v5 = vpop.eup %4630 }
 0x91b   :  { %v3252_v21 = vmul.f32 %v4631_v5, %v3251_v51 }
 0x91c   :  { %3269 = vmatpush1.bf16.msra.mxu0 %v6502_v18  ;;  %4332 = vmatpush3.bf16.msra.mxu1 %v6505_v48  ;;  %v3384_v18 = vld [vmem:[#allocation11 + $0x78] sm:$0xff]  ;;  %v3382_v48 = vld [vmem:[#allocation11 + $0x68] sm:$0xff] }
 0x91d   :  { %3270 = vmatprep.subr.bf16.mxu0 %v6508_v45  ;;  %4333 = vmatprep.subr.bf16.mxu1 %v6926_v4  ;;  %v3254_v19 = vadd.f32 %v3253_v30, %v3252_v21  ;;  %v3381_v45 = vld [vmem:[#allocation11 + $0x60] sm:$0xff] }
 0x91f   :  { %v3255_v56 = vpack.c.bf16 %v3254_v19, %v3254_v19  ;;  %v3624_v19 = vld [vmem:[%s6686_s10] ss:$0 sm:$0xff] }
 0x920   :  { %3271 = vmatpush1.bf16.msra.mxu0 %v6516_v39  ;;  %4334 = vmatpush3.bf16.msra.mxu1 %v6519_v52  ;;  %v3380_v39 = vld [vmem:[#allocation11 + $0x58] sm:$0xff]  ;;  %v3379_v52 = vld [vmem:[#allocation11 + $0x50] sm:$0xff] }
 0x921   :  { %4339 = vmatprep.subr.mxu0 %v6926_v4 }
 0x923   :  { %3289 = vmatmul.mubr.bf16.vlgmr.msra.gmra.mxu0 %v3255_v56  ;;  %4336 = vmatmul.mubr.bf16.vlgmr.msra.gmra.mxu1 %v3255_v56 }
 0x924   :  { %4371 = vmatprep.mubr.msk.f32.mxu0 %vm4914_vm1, %v6926_v4  ;;  %4340 = vmatpush3.msra.mxu0 %v3384_v18 }
 0x925   :  { %4341 = vmatprep.subr.mxu0 %v6926_v4 }
 0x926   :  { %4342 = vmatpush3.msra.mxu0 %v3383_v62 }
 0x927   :  { %4343 = vmatprep.subr.mxu0 %v6926_v4 }
 0x928   :  { %4344 = vmatpush3.msra.mxu0 %v3382_v48 }
 0x929   :  { %4345 = vmatprep.subr.mxu0 %v6926_v4 }
 0x92a   :  { %4346 = vmatpush3.msra.mxu0 %v3381_v45 }
 0x92b   :  { %4347 = vmatprep.subr.mxu0 %v6926_v4 }
 0x92c   :  { %4348 = vmatpush3.msra.mxu0 %v3380_v39 }
 0x92d   :  { %4349 = vmatprep.subr.mxu0 %v6926_v4 }
 0x92e   :  { %4350 = vmatpush3.msra.mxu0 %v3379_v52 }
 0x92f   :  { %4351 = vmatprep.subr.mxu0 %v6926_v4 }
 0x930   :  { %4352 = vmatpush3.msra.mxu0 %v3378_v58 }
 0x931   :  { %4353 = vmatprep.subr.mxu0 %v6926_v4 }
 0x932   :  { %4354 = vmatpush3.msra.mxu0 %v3377_v37 }
 0x933   :  { %4355 = vmatprep.subr.mxu0 %v6926_v4 }
 0x934   :  { %4356 = vmatpush3.msra.mxu0 %v3376_v17 }
 0x935   :  { %4357 = vmatprep.subr.mxu0 %v6926_v4 }
 0x936   :  { %4358 = vmatpush3.msra.mxu0 %v3375_v20 }
 0x937   :  { %4359 = vmatprep.subr.mxu0 %v6926_v4 }
 0x938   :  { %4360 = vmatpush3.msra.mxu0 %v3374_v14 }
 0x939   :  { %4361 = vmatprep.subr.mxu0 %v6926_v4 }
 0x93a   :  { %4362 = vmatpush3.msra.mxu0 %v3373_v11 }
 0x93b   :  { %4363 = vmatprep.subr.mxu0 %v6926_v4 }
 0x93c   :  { %4364 = vmatpush3.msra.mxu0 %v3372_v59 }
 0x93d   :  { %4365 = vmatprep.subr.mxu0 %v6926_v4 }
 0x93e   :  { %4366 = vmatpush3.msra.mxu0 %v3371_v40 }
 0x93f   :  { %4367 = vmatprep.subr.mxu0 %v6926_v4 }
 0x940   :  { %4368 = vmatpush3.msra.mxu0 %v3370_v61 }
 0x941   :  { %4369 = vmatprep.subr.mxu0 %v6926_v4 }
 0x942   :  { %4370 = vmatpush3.msra.mxu0 %v3369_v7 }
 0x9c3   :  { %v3179_v0 = vpop.f32.mrf.mxu0  ;;  %v3220_v25 = vpop.f32.mrf.mxu1 }
 0x9c5   :  { %v3181_v9 = vpop.f32.mrf.mxu0  ;;  %v4317_v35 = vpop.f32.mrf.mxu1 }
 0x9c7   :  { %v3183_v22 = vpop.f32.mrf.mxu0  ;;  %v3223_v8 = vpop.f32.mrf.mxu1 }
 0x9c9   :  { %v3184_v41 = vpop.f32.mrf.mxu0  ;;  %v4318_v38 = vpop.f32.mrf.mxu1 }
 0x9e3   :  { %v3290_v28 = vpop.f32.mrf.mxu0  ;;  %v3331_v32 = vpop.f32.mrf.mxu1 }
 0x9e4   :  { %v3291_v24 = vadd.f32 %v3290_v28, %v7122_v31  ;;  %v3351_v31 = vadd.f32 %v6600_v34, %v3220_v25  ;;  %v3332_v2 = vadd.f32 %v3331_v32, %v5547_v36 }
 0x9e5   :  { %v3292_v33 = vpop.f32.mrf.mxu0  ;;  %v4337_v1 = vpop.f32.mrf.mxu1 }
 0x9e6   :  { %v3337_v44 = vadd.f32 %v3291_v24, %v3179_v0  ;;  %v3293_v4 = vadd.f32 %v3292_v33, %v5536_v3 }
 0x9e7   :  { %v3294_v46 = vpop.f32.mrf.mxu0  ;;  %v3334_v16 = vpop.f32.mrf.mxu1 }
 0x9e8   :  { %v3621_v42 = vmul.f32 -1.442695, %v3337_v44  ;;  %v3344_v27 = vadd.f32 %v3293_v4, %v3181_v9 }
 0x9e9   :  { %v3295_v43 = vpop.f32.mrf.mxu0  ;;  %v4338_v15 = vpop.f32.mrf.mxu1 }
 0x9ea   :  { %4632 = vpow2.f32 %v3621_v42  ;;  %v3622_v55 = vmul.f32 -1.442695, %v3344_v27 }
 0x9ec   :  { %4634 = vpow2.f32 %v3622_v55 }
 0x9f7   :  { %v4633_v57 = vpop.eup %4632 }
 0x9f8   :  { %v3341_v63 = vadd.f32 1.0, %v4633_v57 }
 0x9f9   :  { %v4635_v10 = vpop.eup %4634 }
 0x9fa   :  { %4636 = vrcp.f32 %v3341_v63  ;;  %v3348_v23 = vadd.f32 1.0, %v4635_v10 }
 0x9fc   :  { %4638 = vrcp.f32 %v3348_v23 }
 0xa07   :  { %v4637_v60 = vpop.eup %4636 }
 0xa08   :  { %v3352_v29 = vmul.f32 %v4637_v60, %v3351_v31 }
 0xa09   :  { %v4639_v3 = vpop.eup %4638 }
 0xa0a   :  { %v3353_v53 = vadd.f32 %v3352_v29, %v3332_v2  ;;  %v3355_v26 = vsub.f32 1.0, %v4639_v3  ;;  %v3357_v49 = vmul.f32 %v4639_v3, %v6606_v47 }
 0xa0c   :  { %4640 = vtanh.f32 %v3353_v53 }
 0xa19   :  { %v4641_v12 = vpop.eup %4640 }
 0xa1a   :  { %v3356_v50 = vmul.f32 %v4641_v12, %v3355_v26 }
 0xa1c   :  { %v3358_v54 = vadd.f32 %v3357_v49, %v3356_v50 }
 0xa1e   :  { %v3361_v51 = vadd.f32 %v3360_v6, %v3358_v54 }
 0xa20   :  { %v3623_v5 = vmul.f32 -1.442695, %v3361_v51 }
 0xa22   :  { %4642 = vpow2.f32 %v3623_v5 }
 0xa2f   :  { %v4643_v34 = vpop.eup %4642 }
 0xa30   :  { %v3365_v21 = vadd.f32 1.0, %v4643_v34 }
 0xa32   :  { %4644 = vrcp.f32 %v3365_v21 }
 0xa3f   :  { %v4645_v36 = vpop.eup %4644 }
 0xa40   :  { %v3368_v30 = vmul.f32 %v4645_v36, %v3361_v51 }
 0xa42   :  { %4372 = vmatmul.mubr.f32.vlgmr.msra.gmra.mxu0 %v3368_v30 }
 0xb02   :  { %v3458_v56 = vpop.f32.mrf.mxu0 }
 0xb03   :  { %v3459_v47 = vadd.f32 %v3624_v19, %v3458_v56 }
 0xb04   :  { %v4373_v18 = vpop.f32.mrf.mxu0 }
 0xb05   :  { %3462 = vst [vmem:[#allocation13] sm:$0xff] %v3459_v47 }
 0xb06   :  { %4885 = shalt.err (!%p4882_p10)
}
 0xb07   :  { %3472 = dma.vmem_to_hbm [thread:$0]  %s3470_s0, 128, %s6687_s11, [#allocation7]  }
 0xb08   :  { %4902 = dma.done.wait [#allocation7], 128  }
 0xb09   :  { %4903 = vsyncadd [#allocation7], 4294967168 }
 0xb0a   :  { %3476 = vsyncpa [#allocation6], 1 }
 0xb0b   :  { %3477 = vsyncpa [#allocation9], 1 }
 0xb0c   :  { %3478 = vsyncpa [#allocation12], 1 }
 0xb0d   :  { %3479 = vsyncpa [#allocation7], 1 }
 0xb0e   :  { %3480 = vsyncmov [#allocation4] }
 0xb11   :  { %s3481_s10 = vpop.sfrf %3480 }
 0xb12   :  { %p3625_p11 = scmp.ne.s32.totalorder %s3481_s10, 0 }
 0xb14   :  { %3485 = shalt.err (%p3625_p11)  }

</bundles_post_ra>
